<compile_context>
chip_gen: v5e
topology: v5e:2x2
jax: 0.10.0
libtpu: 0.0.40
codegen_flags: <defaults>
</compile_context>

<pallas_src>
import jax
import jax.numpy as jnp
from jax import lax
from jax.experimental import pallas as pl
from jax.experimental.pallas import tpu as pltpu


def _round_up(x, m):
    return ((x + m - 1) // m) * m


# ---------------------------------------------------------------------------
# Fused Pallas kernel: all LSTM layers (both directions) + final Linear.
# ---------------------------------------------------------------------------

def make_fused_kernel(*, n_layers, bidirectional, T, Bp, H, Gp):
    num_dirs = 2 if bidirectional else 1

    def kernel(*refs):
        it = iter(refs)
        x_ref = next(it)                                    # (T*Bp, E) bf16
        layer_w = [[(next(it), next(it), next(it)) for _ in range(num_dirs)]
                   for _ in range(n_layers)]                # (Din,Gp)bf16,(H,Gp)bf16,(1,Gp)f32
        fcw_refs = [next(it) for _ in range(num_dirs)]      # (H, Op) bf16 each
        fcb_ref = next(it)                                  # (1, Op) f32
        out_ref = next(it)                                  # (Bp, Op) f32
        seq_ref = next(it)                                  # (T*Bp, num_dirs*H) f32 scratch
        gxf_ref = next(it)                                  # (T*Bp, Gp) f32 scratch
        gxb_ref = next(it) if bidirectional else None       # (T*Bp, Gp) f32 scratch

        def cell(gates, c):
            # PyTorch gate order i, f, g, o packed contiguously in [0, 4H).
            i_g = jax.nn.sigmoid(gates[:, 0 * H:1 * H])
            f_g = jax.nn.sigmoid(gates[:, 1 * H:2 * H])
            g_g = jnp.tanh(gates[:, 2 * H:3 * H])
            o_g = jax.nn.sigmoid(gates[:, 3 * H:4 * H])
            c_new = f_g * c + i_g * g_g
            h_new = o_g * jnp.tanh(c_new)
            return h_new, c_new

        def run_layer(layer_idx, inp_ref):
            is_last = layer_idx == n_layers - 1
            wih_f, whh_f, b_f = layer_w[layer_idx][0]
            if bidirectional:
                wih_b, whh_b, b_b = layer_w[layer_idx][1]

            # (a) Hoisted input projection (+ folded bias) for the whole
            #     sequence: one bf16 MXU GEMM per direction; f32 accumulate.
            xs = inp_ref[...].astype(jnp.bfloat16)           # (T*Bp, Din)
            gxf_ref[...] = (
                jnp.dot(xs, wih_f[...], preferred_element_type=jnp.float32)
                + b_f[...])
            if bidirectional:
                gxb_ref[...] = (
                    jnp.dot(xs, wih_b[...], preferred_element_type=jnp.float32)
                    + b_b[...])

            # (b) Recurrence: only h @ W_hh stays on the serial critical path.
            #     W_hh is re-read from VMEM each step (no long vreg live range).
            def step(t, carry):
                h_f, c_f, h_b, c_b = carry
                row = pl.multiple_of(t * Bp, Bp)
                gates_f = gxf_ref[pl.ds(row, Bp), :] + jnp.dot(
                    h_f.astype(jnp.bfloat16), whh_f[...],
                    preferred_element_type=jnp.float32)
                h_f, c_f = cell(gates_f, c_f)
                if not is_last:
                    seq_ref[pl.ds(row, Bp), pl.ds(0, H)] = h_f
                if bidirectional:
                    rrow = pl.multiple_of((T - 1 - t) * Bp, Bp)
                    gates_b = gxb_ref[pl.ds(rrow, Bp), :] + jnp.dot(
                        h_b.astype(jnp.bfloat16), whh_b[...],
                        preferred_element_type=jnp.float32)
                    h_b, c_b = cell(gates_b, c_b)
                    if not is_last:
                        seq_ref[pl.ds(rrow, Bp), pl.ds(H, H)] = h_b
                return (h_f, c_f, h_b, c_b)

            zeros = jnp.zeros((Bp, H), jnp.float32)
            h_f, _c_f, h_b, _c_b = lax.fori_loop(
                0, T, step, (zeros, zeros, zeros, zeros), unroll=8)
            return h_f, h_b

        # Layer 0 reads the embedded input; later layers read the previous
        # layer's sequence output, which stays resident in VMEM scratch.
        # (seq_ref is fully consumed into gxf/gxb before the recurrence
        #  overwrites it, so in-place reuse across layers is safe.)
        h_f, h_b = run_layer(0, x_ref)
        for layer_idx in range(1, n_layers):
            h_f, h_b = run_layer(layer_idx, seq_ref)

        # torch.cat((hidden[-2], hidden[-1]), dim=1) @ W_fc^T + b, expressed as
        # two dots into one accumulator (no lane concat).
        out = jnp.dot(h_f.astype(jnp.bfloat16), fcw_refs[0][...],
                      preferred_element_type=jnp.float32)
        if bidirectional:
            out = out + jnp.dot(h_b.astype(jnp.bfloat16), fcw_refs[1][...],
                                preferred_element_type=jnp.float32)
        out_ref[...] = out + fcb_ref[...]

    return kernel


# ---------------------------------------------------------------------------
# Parameters: PyTorch-layout init + host-side packing (pre-transpose + pad).
# ---------------------------------------------------------------------------

def init_params(key, vocab_size, embed_dim, hidden_dim, output_dim,
                n_layers, bidirectional):
    """Deterministic synthetic parameters with the PyTorch module's layouts."""
    num_dirs = 2 if bidirectional else 1
    keys = jax.random.split(key, 3 + 4 * n_layers * num_dirs)
    kit = iter(keys)

    params = {"embedding": jax.random.normal(
        next(kit), (vocab_size, embed_dim), jnp.float32) * 0.1}

    lstm = []
    for layer in range(n_layers):
        in_dim = embed_dim if layer == 0 else hidden_dim * num_dirs
        dirs = []
        for _d in range(num_dirs):
            w_ih = jax.random.normal(next(kit), (4 * hidden_dim, in_dim),
                                     jnp.float32) * 0.1
            w_hh = jax.random.normal(next(kit), (4 * hidden_dim, hidden_dim),
                                     jnp.float32) * 0.1
            b_ih = jax.random.normal(next(kit), (4 * hidden_dim,),
                                     jnp.float32) * 0.1
            b_hh = jax.random.normal(next(kit), (4 * hidden_dim,),
                                     jnp.float32) * 0.1
            dirs.append((w_ih, w_hh, b_ih, b_hh))
        lstm.append(dirs)
    params["lstm"] = lstm

    params["fc_w"] = jax.random.normal(
        next(kit), (output_dim, hidden_dim * num_dirs), jnp.float32) * 0.1
    params["fc_b"] = jax.random.normal(
        next(kit), (output_dim,), jnp.float32) * 0.1
    return params


def pack_params(params, *, embed_dim, hidden_dim, output_dim, n_layers,
                bidirectional):
    """Pre-transpose, pad the 4H gate axis to Gp, and cast MXU operands to bf16."""
    num_dirs = 2 if bidirectional else 1
    H = hidden_dim
    Gp = _round_up(4 * H, 128)       # concatenated gate axis, padded once
    Op = _round_up(output_dim, 128)  # lane-dense FC output

    def pad_gate_axis(w_t):
        # (rows, 4H) -> (rows, Gp): gates stay contiguous (i,f,g,o), pad tail.
        return jnp.pad(w_t, ((0, 0), (0, Gp - 4 * H)))

    packed_layers = []
    for layer in range(n_layers):
        dirs = []
        for d in range(num_dirs):
            w_ih, w_hh, b_ih, b_hh = params["lstm"][layer][d]
            wih_p = pad_gate_axis(w_ih.T).astype(jnp.bfloat16)   # (Din, Gp)
            whh_p = pad_gate_axis(w_hh.T).astype(jnp.bfloat16)   # (H, Gp)
            b_p = pad_gate_axis((b_ih + b_hh)[None, :])          # (1, Gp) f32
            dirs.append((wih_p, whh_p, b_p))
        packed_layers.append(dirs)

    fc_w_t = params["fc_w"].T                                    # (num_dirs*H, O)
    fcw_dirs = []
    for d in range(num_dirs):
        blk = jnp.zeros((H, Op), jnp.float32).at[:, :output_dim].set(
            fc_w_t[d * H:(d + 1) * H, :])
        fcw_dirs.append(blk.astype(jnp.bfloat16))
    fcb_p = jnp.zeros((1, Op), jnp.float32).at[0, :output_dim].set(
        params["fc_b"])

    return {
        "embedding": params["embedding"],
        "layers": packed_layers,
        "fc_w_dirs": fcw_dirs,
        "fc_b": fcb_p,
        "dims": dict(E=embed_dim, H=H, Gp=Gp, O=output_dim, Op=Op,
                     n_layers=n_layers, bidirectional=bidirectional,
                     num_dirs=num_dirs),
    }


# ---------------------------------------------------------------------------
# Forward pass
# ---------------------------------------------------------------------------

def rnn_text_classifier_forward(packed, tokens):
    """tokens: (B, T) int32 -> logits (B, output_dim). Eval-mode semantics."""
    dims = packed["dims"]
    E, H, Gp, O, Op = dims["E"], dims["H"], dims["Gp"], dims["O"], dims["Op"]
    n_layers, bidirectional = dims["n_layers"], dims["bidirectional"]
    num_dirs = dims["num_dirs"]
    B, T = tokens.shape
    Bp = _round_up(B, 8)                                     # sublane-dense batch

    # Embedding lookup (gather) stays as host-side glue; dropout is identity.
    # No embed-dim padding: x is passed as (T*Bp, E) and tiled implicitly.
    emb = jnp.take(packed["embedding"], tokens, axis=0)      # (B, T, E)
    x = jnp.transpose(emb, (1, 0, 2))                        # time-major (T, B, E)
    x = jnp.pad(x, ((0, 0), (0, Bp - B), (0, 0)))            # batch pad only
    x = x.reshape(T * Bp, E).astype(jnp.bfloat16)            # bf16 MXU operand

    inputs = [x]
    for layer in packed["layers"]:
        for (wih, whh, b) in layer:
            inputs += [wih, whh, b]
    inputs += list(packed["fc_w_dirs"]) + [packed["fc_b"]]

    kernel = make_fused_kernel(n_layers=n_layers, bidirectional=bidirectional,
                               T=T, Bp=Bp, H=H, Gp=Gp)

    scratch = [
        pltpu.VMEM((T * Bp, num_dirs * H), jnp.float32),     # layer seq output
        pltpu.VMEM((T * Bp, Gp), jnp.float32),               # fwd gate pre-acts
    ]
    if bidirectional:
        scratch.append(pltpu.VMEM((T * Bp, Gp), jnp.float32))  # bwd pre-acts

    # Explicit VMEM budget: actual weights + activations + O(T) scratch, 2x
    # headroom, clamped to stay within every generation's physical VMEM.
    def nbytes(a):
        return a.size * a.dtype.itemsize
    needed = sum(nbytes(a) for a in inputs) + Bp * Op * 4
    needed += T * Bp * (num_dirs * H + num_dirs * Gp) * 4
    vmem_limit = int(min(max(2 * needed + (1 << 20), 32 << 20), 64 << 20))

    vmem_spec = pl.BlockSpec(memory_space=pltpu.MemorySpace.VMEM)
    logits_p = pl.pallas_call(
        kernel,
        out_shape=jax.ShapeDtypeStruct((Bp, Op), jnp.float32),
        in_specs=[vmem_spec] * len(inputs),
        out_specs=vmem_spec,
        scratch_shapes=scratch,
        compiler_params=pltpu.CompilerParams(vmem_limit_bytes=vmem_limit),
    )(*inputs)
    return logits_p[:B, :O]


# ---------------------------------------------------------------------------
# Pure-JAX reference (mirrors PyTorch eval-mode forward) for self-check.
# ---------------------------------------------------------------------------

def reference_forward(params, tokens, *, hidden_dim, n_layers, bidirectional):
    H = hidden_dim
    emb = jnp.take(params["embedding"], tokens, axis=0)      # (B, T, E)
    x = jnp.transpose(emb, (1, 0, 2))                        # (T, B, E)

    def run_dir(x_seq, w_ih, w_hh, b_ih, b_hh):
        Bn = x_seq.shape[1]

        def step(carry, x_t):
            h, c = carry
            gates = x_t @ w_ih.T + h @ w_hh.T + b_ih + b_hh
            i = jax.nn.sigmoid(gates[:, 0 * H:1 * H])
            f = jax.nn.sigmoid(gates[:, 1 * H:2 * H])
            g = jnp.tanh(gates[:, 2 * H:3 * H])
            o = jax.nn.sigmoid(gates[:, 3 * H:4 * H])
            c = f * c + i * g
            h = o * jnp.tanh(c)
            return (h, c), h

        init = (jnp.zeros((Bn, H), jnp.float32), jnp.zeros((Bn, H), jnp.float32))
        (h, _c), out = lax.scan(step, init, x_seq)
        return out, h

    h_f_last = h_b_last = None
    for layer in range(n_layers):
        w_ih, w_hh, b_ih, b_hh = params["lstm"][layer][0]
        out_f, h_f_last = run_dir(x, w_ih, w_hh, b_ih, b_hh)
        if bidirectional:
            w_ih, w_hh, b_ih, b_hh = params["lstm"][layer][1]
            out_b_rev, h_b_last = run_dir(x[::-1], w_ih, w_hh, b_ih, b_hh)
            x = jnp.concatenate([out_f, out_b_rev[::-1]], axis=-1)
        else:
            x = out_f
    hidden = (jnp.concatenate([h_f_last, h_b_last], axis=1)
              if bidirectional else h_f_last)
    return hidden @ params["fc_w"].T + params["fc_b"][None, :]


# ---------------------------------------------------------------------------

if __name__ == "__main__":
    VOCAB_SIZE = 50
    EMBED_DIM = 16
    HIDDEN_DIM = 32
    OUTPUT_DIM = 4
    N_LAYERS = 2
    BIDIRECTIONAL = True

    BATCH = 2
    SEQ = 8

    key = jax.random.PRNGKey(0)
    k_params, k_tokens = jax.random.split(key)

    params = init_params(k_params, VOCAB_SIZE, EMBED_DIM, HIDDEN_DIM,
                         OUTPUT_DIM, N_LAYERS, BIDIRECTIONAL)
    packed = pack_params(params, embed_dim=EMBED_DIM, hidden_dim=HIDDEN_DIM,
                         output_dim=OUTPUT_DIM, n_layers=N_LAYERS,
                         bidirectional=BIDIRECTIONAL)
    tokens = jax.random.randint(k_tokens, (BATCH, SEQ), 0, VOCAB_SIZE,
                                dtype=jnp.int32)

    logits = rnn_text_classifier_forward(packed, tokens)
    logits = jax.block_until_ready(logits)
    assert logits.shape == (BATCH, OUTPUT_DIM)

    ref = reference_forward(params, tokens, hidden_dim=HIDDEN_DIM,
                            n_layers=N_LAYERS, bidirectional=BIDIRECTIONAL)
    ref = jax.block_until_ready(ref)
    # bf16 MXU operands (f32 accumulation) -> slightly looser tolerance.
    assert float(jnp.max(jnp.abs(logits - ref))) < 3e-2

    print("KERNEL_OK")
</pallas_src>

<mosaic_0001>
module attributes {stable_mosaic.version = 11 : i64} {
  func.func @kernel(%arg0: memref<64x16xbf16, #tpu.memory_space<vmem>>, %arg1: memref<16x128xbf16, #tpu.memory_space<vmem>>, %arg2: memref<32x128xbf16, #tpu.memory_space<vmem>>, %arg3: memref<1x128xf32, #tpu.memory_space<vmem>>, %arg4: memref<16x128xbf16, #tpu.memory_space<vmem>>, %arg5: memref<32x128xbf16, #tpu.memory_space<vmem>>, %arg6: memref<1x128xf32, #tpu.memory_space<vmem>>, %arg7: memref<64x128xbf16, #tpu.memory_space<vmem>>, %arg8: memref<32x128xbf16, #tpu.memory_space<vmem>>, %arg9: memref<1x128xf32, #tpu.memory_space<vmem>>, %arg10: memref<64x128xbf16, #tpu.memory_space<vmem>>, %arg11: memref<32x128xbf16, #tpu.memory_space<vmem>>, %arg12: memref<1x128xf32, #tpu.memory_space<vmem>>, %arg13: memref<32x128xbf16, #tpu.memory_space<vmem>>, %arg14: memref<32x128xbf16, #tpu.memory_space<vmem>>, %arg15: memref<1x128xf32, #tpu.memory_space<vmem>>, %arg16: memref<8x128xf32, #tpu.memory_space<vmem>>, %arg17: memref<64x64xf32, #tpu.memory_space<vmem>>, %arg18: memref<64x128xf32, #tpu.memory_space<vmem>>, %arg19: memref<64x128xf32, #tpu.memory_space<vmem>>) attributes {dimension_semantics = [], scalar_prefetch = 0 : i64, scratch_operands = 3 : i64, tpu.core_type = #tpu.core_type<tc>} {
    %c0 = arith.constant 0 : index
    %c0_0 = arith.constant 0 : index
    %0 = vector.load %arg0[%c0, %c0_0] : memref<64x16xbf16, #tpu.memory_space<vmem>>, vector<64x16xbf16>
    %c0_1 = arith.constant 0 : index
    %c0_2 = arith.constant 0 : index
    %1 = vector.load %arg1[%c0_1, %c0_2] : memref<16x128xbf16, #tpu.memory_space<vmem>>, vector<16x128xbf16>
    %cst = arith.constant dense<0.000000e+00> : vector<64x128xf32>
    %2 = tpu.matmul %0, %1, %cst {dimension_numbers = #tpu.dot_dimension_numbers<[1], [0], [0], [1], [0, 0, 1, 1], [], []>} : vector<64x16xbf16>, vector<16x128xbf16>, vector<64x128xf32> -> vector<64x128xf32>
    %c0_3 = arith.constant 0 : index
    %c0_4 = arith.constant 0 : index
    %3 = vector.load %arg3[%c0_3, %c0_4] : memref<1x128xf32, #tpu.memory_space<vmem>>, vector<1x128xf32>
    %4 = vector.broadcast %3 : vector<1x128xf32> to vector<64x128xf32>
    %5 = arith.addf %2, %4 : vector<64x128xf32>
    %c0_5 = arith.constant 0 : index
    %c0_6 = arith.constant 0 : index
    %6 = vector.load %arg18[%c0_5, %c0_6] : memref<64x128xf32, #tpu.memory_space<vmem>>, vector<64x128xf32>
    tpu.vector_store %arg18[%c0_5, %c0_6], %5 {strides = array<i32>} : memref<64x128xf32, #tpu.memory_space<vmem>>, vector<64x128xf32>,
    %c0_7 = arith.constant 0 : index
    %c0_8 = arith.constant 0 : index
    %7 = vector.load %arg4[%c0_7, %c0_8] : memref<16x128xbf16, #tpu.memory_space<vmem>>, vector<16x128xbf16>
    %cst_9 = arith.constant dense<0.000000e+00> : vector<64x128xf32>
    %8 = tpu.matmul %0, %7, %cst_9 {dimension_numbers = #tpu.dot_dimension_numbers<[1], [0], [0], [1], [0, 0, 1, 1], [], []>} : vector<64x16xbf16>, vector<16x128xbf16>, vector<64x128xf32> -> vector<64x128xf32>
    %c0_10 = arith.constant 0 : index
    %c0_11 = arith.constant 0 : index
    %9 = vector.load %arg6[%c0_10, %c0_11] : memref<1x128xf32, #tpu.memory_space<vmem>>, vector<1x128xf32>
    %10 = vector.broadcast %9 : vector<1x128xf32> to vector<64x128xf32>
    %11 = arith.addf %8, %10 : vector<64x128xf32>
    %c0_12 = arith.constant 0 : index
    %c0_13 = arith.constant 0 : index
    %12 = vector.load %arg19[%c0_12, %c0_13] : memref<64x128xf32, #tpu.memory_space<vmem>>, vector<64x128xf32>
    tpu.vector_store %arg19[%c0_12, %c0_13], %11 {strides = array<i32>} : memref<64x128xf32, #tpu.memory_space<vmem>>, vector<64x128xf32>,
    %cst_14 = arith.constant 0.000000e+00 : f32
    %13 = vector.broadcast %cst_14 : f32 to vector<8x32xf32>
    %c0_i32 = arith.constant 0 : i32
    %c8_i32 = arith.constant 8 : i32
    %14 = arith.muli %c0_i32, %c8_i32 : i32
    %15 = tpu.assume_multiple %14, 8 : i32
    %16 = arith.index_cast %15 : i32 to index
    %c0_15 = arith.constant 0 : index
    %17 = vector.load %arg18[%16, %c0_15] : memref<64x128xf32, #tpu.memory_space<vmem>>, vector<8x128xf32>
    %18 = arith.truncf %13 : vector<8x32xf32> to vector<8x32xbf16>
    %c0_16 = arith.constant 0 : index
    %c0_17 = arith.constant 0 : index
    %19 = vector.load %arg2[%c0_16, %c0_17] : memref<32x128xbf16, #tpu.memory_space<vmem>>, vector<32x128xbf16>
    %cst_18 = arith.constant dense<0.000000e+00> : vector<8x128xf32>
    %20 = tpu.matmul %18, %19, %cst_18 {dimension_numbers = #tpu.dot_dimension_numbers<[1], [0], [0], [1], [0, 0, 1, 1], [], []>} : vector<8x32xbf16>, vector<32x128xbf16>, vector<8x128xf32> -> vector<8x128xf32>
    %21 = arith.addf %17, %20 : vector<8x128xf32>
    %22 = vector.extract_strided_slice %21 {offsets = [0, 0], sizes = [8, 32], strides = [1, 1]} : vector<8x128xf32> to vector<8x32xf32>
    %23 = arith.negf %22 : vector<8x32xf32>
    %24 = math.exp %23 : vector<8x32xf32>
    %cst_19 = arith.constant 1.000000e+00 : f32
    %25 = vector.broadcast %cst_19 : f32 to vector<8x32xf32>
    %26 = arith.addf %25, %24 : vector<8x32xf32>
    %27 = arith.divf %25, %26 : vector<8x32xf32>
    %28 = vector.extract_strided_slice %21 {offsets = [0, 32], sizes = [8, 32], strides = [1, 1]} : vector<8x128xf32> to vector<8x32xf32>
    %29 = arith.negf %28 : vector<8x32xf32>
    %30 = math.exp %29 : vector<8x32xf32>
    %cst_20 = arith.constant 1.000000e+00 : f32
    %31 = vector.broadcast %cst_20 : f32 to vector<8x32xf32>
    %32 = arith.addf %31, %30 : vector<8x32xf32>
    %33 = arith.divf %31, %32 : vector<8x32xf32>
    %34 = vector.extract_strided_slice %21 {offsets = [0, 64], sizes = [8, 32], strides = [1, 1]} : vector<8x128xf32> to vector<8x32xf32>
    %35 = math.tanh %34 : vector<8x32xf32>
    %36 = vector.extract_strided_slice %21 {offsets = [0, 96], sizes = [8, 32], strides = [1, 1]} : vector<8x128xf32> to vector<8x32xf32>
    %37 = arith.negf %36 : vector<8x32xf32>
    %38 = math.exp %37 : vector<8x32xf32>
    %cst_21 = arith.constant 1.000000e+00 : f32
    %39 = vector.broadcast %cst_21 : f32 to vector<8x32xf32>
    %40 = arith.addf %39, %38 : vector<8x32xf32>
    %41 = arith.divf %39, %40 : vector<8x32xf32>
    %42 = arith.mulf %33, %13 : vector<8x32xf32>
    %43 = arith.mulf %27, %35 : vector<8x32xf32>
    %44 = arith.addf %42, %43 : vector<8x32xf32>
    %45 = math.tanh %44 : vector<8x32xf32>
    %46 = arith.mulf %41, %45 : vector<8x32xf32>
    %47 = arith.index_cast %15 : i32 to index
    %c0_22 = arith.constant 0 : index
    %48 = vector.load %arg17[%47, %c0_22] : memref<64x64xf32, #tpu.memory_space<vmem>>, vector<8x32xf32>
    tpu.vector_store %arg17[%47, %c0_22], %46 {strides = array<i32>} : memref<64x64xf32, #tpu.memory_space<vmem>>, vector<8x32xf32>,
    %c7_i32 = arith.constant 7 : i32
    %49 = arith.subi %c7_i32, %c0_i32 : i32
    %c8_i32_23 = arith.constant 8 : i32
    %50 = arith.muli %49, %c8_i32_23 : i32
    %51 = tpu.assume_multiple %50, 8 : i32
    %52 = arith.index_cast %51 : i32 to index
    %c0_24 = arith.constant 0 : index
    %53 = vector.load %arg19[%52, %c0_24] : memref<64x128xf32, #tpu.memory_space<vmem>>, vector<8x128xf32>
    %54 = arith.truncf %13 : vector<8x32xf32> to vector<8x32xbf16>
    %c0_25 = arith.constant 0 : index
    %c0_26 = arith.constant 0 : index
    %55 = vector.load %arg5[%c0_25, %c0_26] : memref<32x128xbf16, #tpu.memory_space<vmem>>, vector<32x128xbf16>
    %cst_27 = arith.constant dense<0.000000e+00> : vector<8x128xf32>
    %56 = tpu.matmul %54, %55, %cst_27 {dimension_numbers = #tpu.dot_dimension_numbers<[1], [0], [0], [1], [0, 0, 1, 1], [], []>} : vector<8x32xbf16>, vector<32x128xbf16>, vector<8x128xf32> -> vector<8x128xf32>
    %57 = arith.addf %53, %56 : vector<8x128xf32>
    %58 = vector.extract_strided_slice %57 {offsets = [0, 0], sizes = [8, 32], strides = [1, 1]} : vector<8x128xf32> to vector<8x32xf32>
    %59 = arith.negf %58 : vector<8x32xf32>
    %60 = math.exp %59 : vector<8x32xf32>
    %cst_28 = arith.constant 1.000000e+00 : f32
    %61 = vector.broadcast %cst_28 : f32 to vector<8x32xf32>
    %62 = arith.addf %61, %60 : vector<8x32xf32>
    %63 = arith.divf %61, %62 : vector<8x32xf32>
    %64 = vector.extract_strided_slice %57 {offsets = [0, 32], sizes = [8, 32], strides = [1, 1]} : vector<8x128xf32> to vector<8x32xf32>
    %65 = arith.negf %64 : vector<8x32xf32>
    %66 = math.exp %65 : vector<8x32xf32>
    %cst_29 = arith.constant 1.000000e+00 : f32
    %67 = vector.broadcast %cst_29 : f32 to vector<8x32xf32>
    %68 = arith.addf %67, %66 : vector<8x32xf32>
    %69 = arith.divf %67, %68 : vector<8x32xf32>
    %70 = vector.extract_strided_slice %57 {offsets = [0, 64], sizes = [8, 32], strides = [1, 1]} : vector<8x128xf32> to vector<8x32xf32>
    %71 = math.tanh %70 : vector<8x32xf32>
    %72 = vector.extract_strided_slice %57 {offsets = [0, 96], sizes = [8, 32], strides = [1, 1]} : vector<8x128xf32> to vector<8x32xf32>
    %73 = arith.negf %72 : vector<8x32xf32>
    %74 = math.exp %73 : vector<8x32xf32>
    %cst_30 = arith.constant 1.000000e+00 : f32
    %75 = vector.broadcast %cst_30 : f32 to vector<8x32xf32>
    %76 = arith.addf %75, %74 : vector<8x32xf32>
    %77 = arith.divf %75, %76 : vector<8x32xf32>
    %78 = arith.mulf %69, %13 : vector<8x32xf32>
    %79 = arith.mulf %63, %71 : vector<8x32xf32>
    %80 = arith.addf %78, %79 : vector<8x32xf32>
    %81 = math.tanh %80 : vector<8x32xf32>
    %82 = arith.mulf %77, %81 : vector<8x32xf32>
    %83 = arith.index_cast %51 : i32 to index
    %c32 = arith.constant 32 : index
    %84 = vector.load %arg17[%83, %c32] : memref<64x64xf32, #tpu.memory_space<vmem>>, vector<8x32xf32>
    tpu.vector_store %arg17[%83, %c32], %82 {strides = array<i32>} : memref<64x64xf32, #tpu.memory_space<vmem>>, vector<8x32xf32>,
    %c1_i32 = arith.constant 1 : i32
    %c8_i32_31 = arith.constant 8 : i32
    %85 = arith.muli %c1_i32, %c8_i32_31 : i32
    %86 = tpu.assume_multiple %85, 8 : i32
    %87 = arith.index_cast %86 : i32 to index
    %c0_32 = arith.constant 0 : index
    %88 = vector.load %arg18[%87, %c0_32] : memref<64x128xf32, #tpu.memory_space<vmem>>, vector<8x128xf32>
    %89 = arith.truncf %46 : vector<8x32xf32> to vector<8x32xbf16>
    %c0_33 = arith.constant 0 : index
    %c0_34 = arith.constant 0 : index
    %90 = vector.load %arg2[%c0_33, %c0_34] : memref<32x128xbf16, #tpu.memory_space<vmem>>, vector<32x128xbf16>
    %cst_35 = arith.constant dense<0.000000e+00> : vector<8x128xf32>
    %91 = tpu.matmul %89, %90, %cst_35 {dimension_numbers = #tpu.dot_dimension_numbers<[1], [0], [0], [1], [0, 0, 1, 1], [], []>} : vector<8x32xbf16>, vector<32x128xbf16>, vector<8x128xf32> -> vector<8x128xf32>
    %92 = arith.addf %88, %91 : vector<8x128xf32>
    %93 = vector.extract_strided_slice %92 {offsets = [0, 0], sizes = [8, 32], strides = [1, 1]} : vector<8x128xf32> to vector<8x32xf32>
    %94 = arith.negf %93 : vector<8x32xf32>
    %95 = math.exp %94 : vector<8x32xf32>
    %cst_36 = arith.constant 1.000000e+00 : f32
    %96 = vector.broadcast %cst_36 : f32 to vector<8x32xf32>
    %97 = arith.addf %96, %95 : vector<8x32xf32>
    %98 = arith.divf %96, %97 : vector<8x32xf32>
    %99 = vector.extract_strided_slice %92 {offsets = [0, 32], sizes = [8, 32], strides = [1, 1]} : vector<8x128xf32> to vector<8x32xf32>
    %100 = arith.negf %99 : vector<8x32xf32>
    %101 = math.exp %100 : vector<8x32xf32>
    %cst_37 = arith.constant 1.000000e+00 : f32
    %102 = vector.broadcast %cst_37 : f32 to vector<8x32xf32>
    %103 = arith.addf %102, %101 : vector<8x32xf32>
    %104 = arith.divf %102, %103 : vector<8x32xf32>
    %105 = vector.extract_strided_slice %92 {offsets = [0, 64], sizes = [8, 32], strides = [1, 1]} : vector<8x128xf32> to vector<8x32xf32>
    %106 = math.tanh %105 : vector<8x32xf32>
    %107 = vector.extract_strided_slice %92 {offsets = [0, 96], sizes = [8, 32], strides = [1, 1]} : vector<8x128xf32> to vector<8x32xf32>
    %108 = arith.negf %107 : vector<8x32xf32>
    %109 = math.exp %108 : vector<8x32xf32>
    %cst_38 = arith.constant 1.000000e+00 : f32
    %110 = vector.broadcast %cst_38 : f32 to vector<8x32xf32>
    %111 = arith.addf %110, %109 : vector<8x32xf32>
    %112 = arith.divf %110, %111 : vector<8x32xf32>
    %113 = arith.mulf %104, %44 : vector<8x32xf32>
    %114 = arith.mulf %98, %106 : vector<8x32xf32>
    %115 = arith.addf %113, %114 : vector<8x32xf32>
    %116 = math.tanh %115 : vector<8x32xf32>
    %117 = arith.mulf %112, %116 : vector<8x32xf32>
    %118 = arith.index_cast %86 : i32 to index
    %c0_39 = arith.constant 0 : index
    %119 = vector.load %arg17[%118, %c0_39] : memref<64x64xf32, #tpu.memory_space<vmem>>, vector<8x32xf32>
    tpu.vector_store %arg17[%118, %c0_39], %117 {strides = array<i32>} : memref<64x64xf32, #tpu.memory_space<vmem>>, vector<8x32xf32>,
    %c7_i32_40 = arith.constant 7 : i32
    %120 = arith.subi %c7_i32_40, %c1_i32 : i32
    %c8_i32_41 = arith.constant 8 : i32
    %121 = arith.muli %120, %c8_i32_41 : i32
    %122 = tpu.assume_multiple %121, 8 : i32
    %123 = arith.index_cast %122 : i32 to index
    %c0_42 = arith.constant 0 : index
    %124 = vector.load %arg19[%123, %c0_42] : memref<64x128xf32, #tpu.memory_space<vmem>>, vector<8x128xf32>
    %125 = arith.truncf %82 : vector<8x32xf32> to vector<8x32xbf16>
    %c0_43 = arith.constant 0 : index
    %c0_44 = arith.constant 0 : index
    %126 = vector.load %arg5[%c0_43, %c0_44] : memref<32x128xbf16, #tpu.memory_space<vmem>>, vector<32x128xbf16>
    %cst_45 = arith.constant dense<0.000000e+00> : vector<8x128xf32>
    %127 = tpu.matmul %125, %126, %cst_45 {dimension_numbers = #tpu.dot_dimension_numbers<[1], [0], [0], [1], [0, 0, 1, 1], [], []>} : vector<8x32xbf16>, vector<32x128xbf16>, vector<8x128xf32> -> vector<8x128xf32>
    %128 = arith.addf %124, %127 : vector<8x128xf32>
    %129 = vector.extract_strided_slice %128 {offsets = [0, 0], sizes = [8, 32], strides = [1, 1]} : vector<8x128xf32> to vector<8x32xf32>
    %130 = arith.negf %129 : vector<8x32xf32>
    %131 = math.exp %130 : vector<8x32xf32>
    %cst_46 = arith.constant 1.000000e+00 : f32
    %132 = vector.broadcast %cst_46 : f32 to vector<8x32xf32>
    %133 = arith.addf %132, %131 : vector<8x32xf32>
    %134 = arith.divf %132, %133 : vector<8x32xf32>
    %135 = vector.extract_strided_slice %128 {offsets = [0, 32], sizes = [8, 32], strides = [1, 1]} : vector<8x128xf32> to vector<8x32xf32>
    %136 = arith.negf %135 : vector<8x32xf32>
    %137 = math.exp %136 : vector<8x32xf32>
    %cst_47 = arith.constant 1.000000e+00 : f32
    %138 = vector.broadcast %cst_47 : f32 to vector<8x32xf32>
    %139 = arith.addf %138, %137 : vector<8x32xf32>
    %140 = arith.divf %138, %139 : vector<8x32xf32>
    %141 = vector.extract_strided_slice %128 {offsets = [0, 64], sizes = [8, 32], strides = [1, 1]} : vector<8x128xf32> to vector<8x32xf32>
    %142 = math.tanh %141 : vector<8x32xf32>
    %143 = vector.extract_strided_slice %128 {offsets = [0, 96], sizes = [8, 32], strides = [1, 1]} : vector<8x128xf32> to vector<8x32xf32>
    %144 = arith.negf %143 : vector<8x32xf32>
    %145 = math.exp %144 : vector<8x32xf32>
    %cst_48 = arith.constant 1.000000e+00 : f32
    %146 = vector.broadcast %cst_48 : f32 to vector<8x32xf32>
    %147 = arith.addf %146, %145 : vector<8x32xf32>
    %148 = arith.divf %146, %147 : vector<8x32xf32>
    %149 = arith.mulf %140, %80 : vector<8x32xf32>
    %150 = arith.mulf %134, %142 : vector<8x32xf32>
    %151 = arith.addf %149, %150 : vector<8x32xf32>
    %152 = math.tanh %151 : vector<8x32xf32>
    %153 = arith.mulf %148, %152 : vector<8x32xf32>
    %154 = arith.index_cast %122 : i32 to index
    %c32_49 = arith.constant 32 : index
    %155 = vector.load %arg17[%154, %c32_49] : memref<64x64xf32, #tpu.memory_space<vmem>>, vector<8x32xf32>
    tpu.vector_store %arg17[%154, %c32_49], %153 {strides = array<i32>} : memref<64x64xf32, #tpu.memory_space<vmem>>, vector<8x32xf32>,
    %c2_i32 = arith.constant 2 : i32
    %c8_i32_50 = arith.constant 8 : i32
    %156 = arith.muli %c2_i32, %c8_i32_50 : i32
    %157 = tpu.assume_multiple %156, 8 : i32
    %158 = arith.index_cast %157 : i32 to index
    %c0_51 = arith.constant 0 : index
    %159 = vector.load %arg18[%158, %c0_51] : memref<64x128xf32, #tpu.memory_space<vmem>>, vector<8x128xf32>
    %160 = arith.truncf %117 : vector<8x32xf32> to vector<8x32xbf16>
    %c0_52 = arith.constant 0 : index
    %c0_53 = arith.constant 0 : index
    %161 = vector.load %arg2[%c0_52, %c0_53] : memref<32x128xbf16, #tpu.memory_space<vmem>>, vector<32x128xbf16>
    %cst_54 = arith.constant dense<0.000000e+00> : vector<8x128xf32>
    %162 = tpu.matmul %160, %161, %cst_54 {dimension_numbers = #tpu.dot_dimension_numbers<[1], [0], [0], [1], [0, 0, 1, 1], [], []>} : vector<8x32xbf16>, vector<32x128xbf16>, vector<8x128xf32> -> vector<8x128xf32>
    %163 = arith.addf %159, %162 : vector<8x128xf32>
    %164 = vector.extract_strided_slice %163 {offsets = [0, 0], sizes = [8, 32], strides = [1, 1]} : vector<8x128xf32> to vector<8x32xf32>
    %165 = arith.negf %164 : vector<8x32xf32>
    %166 = math.exp %165 : vector<8x32xf32>
    %cst_55 = arith.constant 1.000000e+00 : f32
    %167 = vector.broadcast %cst_55 : f32 to vector<8x32xf32>
    %168 = arith.addf %167, %166 : vector<8x32xf32>
    %169 = arith.divf %167, %168 : vector<8x32xf32>
    %170 = vector.extract_strided_slice %163 {offsets = [0, 32], sizes = [8, 32], strides = [1, 1]} : vector<8x128xf32> to vector<8x32xf32>
    %171 = arith.negf %170 : vector<8x32xf32>
    %172 = math.exp %171 : vector<8x32xf32>
    %cst_56 = arith.constant 1.000000e+00 : f32
    %173 = vector.broadcast %cst_56 : f32 to vector<8x32xf32>
    %174 = arith.addf %173, %172 : vector<8x32xf32>
    %175 = arith.divf %173, %174 : vector<8x32xf32>
    %176 = vector.extract_strided_slice %163 {offsets = [0, 64], sizes = [8, 32], strides = [1, 1]} : vector<8x128xf32> to vector<8x32xf32>
    %177 = math.tanh %176 : vector<8x32xf32>
    %178 = vector.extract_strided_slice %163 {offsets = [0, 96], sizes = [8, 32], strides = [1, 1]} : vector<8x128xf32> to vector<8x32xf32>
    %179 = arith.negf %178 : vector<8x32xf32>
    %180 = math.exp %179 : vector<8x32xf32>
    %cst_57 = arith.constant 1.000000e+00 : f32
    %181 = vector.broadcast %cst_57 : f32 to vector<8x32xf32>
    %182 = arith.addf %181, %180 : vector<8x32xf32>
    %183 = arith.divf %181, %182 : vector<8x32xf32>
    %184 = arith.mulf %175, %115 : vector<8x32xf32>
    %185 = arith.mulf %169, %177 : vector<8x32xf32>
    %186 = arith.addf %184, %185 : vector<8x32xf32>
    %187 = math.tanh %186 : vector<8x32xf32>
    %188 = arith.mulf %183, %187 : vector<8x32xf32>
    %189 = arith.index_cast %157 : i32 to index
    %c0_58 = arith.constant 0 : index
    %190 = vector.load %arg17[%189, %c0_58] : memref<64x64xf32, #tpu.memory_space<vmem>>, vector<8x32xf32>
    tpu.vector_store %arg17[%189, %c0_58], %188 {strides = array<i32>} : memref<64x64xf32, #tpu.memory_space<vmem>>, vector<8x32xf32>,
    %c7_i32_59 = arith.constant 7 : i32
    %191 = arith.subi %c7_i32_59, %c2_i32 : i32
    %c8_i32_60 = arith.constant 8 : i32
    %192 = arith.muli %191, %c8_i32_60 : i32
    %193 = tpu.assume_multiple %192, 8 : i32
    %194 = arith.index_cast %193 : i32 to index
    %c0_61 = arith.constant 0 : index
    %195 = vector.load %arg19[%194, %c0_61] : memref<64x128xf32, #tpu.memory_space<vmem>>, vector<8x128xf32>
    %196 = arith.truncf %153 : vector<8x32xf32> to vector<8x32xbf16>
    %c0_62 = arith.constant 0 : index
    %c0_63 = arith.constant 0 : index
    %197 = vector.load %arg5[%c0_62, %c0_63] : memref<32x128xbf16, #tpu.memory_space<vmem>>, vector<32x128xbf16>
    %cst_64 = arith.constant dense<0.000000e+00> : vector<8x128xf32>
    %198 = tpu.matmul %196, %197, %cst_64 {dimension_numbers = #tpu.dot_dimension_numbers<[1], [0], [0], [1], [0, 0, 1, 1], [], []>} : vector<8x32xbf16>, vector<32x128xbf16>, vector<8x128xf32> -> vector<8x128xf32>
    %199 = arith.addf %195, %198 : vector<8x128xf32>
    %200 = vector.extract_strided_slice %199 {offsets = [0, 0], sizes = [8, 32], strides = [1, 1]} : vector<8x128xf32> to vector<8x32xf32>
    %201 = arith.negf %200 : vector<8x32xf32>
    %202 = math.exp %201 : vector<8x32xf32>
    %cst_65 = arith.constant 1.000000e+00 : f32
    %203 = vector.broadcast %cst_65 : f32 to vector<8x32xf32>
    %204 = arith.addf %203, %202 : vector<8x32xf32>
    %205 = arith.divf %203, %204 : vector<8x32xf32>
    %206 = vector.extract_strided_slice %199 {offsets = [0, 32], sizes = [8, 32], strides = [1, 1]} : vector<8x128xf32> to vector<8x32xf32>
    %207 = arith.negf %206 : vector<8x32xf32>
    %208 = math.exp %207 : vector<8x32xf32>
    %cst_66 = arith.constant 1.000000e+00 : f32
    %209 = vector.broadcast %cst_66 : f32 to vector<8x32xf32>
    %210 = arith.addf %209, %208 : vector<8x32xf32>
    %211 = arith.divf %209, %210 : vector<8x32xf32>
    %212 = vector.extract_strided_slice %199 {offsets = [0, 64], sizes = [8, 32], strides = [1, 1]} : vector<8x128xf32> to vector<8x32xf32>
    %213 = math.tanh %212 : vector<8x32xf32>
    %214 = vector.extract_strided_slice %199 {offsets = [0, 96], sizes = [8, 32], strides = [1, 1]} : vector<8x128xf32> to vector<8x32xf32>
    %215 = arith.negf %214 : vector<8x32xf32>
    %216 = math.exp %215 : vector<8x32xf32>
    %cst_67 = arith.constant 1.000000e+00 : f32
    %217 = vector.broadcast %cst_67 : f32 to vector<8x32xf32>
    %218 = arith.addf %217, %216 : vector<8x32xf32>
    %219 = arith.divf %217, %218 : vector<8x32xf32>
    %220 = arith.mulf %211, %151 : vector<8x32xf32>
    %221 = arith.mulf %205, %213 : vector<8x32xf32>
    %222 = arith.addf %220, %221 : vector<8x32xf32>
    %223 = math.tanh %222 : vector<8x32xf32>
    %224 = arith.mulf %219, %223 : vector<8x32xf32>
    %225 = arith.index_cast %193 : i32 to index
    %c32_68 = arith.constant 32 : index
    %226 = vector.load %arg17[%225, %c32_68] : memref<64x64xf32, #tpu.memory_space<vmem>>, vector<8x32xf32>
    tpu.vector_store %arg17[%225, %c32_68], %224 {strides = array<i32>} : memref<64x64xf32, #tpu.memory_space<vmem>>, vector<8x32xf32>,
    %c3_i32 = arith.constant 3 : i32
    %c8_i32_69 = arith.constant 8 : i32
    %227 = arith.muli %c3_i32, %c8_i32_69 : i32
    %228 = tpu.assume_multiple %227, 8 : i32
    %229 = arith.index_cast %228 : i32 to index
    %c0_70 = arith.constant 0 : index
    %230 = vector.load %arg18[%229, %c0_70] : memref<64x128xf32, #tpu.memory_space<vmem>>, vector<8x128xf32>
    %231 = arith.truncf %188 : vector<8x32xf32> to vector<8x32xbf16>
    %c0_71 = arith.constant 0 : index
    %c0_72 = arith.constant 0 : index
    %232 = vector.load %arg2[%c0_71, %c0_72] : memref<32x128xbf16, #tpu.memory_space<vmem>>, vector<32x128xbf16>
    %cst_73 = arith.constant dense<0.000000e+00> : vector<8x128xf32>
    %233 = tpu.matmul %231, %232, %cst_73 {dimension_numbers = #tpu.dot_dimension_numbers<[1], [0], [0], [1], [0, 0, 1, 1], [], []>} : vector<8x32xbf16>, vector<32x128xbf16>, vector<8x128xf32> -> vector<8x128xf32>
    %234 = arith.addf %230, %233 : vector<8x128xf32>
    %235 = vector.extract_strided_slice %234 {offsets = [0, 0], sizes = [8, 32], strides = [1, 1]} : vector<8x128xf32> to vector<8x32xf32>
    %236 = arith.negf %235 : vector<8x32xf32>
    %237 = math.exp %236 : vector<8x32xf32>
    %cst_74 = arith.constant 1.000000e+00 : f32
    %238 = vector.broadcast %cst_74 : f32 to vector<8x32xf32>
    %239 = arith.addf %238, %237 : vector<8x32xf32>
    %240 = arith.divf %238, %239 : vector<8x32xf32>
    %241 = vector.extract_strided_slice %234 {offsets = [0, 32], sizes = [8, 32], strides = [1, 1]} : vector<8x128xf32> to vector<8x32xf32>
    %242 = arith.negf %241 : vector<8x32xf32>
    %243 = math.exp %242 : vector<8x32xf32>
    %cst_75 = arith.constant 1.000000e+00 : f32
    %244 = vector.broadcast %cst_75 : f32 to vector<8x32xf32>
    %245 = arith.addf %244, %243 : vector<8x32xf32>
    %246 = arith.divf %244, %245 : vector<8x32xf32>
    %247 = vector.extract_strided_slice %234 {offsets = [0, 64], sizes = [8, 32], strides = [1, 1]} : vector<8x128xf32> to vector<8x32xf32>
    %248 = math.tanh %247 : vector<8x32xf32>
    %249 = vector.extract_strided_slice %234 {offsets = [0, 96], sizes = [8, 32], strides = [1, 1]} : vector<8x128xf32> to vector<8x32xf32>
    %250 = arith.negf %249 : vector<8x32xf32>
    %251 = math.exp %250 : vector<8x32xf32>
    %cst_76 = arith.constant 1.000000e+00 : f32
    %252 = vector.broadcast %cst_76 : f32 to vector<8x32xf32>
    %253 = arith.addf %252, %251 : vector<8x32xf32>
    %254 = arith.divf %252, %253 : vector<8x32xf32>
    %255 = arith.mulf %246, %186 : vector<8x32xf32>
    %256 = arith.mulf %240, %248 : vector<8x32xf32>
    %257 = arith.addf %255, %256 : vector<8x32xf32>
    %258 = math.tanh %257 : vector<8x32xf32>
    %259 = arith.mulf %254, %258 : vector<8x32xf32>
    %260 = arith.index_cast %228 : i32 to index
    %c0_77 = arith.constant 0 : index
    %261 = vector.load %arg17[%260, %c0_77] : memref<64x64xf32, #tpu.memory_space<vmem>>, vector<8x32xf32>
    tpu.vector_store %arg17[%260, %c0_77], %259 {strides = array<i32>} : memref<64x64xf32, #tpu.memory_space<vmem>>, vector<8x32xf32>,
    %c7_i32_78 = arith.constant 7 : i32
    %262 = arith.subi %c7_i32_78, %c3_i32 : i32
    %c8_i32_79 = arith.constant 8 : i32
    %263 = arith.muli %262, %c8_i32_79 : i32
    %264 = tpu.assume_multiple %263, 8 : i32
    %265 = arith.index_cast %264 : i32 to index
    %c0_80 = arith.constant 0 : index
    %266 = vector.load %arg19[%265, %c0_80] : memref<64x128xf32, #tpu.memory_space<vmem>>, vector<8x128xf32>
    %267 = arith.truncf %224 : vector<8x32xf32> to vector<8x32xbf16>
    %c0_81 = arith.constant 0 : index
    %c0_82 = arith.constant 0 : index
    %268 = vector.load %arg5[%c0_81, %c0_82] : memref<32x128xbf16, #tpu.memory_space<vmem>>, vector<32x128xbf16>
    %cst_83 = arith.constant dense<0.000000e+00> : vector<8x128xf32>
    %269 = tpu.matmul %267, %268, %cst_83 {dimension_numbers = #tpu.dot_dimension_numbers<[1], [0], [0], [1], [0, 0, 1, 1], [], []>} : vector<8x32xbf16>, vector<32x128xbf16>, vector<8x128xf32> -> vector<8x128xf32>
    %270 = arith.addf %266, %269 : vector<8x128xf32>
    %271 = vector.extract_strided_slice %270 {offsets = [0, 0], sizes = [8, 32], strides = [1, 1]} : vector<8x128xf32> to vector<8x32xf32>
    %272 = arith.negf %271 : vector<8x32xf32>
    %273 = math.exp %272 : vector<8x32xf32>
    %cst_84 = arith.constant 1.000000e+00 : f32
    %274 = vector.broadcast %cst_84 : f32 to vector<8x32xf32>
    %275 = arith.addf %274, %273 : vector<8x32xf32>
    %276 = arith.divf %274, %275 : vector<8x32xf32>
    %277 = vector.extract_strided_slice %270 {offsets = [0, 32], sizes = [8, 32], strides = [1, 1]} : vector<8x128xf32> to vector<8x32xf32>
    %278 = arith.negf %277 : vector<8x32xf32>
    %279 = math.exp %278 : vector<8x32xf32>
    %cst_85 = arith.constant 1.000000e+00 : f32
    %280 = vector.broadcast %cst_85 : f32 to vector<8x32xf32>
    %281 = arith.addf %280, %279 : vector<8x32xf32>
    %282 = arith.divf %280, %281 : vector<8x32xf32>
    %283 = vector.extract_strided_slice %270 {offsets = [0, 64], sizes = [8, 32], strides = [1, 1]} : vector<8x128xf32> to vector<8x32xf32>
    %284 = math.tanh %283 : vector<8x32xf32>
    %285 = vector.extract_strided_slice %270 {offsets = [0, 96], sizes = [8, 32], strides = [1, 1]} : vector<8x128xf32> to vector<8x32xf32>
    %286 = arith.negf %285 : vector<8x32xf32>
    %287 = math.exp %286 : vector<8x32xf32>
    %cst_86 = arith.constant 1.000000e+00 : f32
    %288 = vector.broadcast %cst_86 : f32 to vector<8x32xf32>
    %289 = arith.addf %288, %287 : vector<8x32xf32>
    %290 = arith.divf %288, %289 : vector<8x32xf32>
    %291 = arith.mulf %282, %222 : vector<8x32xf32>
    %292 = arith.mulf %276, %284 : vector<8x32xf32>
    %293 = arith.addf %291, %292 : vector<8x32xf32>
    %294 = math.tanh %293 : vector<8x32xf32>
    %295 = arith.mulf %290, %294 : vector<8x32xf32>
    %296 = arith.index_cast %264 : i32 to index
    %c32_87 = arith.constant 32 : index
    %297 = vector.load %arg17[%296, %c32_87] : memref<64x64xf32, #tpu.memory_space<vmem>>, vector<8x32xf32>
    tpu.vector_store %arg17[%296, %c32_87], %295 {strides = array<i32>} : memref<64x64xf32, #tpu.memory_space<vmem>>, vector<8x32xf32>,
    %c4_i32 = arith.constant 4 : i32
    %c8_i32_88 = arith.constant 8 : i32
    %298 = arith.muli %c4_i32, %c8_i32_88 : i32
    %299 = tpu.assume_multiple %298, 8 : i32
    %300 = arith.index_cast %299 : i32 to index
    %c0_89 = arith.constant 0 : index
    %301 = vector.load %arg18[%300, %c0_89] : memref<64x128xf32, #tpu.memory_space<vmem>>, vector<8x128xf32>
    %302 = arith.truncf %259 : vector<8x32xf32> to vector<8x32xbf16>
    %c0_90 = arith.constant 0 : index
    %c0_91 = arith.constant 0 : index
    %303 = vector.load %arg2[%c0_90, %c0_91] : memref<32x128xbf16, #tpu.memory_space<vmem>>, vector<32x128xbf16>
    %cst_92 = arith.constant dense<0.000000e+00> : vector<8x128xf32>
    %304 = tpu.matmul %302, %303, %cst_92 {dimension_numbers = #tpu.dot_dimension_numbers<[1], [0], [0], [1], [0, 0, 1, 1], [], []>} : vector<8x32xbf16>, vector<32x128xbf16>, vector<8x128xf32> -> vector<8x128xf32>
    %305 = arith.addf %301, %304 : vector<8x128xf32>
    %306 = vector.extract_strided_slice %305 {offsets = [0, 0], sizes = [8, 32], strides = [1, 1]} : vector<8x128xf32> to vector<8x32xf32>
    %307 = arith.negf %306 : vector<8x32xf32>
    %308 = math.exp %307 : vector<8x32xf32>
    %cst_93 = arith.constant 1.000000e+00 : f32
    %309 = vector.broadcast %cst_93 : f32 to vector<8x32xf32>
    %310 = arith.addf %309, %308 : vector<8x32xf32>
    %311 = arith.divf %309, %310 : vector<8x32xf32>
    %312 = vector.extract_strided_slice %305 {offsets = [0, 32], sizes = [8, 32], strides = [1, 1]} : vector<8x128xf32> to vector<8x32xf32>
    %313 = arith.negf %312 : vector<8x32xf32>
    %314 = math.exp %313 : vector<8x32xf32>
    %cst_94 = arith.constant 1.000000e+00 : f32
    %315 = vector.broadcast %cst_94 : f32 to vector<8x32xf32>
    %316 = arith.addf %315, %314 : vector<8x32xf32>
    %317 = arith.divf %315, %316 : vector<8x32xf32>
    %318 = vector.extract_strided_slice %305 {offsets = [0, 64], sizes = [8, 32], strides = [1, 1]} : vector<8x128xf32> to vector<8x32xf32>
    %319 = math.tanh %318 : vector<8x32xf32>
    %320 = vector.extract_strided_slice %305 {offsets = [0, 96], sizes = [8, 32], strides = [1, 1]} : vector<8x128xf32> to vector<8x32xf32>
    %321 = arith.negf %320 : vector<8x32xf32>
    %322 = math.exp %321 : vector<8x32xf32>
    %cst_95 = arith.constant 1.000000e+00 : f32
    %323 = vector.broadcast %cst_95 : f32 to vector<8x32xf32>
    %324 = arith.addf %323, %322 : vector<8x32xf32>
    %325 = arith.divf %323, %324 : vector<8x32xf32>
    %326 = arith.mulf %317, %257 : vector<8x32xf32>
    %327 = arith.mulf %311, %319 : vector<8x32xf32>
    %328 = arith.addf %326, %327 : vector<8x32xf32>
    %329 = math.tanh %328 : vector<8x32xf32>
    %330 = arith.mulf %325, %329 : vector<8x32xf32>
    %331 = arith.index_cast %299 : i32 to index
    %c0_96 = arith.constant 0 : index
    %332 = vector.load %arg17[%331, %c0_96] : memref<64x64xf32, #tpu.memory_space<vmem>>, vector<8x32xf32>
    tpu.vector_store %arg17[%331, %c0_96], %330 {strides = array<i32>} : memref<64x64xf32, #tpu.memory_space<vmem>>, vector<8x32xf32>,
    %c7_i32_97 = arith.constant 7 : i32
    %333 = arith.subi %c7_i32_97, %c4_i32 : i32
    %c8_i32_98 = arith.constant 8 : i32
    %334 = arith.muli %333, %c8_i32_98 : i32
    %335 = tpu.assume_multiple %334, 8 : i32
    %336 = arith.index_cast %335 : i32 to index
    %c0_99 = arith.constant 0 : index
    %337 = vector.load %arg19[%336, %c0_99] : memref<64x128xf32, #tpu.memory_space<vmem>>, vector<8x128xf32>
    %338 = arith.truncf %295 : vector<8x32xf32> to vector<8x32xbf16>
    %c0_100 = arith.constant 0 : index
    %c0_101 = arith.constant 0 : index
    %339 = vector.load %arg5[%c0_100, %c0_101] : memref<32x128xbf16, #tpu.memory_space<vmem>>, vector<32x128xbf16>
    %cst_102 = arith.constant dense<0.000000e+00> : vector<8x128xf32>
    %340 = tpu.matmul %338, %339, %cst_102 {dimension_numbers = #tpu.dot_dimension_numbers<[1], [0], [0], [1], [0, 0, 1, 1], [], []>} : vector<8x32xbf16>, vector<32x128xbf16>, vector<8x128xf32> -> vector<8x128xf32>
    %341 = arith.addf %337, %340 : vector<8x128xf32>
    %342 = vector.extract_strided_slice %341 {offsets = [0, 0], sizes = [8, 32], strides = [1, 1]} : vector<8x128xf32> to vector<8x32xf32>
    %343 = arith.negf %342 : vector<8x32xf32>
    %344 = math.exp %343 : vector<8x32xf32>
    %cst_103 = arith.constant 1.000000e+00 : f32
    %345 = vector.broadcast %cst_103 : f32 to vector<8x32xf32>
    %346 = arith.addf %345, %344 : vector<8x32xf32>
    %347 = arith.divf %345, %346 : vector<8x32xf32>
    %348 = vector.extract_strided_slice %341 {offsets = [0, 32], sizes = [8, 32], strides = [1, 1]} : vector<8x128xf32> to vector<8x32xf32>
    %349 = arith.negf %348 : vector<8x32xf32>
    %350 = math.exp %349 : vector<8x32xf32>
    %cst_104 = arith.constant 1.000000e+00 : f32
    %351 = vector.broadcast %cst_104 : f32 to vector<8x32xf32>
    %352 = arith.addf %351, %350 : vector<8x32xf32>
    %353 = arith.divf %351, %352 : vector<8x32xf32>
    %354 = vector.extract_strided_slice %341 {offsets = [0, 64], sizes = [8, 32], strides = [1, 1]} : vector<8x128xf32> to vector<8x32xf32>
    %355 = math.tanh %354 : vector<8x32xf32>
    %356 = vector.extract_strided_slice %341 {offsets = [0, 96], sizes = [8, 32], strides = [1, 1]} : vector<8x128xf32> to vector<8x32xf32>
    %357 = arith.negf %356 : vector<8x32xf32>
    %358 = math.exp %357 : vector<8x32xf32>
    %cst_105 = arith.constant 1.000000e+00 : f32
    %359 = vector.broadcast %cst_105 : f32 to vector<8x32xf32>
    %360 = arith.addf %359, %358 : vector<8x32xf32>
    %361 = arith.divf %359, %360 : vector<8x32xf32>
    %362 = arith.mulf %353, %293 : vector<8x32xf32>
    %363 = arith.mulf %347, %355 : vector<8x32xf32>
    %364 = arith.addf %362, %363 : vector<8x32xf32>
    %365 = math.tanh %364 : vector<8x32xf32>
    %366 = arith.mulf %361, %365 : vector<8x32xf32>
    %367 = arith.index_cast %335 : i32 to index
    %c32_106 = arith.constant 32 : index
    %368 = vector.load %arg17[%367, %c32_106] : memref<64x64xf32, #tpu.memory_space<vmem>>, vector<8x32xf32>
    tpu.vector_store %arg17[%367, %c32_106], %366 {strides = array<i32>} : memref<64x64xf32, #tpu.memory_space<vmem>>, vector<8x32xf32>,
    %c5_i32 = arith.constant 5 : i32
    %c8_i32_107 = arith.constant 8 : i32
    %369 = arith.muli %c5_i32, %c8_i32_107 : i32
    %370 = tpu.assume_multiple %369, 8 : i32
    %371 = arith.index_cast %370 : i32 to index
    %c0_108 = arith.constant 0 : index
    %372 = vector.load %arg18[%371, %c0_108] : memref<64x128xf32, #tpu.memory_space<vmem>>, vector<8x128xf32>
    %373 = arith.truncf %330 : vector<8x32xf32> to vector<8x32xbf16>
    %c0_109 = arith.constant 0 : index
    %c0_110 = arith.constant 0 : index
    %374 = vector.load %arg2[%c0_109, %c0_110] : memref<32x128xbf16, #tpu.memory_space<vmem>>, vector<32x128xbf16>
    %cst_111 = arith.constant dense<0.000000e+00> : vector<8x128xf32>
    %375 = tpu.matmul %373, %374, %cst_111 {dimension_numbers = #tpu.dot_dimension_numbers<[1], [0], [0], [1], [0, 0, 1, 1], [], []>} : vector<8x32xbf16>, vector<32x128xbf16>, vector<8x128xf32> -> vector<8x128xf32>
    %376 = arith.addf %372, %375 : vector<8x128xf32>
    %377 = vector.extract_strided_slice %376 {offsets = [0, 0], sizes = [8, 32], strides = [1, 1]} : vector<8x128xf32> to vector<8x32xf32>
    %378 = arith.negf %377 : vector<8x32xf32>
    %379 = math.exp %378 : vector<8x32xf32>
    %cst_112 = arith.constant 1.000000e+00 : f32
    %380 = vector.broadcast %cst_112 : f32 to vector<8x32xf32>
    %381 = arith.addf %380, %379 : vector<8x32xf32>
    %382 = arith.divf %380, %381 : vector<8x32xf32>
    %383 = vector.extract_strided_slice %376 {offsets = [0, 32], sizes = [8, 32], strides = [1, 1]} : vector<8x128xf32> to vector<8x32xf32>
    %384 = arith.negf %383 : vector<8x32xf32>
    %385 = math.exp %384 : vector<8x32xf32>
    %cst_113 = arith.constant 1.000000e+00 : f32
    %386 = vector.broadcast %cst_113 : f32 to vector<8x32xf32>
    %387 = arith.addf %386, %385 : vector<8x32xf32>
    %388 = arith.divf %386, %387 : vector<8x32xf32>
    %389 = vector.extract_strided_slice %376 {offsets = [0, 64], sizes = [8, 32], strides = [1, 1]} : vector<8x128xf32> to vector<8x32xf32>
    %390 = math.tanh %389 : vector<8x32xf32>
    %391 = vector.extract_strided_slice %376 {offsets = [0, 96], sizes = [8, 32], strides = [1, 1]} : vector<8x128xf32> to vector<8x32xf32>
    %392 = arith.negf %391 : vector<8x32xf32>
    %393 = math.exp %392 : vector<8x32xf32>
    %cst_114 = arith.constant 1.000000e+00 : f32
    %394 = vector.broadcast %cst_114 : f32 to vector<8x32xf32>
    %395 = arith.addf %394, %393 : vector<8x32xf32>
    %396 = arith.divf %394, %395 : vector<8x32xf32>
    %397 = arith.mulf %388, %328 : vector<8x32xf32>
    %398 = arith.mulf %382, %390 : vector<8x32xf32>
    %399 = arith.addf %397, %398 : vector<8x32xf32>
    %400 = math.tanh %399 : vector<8x32xf32>
    %401 = arith.mulf %396, %400 : vector<8x32xf32>
    %402 = arith.index_cast %370 : i32 to index
    %c0_115 = arith.constant 0 : index
    %403 = vector.load %arg17[%402, %c0_115] : memref<64x64xf32, #tpu.memory_space<vmem>>, vector<8x32xf32>
    tpu.vector_store %arg17[%402, %c0_115], %401 {strides = array<i32>} : memref<64x64xf32, #tpu.memory_space<vmem>>, vector<8x32xf32>,
    %c7_i32_116 = arith.constant 7 : i32
    %404 = arith.subi %c7_i32_116, %c5_i32 : i32
    %c8_i32_117 = arith.constant 8 : i32
    %405 = arith.muli %404, %c8_i32_117 : i32
    %406 = tpu.assume_multiple %405, 8 : i32
    %407 = arith.index_cast %406 : i32 to index
    %c0_118 = arith.constant 0 : index
    %408 = vector.load %arg19[%407, %c0_118] : memref<64x128xf32, #tpu.memory_space<vmem>>, vector<8x128xf32>
    %409 = arith.truncf %366 : vector<8x32xf32> to vector<8x32xbf16>
    %c0_119 = arith.constant 0 : index
    %c0_120 = arith.constant 0 : index
    %410 = vector.load %arg5[%c0_119, %c0_120] : memref<32x128xbf16, #tpu.memory_space<vmem>>, vector<32x128xbf16>
    %cst_121 = arith.constant dense<0.000000e+00> : vector<8x128xf32>
    %411 = tpu.matmul %409, %410, %cst_121 {dimension_numbers = #tpu.dot_dimension_numbers<[1], [0], [0], [1], [0, 0, 1, 1], [], []>} : vector<8x32xbf16>, vector<32x128xbf16>, vector<8x128xf32> -> vector<8x128xf32>
    %412 = arith.addf %408, %411 : vector<8x128xf32>
    %413 = vector.extract_strided_slice %412 {offsets = [0, 0], sizes = [8, 32], strides = [1, 1]} : vector<8x128xf32> to vector<8x32xf32>
    %414 = arith.negf %413 : vector<8x32xf32>
    %415 = math.exp %414 : vector<8x32xf32>
    %cst_122 = arith.constant 1.000000e+00 : f32
    %416 = vector.broadcast %cst_122 : f32 to vector<8x32xf32>
    %417 = arith.addf %416, %415 : vector<8x32xf32>
    %418 = arith.divf %416, %417 : vector<8x32xf32>
    %419 = vector.extract_strided_slice %412 {offsets = [0, 32], sizes = [8, 32], strides = [1, 1]} : vector<8x128xf32> to vector<8x32xf32>
    %420 = arith.negf %419 : vector<8x32xf32>
    %421 = math.exp %420 : vector<8x32xf32>
    %cst_123 = arith.constant 1.000000e+00 : f32
    %422 = vector.broadcast %cst_123 : f32 to vector<8x32xf32>
    %423 = arith.addf %422, %421 : vector<8x32xf32>
    %424 = arith.divf %422, %423 : vector<8x32xf32>
    %425 = vector.extract_strided_slice %412 {offsets = [0, 64], sizes = [8, 32], strides = [1, 1]} : vector<8x128xf32> to vector<8x32xf32>
    %426 = math.tanh %425 : vector<8x32xf32>
    %427 = vector.extract_strided_slice %412 {offsets = [0, 96], sizes = [8, 32], strides = [1, 1]} : vector<8x128xf32> to vector<8x32xf32>
    %428 = arith.negf %427 : vector<8x32xf32>
    %429 = math.exp %428 : vector<8x32xf32>
    %cst_124 = arith.constant 1.000000e+00 : f32
    %430 = vector.broadcast %cst_124 : f32 to vector<8x32xf32>
    %431 = arith.addf %430, %429 : vector<8x32xf32>
    %432 = arith.divf %430, %431 : vector<8x32xf32>
    %433 = arith.mulf %424, %364 : vector<8x32xf32>
    %434 = arith.mulf %418, %426 : vector<8x32xf32>
    %435 = arith.addf %433, %434 : vector<8x32xf32>
    %436 = math.tanh %435 : vector<8x32xf32>
    %437 = arith.mulf %432, %436 : vector<8x32xf32>
    %438 = arith.index_cast %406 : i32 to index
    %c32_125 = arith.constant 32 : index
    %439 = vector.load %arg17[%438, %c32_125] : memref<64x64xf32, #tpu.memory_space<vmem>>, vector<8x32xf32>
    tpu.vector_store %arg17[%438, %c32_125], %437 {strides = array<i32>} : memref<64x64xf32, #tpu.memory_space<vmem>>, vector<8x32xf32>,
    %c6_i32 = arith.constant 6 : i32
    %c8_i32_126 = arith.constant 8 : i32
    %440 = arith.muli %c6_i32, %c8_i32_126 : i32
    %441 = tpu.assume_multiple %440, 8 : i32
    %442 = arith.index_cast %441 : i32 to index
    %c0_127 = arith.constant 0 : index
    %443 = vector.load %arg18[%442, %c0_127] : memref<64x128xf32, #tpu.memory_space<vmem>>, vector<8x128xf32>
    %444 = arith.truncf %401 : vector<8x32xf32> to vector<8x32xbf16>
    %c0_128 = arith.constant 0 : index
    %c0_129 = arith.constant 0 : index
    %445 = vector.load %arg2[%c0_128, %c0_129] : memref<32x128xbf16, #tpu.memory_space<vmem>>, vector<32x128xbf16>
    %cst_130 = arith.constant dense<0.000000e+00> : vector<8x128xf32>
    %446 = tpu.matmul %444, %445, %cst_130 {dimension_numbers = #tpu.dot_dimension_numbers<[1], [0], [0], [1], [0, 0, 1, 1], [], []>} : vector<8x32xbf16>, vector<32x128xbf16>, vector<8x128xf32> -> vector<8x128xf32>
    %447 = arith.addf %443, %446 : vector<8x128xf32>
    %448 = vector.extract_strided_slice %447 {offsets = [0, 0], sizes = [8, 32], strides = [1, 1]} : vector<8x128xf32> to vector<8x32xf32>
    %449 = arith.negf %448 : vector<8x32xf32>
    %450 = math.exp %449 : vector<8x32xf32>
    %cst_131 = arith.constant 1.000000e+00 : f32
    %451 = vector.broadcast %cst_131 : f32 to vector<8x32xf32>
    %452 = arith.addf %451, %450 : vector<8x32xf32>
    %453 = arith.divf %451, %452 : vector<8x32xf32>
    %454 = vector.extract_strided_slice %447 {offsets = [0, 32], sizes = [8, 32], strides = [1, 1]} : vector<8x128xf32> to vector<8x32xf32>
    %455 = arith.negf %454 : vector<8x32xf32>
    %456 = math.exp %455 : vector<8x32xf32>
    %cst_132 = arith.constant 1.000000e+00 : f32
    %457 = vector.broadcast %cst_132 : f32 to vector<8x32xf32>
    %458 = arith.addf %457, %456 : vector<8x32xf32>
    %459 = arith.divf %457, %458 : vector<8x32xf32>
    %460 = vector.extract_strided_slice %447 {offsets = [0, 64], sizes = [8, 32], strides = [1, 1]} : vector<8x128xf32> to vector<8x32xf32>
    %461 = math.tanh %460 : vector<8x32xf32>
    %462 = vector.extract_strided_slice %447 {offsets = [0, 96], sizes = [8, 32], strides = [1, 1]} : vector<8x128xf32> to vector<8x32xf32>
    %463 = arith.negf %462 : vector<8x32xf32>
    %464 = math.exp %463 : vector<8x32xf32>
    %cst_133 = arith.constant 1.000000e+00 : f32
    %465 = vector.broadcast %cst_133 : f32 to vector<8x32xf32>
    %466 = arith.addf %465, %464 : vector<8x32xf32>
    %467 = arith.divf %465, %466 : vector<8x32xf32>
    %468 = arith.mulf %459, %399 : vector<8x32xf32>
    %469 = arith.mulf %453, %461 : vector<8x32xf32>
    %470 = arith.addf %468, %469 : vector<8x32xf32>
    %471 = math.tanh %470 : vector<8x32xf32>
    %472 = arith.mulf %467, %471 : vector<8x32xf32>
    %473 = arith.index_cast %441 : i32 to index
    %c0_134 = arith.constant 0 : index
    %474 = vector.load %arg17[%473, %c0_134] : memref<64x64xf32, #tpu.memory_space<vmem>>, vector<8x32xf32>
    tpu.vector_store %arg17[%473, %c0_134], %472 {strides = array<i32>} : memref<64x64xf32, #tpu.memory_space<vmem>>, vector<8x32xf32>,
    %c7_i32_135 = arith.constant 7 : i32
    %475 = arith.subi %c7_i32_135, %c6_i32 : i32
    %c8_i32_136 = arith.constant 8 : i32
    %476 = arith.muli %475, %c8_i32_136 : i32
    %477 = tpu.assume_multiple %476, 8 : i32
    %478 = arith.index_cast %477 : i32 to index
    %c0_137 = arith.constant 0 : index
    %479 = vector.load %arg19[%478, %c0_137] : memref<64x128xf32, #tpu.memory_space<vmem>>, vector<8x128xf32>
    %480 = arith.truncf %437 : vector<8x32xf32> to vector<8x32xbf16>
    %c0_138 = arith.constant 0 : index
    %c0_139 = arith.constant 0 : index
    %481 = vector.load %arg5[%c0_138, %c0_139] : memref<32x128xbf16, #tpu.memory_space<vmem>>, vector<32x128xbf16>
    %cst_140 = arith.constant dense<0.000000e+00> : vector<8x128xf32>
    %482 = tpu.matmul %480, %481, %cst_140 {dimension_numbers = #tpu.dot_dimension_numbers<[1], [0], [0], [1], [0, 0, 1, 1], [], []>} : vector<8x32xbf16>, vector<32x128xbf16>, vector<8x128xf32> -> vector<8x128xf32>
    %483 = arith.addf %479, %482 : vector<8x128xf32>
    %484 = vector.extract_strided_slice %483 {offsets = [0, 0], sizes = [8, 32], strides = [1, 1]} : vector<8x128xf32> to vector<8x32xf32>
    %485 = arith.negf %484 : vector<8x32xf32>
    %486 = math.exp %485 : vector<8x32xf32>
    %cst_141 = arith.constant 1.000000e+00 : f32
    %487 = vector.broadcast %cst_141 : f32 to vector<8x32xf32>
    %488 = arith.addf %487, %486 : vector<8x32xf32>
    %489 = arith.divf %487, %488 : vector<8x32xf32>
    %490 = vector.extract_strided_slice %483 {offsets = [0, 32], sizes = [8, 32], strides = [1, 1]} : vector<8x128xf32> to vector<8x32xf32>
    %491 = arith.negf %490 : vector<8x32xf32>
    %492 = math.exp %491 : vector<8x32xf32>
    %cst_142 = arith.constant 1.000000e+00 : f32
    %493 = vector.broadcast %cst_142 : f32 to vector<8x32xf32>
    %494 = arith.addf %493, %492 : vector<8x32xf32>
    %495 = arith.divf %493, %494 : vector<8x32xf32>
    %496 = vector.extract_strided_slice %483 {offsets = [0, 64], sizes = [8, 32], strides = [1, 1]} : vector<8x128xf32> to vector<8x32xf32>
    %497 = math.tanh %496 : vector<8x32xf32>
    %498 = vector.extract_strided_slice %483 {offsets = [0, 96], sizes = [8, 32], strides = [1, 1]} : vector<8x128xf32> to vector<8x32xf32>
    %499 = arith.negf %498 : vector<8x32xf32>
    %500 = math.exp %499 : vector<8x32xf32>
    %cst_143 = arith.constant 1.000000e+00 : f32
    %501 = vector.broadcast %cst_143 : f32 to vector<8x32xf32>
    %502 = arith.addf %501, %500 : vector<8x32xf32>
    %503 = arith.divf %501, %502 : vector<8x32xf32>
    %504 = arith.mulf %495, %435 : vector<8x32xf32>
    %505 = arith.mulf %489, %497 : vector<8x32xf32>
    %506 = arith.addf %504, %505 : vector<8x32xf32>
    %507 = math.tanh %506 : vector<8x32xf32>
    %508 = arith.mulf %503, %507 : vector<8x32xf32>
    %509 = arith.index_cast %477 : i32 to index
    %c32_144 = arith.constant 32 : index
    %510 = vector.load %arg17[%509, %c32_144] : memref<64x64xf32, #tpu.memory_space<vmem>>, vector<8x32xf32>
    tpu.vector_store %arg17[%509, %c32_144], %508 {strides = array<i32>} : memref<64x64xf32, #tpu.memory_space<vmem>>, vector<8x32xf32>,
    %c7_i32_145 = arith.constant 7 : i32
    %c8_i32_146 = arith.constant 8 : i32
    %511 = arith.muli %c7_i32_145, %c8_i32_146 : i32
    %512 = tpu.assume_multiple %511, 8 : i32
    %513 = arith.index_cast %512 : i32 to index
    %c0_147 = arith.constant 0 : index
    %514 = vector.load %arg18[%513, %c0_147] : memref<64x128xf32, #tpu.memory_space<vmem>>, vector<8x128xf32>
    %515 = arith.truncf %472 : vector<8x32xf32> to vector<8x32xbf16>
    %c0_148 = arith.constant 0 : index
    %c0_149 = arith.constant 0 : index
    %516 = vector.load %arg2[%c0_148, %c0_149] : memref<32x128xbf16, #tpu.memory_space<vmem>>, vector<32x128xbf16>
    %cst_150 = arith.constant dense<0.000000e+00> : vector<8x128xf32>
    %517 = tpu.matmul %515, %516, %cst_150 {dimension_numbers = #tpu.dot_dimension_numbers<[1], [0], [0], [1], [0, 0, 1, 1], [], []>} : vector<8x32xbf16>, vector<32x128xbf16>, vector<8x128xf32> -> vector<8x128xf32>
    %518 = arith.addf %514, %517 : vector<8x128xf32>
    %519 = vector.extract_strided_slice %518 {offsets = [0, 0], sizes = [8, 32], strides = [1, 1]} : vector<8x128xf32> to vector<8x32xf32>
    %520 = arith.negf %519 : vector<8x32xf32>
    %521 = math.exp %520 : vector<8x32xf32>
    %cst_151 = arith.constant 1.000000e+00 : f32
    %522 = vector.broadcast %cst_151 : f32 to vector<8x32xf32>
    %523 = arith.addf %522, %521 : vector<8x32xf32>
    %524 = arith.divf %522, %523 : vector<8x32xf32>
    %525 = vector.extract_strided_slice %518 {offsets = [0, 32], sizes = [8, 32], strides = [1, 1]} : vector<8x128xf32> to vector<8x32xf32>
    %526 = arith.negf %525 : vector<8x32xf32>
    %527 = math.exp %526 : vector<8x32xf32>
    %cst_152 = arith.constant 1.000000e+00 : f32
    %528 = vector.broadcast %cst_152 : f32 to vector<8x32xf32>
    %529 = arith.addf %528, %527 : vector<8x32xf32>
    %530 = arith.divf %528, %529 : vector<8x32xf32>
    %531 = vector.extract_strided_slice %518 {offsets = [0, 64], sizes = [8, 32], strides = [1, 1]} : vector<8x128xf32> to vector<8x32xf32>
    %532 = math.tanh %531 : vector<8x32xf32>
    %533 = vector.extract_strided_slice %518 {offsets = [0, 96], sizes = [8, 32], strides = [1, 1]} : vector<8x128xf32> to vector<8x32xf32>
    %534 = arith.negf %533 : vector<8x32xf32>
    %535 = math.exp %534 : vector<8x32xf32>
    %cst_153 = arith.constant 1.000000e+00 : f32
    %536 = vector.broadcast %cst_153 : f32 to vector<8x32xf32>
    %537 = arith.addf %536, %535 : vector<8x32xf32>
    %538 = arith.divf %536, %537 : vector<8x32xf32>
    %539 = arith.mulf %530, %470 : vector<8x32xf32>
    %540 = arith.mulf %524, %532 : vector<8x32xf32>
    %541 = arith.addf %539, %540 : vector<8x32xf32>
    %542 = math.tanh %541 : vector<8x32xf32>
    %543 = arith.mulf %538, %542 : vector<8x32xf32>
    %544 = arith.index_cast %512 : i32 to index
    %c0_154 = arith.constant 0 : index
    %545 = vector.load %arg17[%544, %c0_154] : memref<64x64xf32, #tpu.memory_space<vmem>>, vector<8x32xf32>
    tpu.vector_store %arg17[%544, %c0_154], %543 {strides = array<i32>} : memref<64x64xf32, #tpu.memory_space<vmem>>, vector<8x32xf32>,
    %c7_i32_155 = arith.constant 7 : i32
    %546 = arith.subi %c7_i32_155, %c7_i32_145 : i32
    %c8_i32_156 = arith.constant 8 : i32
    %547 = arith.muli %546, %c8_i32_156 : i32
    %548 = tpu.assume_multiple %547, 8 : i32
    %549 = arith.index_cast %548 : i32 to index
    %c0_157 = arith.constant 0 : index
    %550 = vector.load %arg19[%549, %c0_157] : memref<64x128xf32, #tpu.memory_space<vmem>>, vector<8x128xf32>
    %551 = arith.truncf %508 : vector<8x32xf32> to vector<8x32xbf16>
    %c0_158 = arith.constant 0 : index
    %c0_159 = arith.constant 0 : index
    %552 = vector.load %arg5[%c0_158, %c0_159] : memref<32x128xbf16, #tpu.memory_space<vmem>>, vector<32x128xbf16>
    %cst_160 = arith.constant dense<0.000000e+00> : vector<8x128xf32>
    %553 = tpu.matmul %551, %552, %cst_160 {dimension_numbers = #tpu.dot_dimension_numbers<[1], [0], [0], [1], [0, 0, 1, 1], [], []>} : vector<8x32xbf16>, vector<32x128xbf16>, vector<8x128xf32> -> vector<8x128xf32>
    %554 = arith.addf %550, %553 : vector<8x128xf32>
    %555 = vector.extract_strided_slice %554 {offsets = [0, 0], sizes = [8, 32], strides = [1, 1]} : vector<8x128xf32> to vector<8x32xf32>
    %556 = arith.negf %555 : vector<8x32xf32>
    %557 = math.exp %556 : vector<8x32xf32>
    %cst_161 = arith.constant 1.000000e+00 : f32
    %558 = vector.broadcast %cst_161 : f32 to vector<8x32xf32>
    %559 = arith.addf %558, %557 : vector<8x32xf32>
    %560 = arith.divf %558, %559 : vector<8x32xf32>
    %561 = vector.extract_strided_slice %554 {offsets = [0, 32], sizes = [8, 32], strides = [1, 1]} : vector<8x128xf32> to vector<8x32xf32>
    %562 = arith.negf %561 : vector<8x32xf32>
    %563 = math.exp %562 : vector<8x32xf32>
    %cst_162 = arith.constant 1.000000e+00 : f32
    %564 = vector.broadcast %cst_162 : f32 to vector<8x32xf32>
    %565 = arith.addf %564, %563 : vector<8x32xf32>
    %566 = arith.divf %564, %565 : vector<8x32xf32>
    %567 = vector.extract_strided_slice %554 {offsets = [0, 64], sizes = [8, 32], strides = [1, 1]} : vector<8x128xf32> to vector<8x32xf32>
    %568 = math.tanh %567 : vector<8x32xf32>
    %569 = vector.extract_strided_slice %554 {offsets = [0, 96], sizes = [8, 32], strides = [1, 1]} : vector<8x128xf32> to vector<8x32xf32>
    %570 = arith.negf %569 : vector<8x32xf32>
    %571 = math.exp %570 : vector<8x32xf32>
    %cst_163 = arith.constant 1.000000e+00 : f32
    %572 = vector.broadcast %cst_163 : f32 to vector<8x32xf32>
    %573 = arith.addf %572, %571 : vector<8x32xf32>
    %574 = arith.divf %572, %573 : vector<8x32xf32>
    %575 = arith.mulf %566, %506 : vector<8x32xf32>
    %576 = arith.mulf %560, %568 : vector<8x32xf32>
    %577 = arith.addf %575, %576 : vector<8x32xf32>
    %578 = math.tanh %577 : vector<8x32xf32>
    %579 = arith.mulf %574, %578 : vector<8x32xf32>
    %580 = arith.index_cast %548 : i32 to index
    %c32_164 = arith.constant 32 : index
    %581 = vector.load %arg17[%580, %c32_164] : memref<64x64xf32, #tpu.memory_space<vmem>>, vector<8x32xf32>
    tpu.vector_store %arg17[%580, %c32_164], %579 {strides = array<i32>} : memref<64x64xf32, #tpu.memory_space<vmem>>, vector<8x32xf32>,
    %c8_i32_165 = arith.constant 8 : i32
    %c0_166 = arith.constant 0 : index
    %c0_167 = arith.constant 0 : index
    %582 = vector.load %arg17[%c0_166, %c0_167] : memref<64x64xf32, #tpu.memory_space<vmem>>, vector<64x64xf32>
    %583 = arith.truncf %582 : vector<64x64xf32> to vector<64x64xbf16>
    %c0_168 = arith.constant 0 : index
    %c0_169 = arith.constant 0 : index
    %584 = vector.load %arg7[%c0_168, %c0_169] : memref<64x128xbf16, #tpu.memory_space<vmem>>, vector<64x128xbf16>
    %cst_170 = arith.constant dense<0.000000e+00> : vector<64x128xf32>
    %585 = tpu.matmul %583, %584, %cst_170 {dimension_numbers = #tpu.dot_dimension_numbers<[1], [0], [0], [1], [0, 0, 1, 1], [], []>} : vector<64x64xbf16>, vector<64x128xbf16>, vector<64x128xf32> -> vector<64x128xf32>
    %c0_171 = arith.constant 0 : index
    %c0_172 = arith.constant 0 : index
    %586 = vector.load %arg9[%c0_171, %c0_172] : memref<1x128xf32, #tpu.memory_space<vmem>>, vector<1x128xf32>
    %587 = vector.broadcast %586 : vector<1x128xf32> to vector<64x128xf32>
    %588 = arith.addf %585, %587 : vector<64x128xf32>
    %c0_173 = arith.constant 0 : index
    %c0_174 = arith.constant 0 : index
    %589 = vector.load %arg18[%c0_173, %c0_174] : memref<64x128xf32, #tpu.memory_space<vmem>>, vector<64x128xf32>
    tpu.vector_store %arg18[%c0_173, %c0_174], %588 {strides = array<i32>} : memref<64x128xf32, #tpu.memory_space<vmem>>, vector<64x128xf32>,
    %c0_175 = arith.constant 0 : index
    %c0_176 = arith.constant 0 : index
    %590 = vector.load %arg10[%c0_175, %c0_176] : memref<64x128xbf16, #tpu.memory_space<vmem>>, vector<64x128xbf16>
    %cst_177 = arith.constant dense<0.000000e+00> : vector<64x128xf32>
    %591 = tpu.matmul %583, %590, %cst_177 {dimension_numbers = #tpu.dot_dimension_numbers<[1], [0], [0], [1], [0, 0, 1, 1], [], []>} : vector<64x64xbf16>, vector<64x128xbf16>, vector<64x128xf32> -> vector<64x128xf32>
    %c0_178 = arith.constant 0 : index
    %c0_179 = arith.constant 0 : index
    %592 = vector.load %arg12[%c0_178, %c0_179] : memref<1x128xf32, #tpu.memory_space<vmem>>, vector<1x128xf32>
    %593 = vector.broadcast %592 : vector<1x128xf32> to vector<64x128xf32>
    %594 = arith.addf %591, %593 : vector<64x128xf32>
    %c0_180 = arith.constant 0 : index
    %c0_181 = arith.constant 0 : index
    %595 = vector.load %arg19[%c0_180, %c0_181] : memref<64x128xf32, #tpu.memory_space<vmem>>, vector<64x128xf32>
    tpu.vector_store %arg19[%c0_180, %c0_181], %594 {strides = array<i32>} : memref<64x128xf32, #tpu.memory_space<vmem>>, vector<64x128xf32>,
    %cst_182 = arith.constant 0.000000e+00 : f32
    %596 = vector.broadcast %cst_182 : f32 to vector<8x32xf32>
    %c0_i32_183 = arith.constant 0 : i32
    %c8_i32_184 = arith.constant 8 : i32
    %597 = arith.muli %c0_i32_183, %c8_i32_184 : i32
    %598 = tpu.assume_multiple %597, 8 : i32
    %599 = arith.index_cast %598 : i32 to index
    %c0_185 = arith.constant 0 : index
    %600 = vector.load %arg18[%599, %c0_185] : memref<64x128xf32, #tpu.memory_space<vmem>>, vector<8x128xf32>
    %601 = arith.truncf %596 : vector<8x32xf32> to vector<8x32xbf16>
    %c0_186 = arith.constant 0 : index
    %c0_187 = arith.constant 0 : index
    %602 = vector.load %arg8[%c0_186, %c0_187] : memref<32x128xbf16, #tpu.memory_space<vmem>>, vector<32x128xbf16>
    %cst_188 = arith.constant dense<0.000000e+00> : vector<8x128xf32>
    %603 = tpu.matmul %601, %602, %cst_188 {dimension_numbers = #tpu.dot_dimension_numbers<[1], [0], [0], [1], [0, 0, 1, 1], [], []>} : vector<8x32xbf16>, vector<32x128xbf16>, vector<8x128xf32> -> vector<8x128xf32>
    %604 = arith.addf %600, %603 : vector<8x128xf32>
    %605 = vector.extract_strided_slice %604 {offsets = [0, 0], sizes = [8, 32], strides = [1, 1]} : vector<8x128xf32> to vector<8x32xf32>
    %606 = arith.negf %605 : vector<8x32xf32>
    %607 = math.exp %606 : vector<8x32xf32>
    %cst_189 = arith.constant 1.000000e+00 : f32
    %608 = vector.broadcast %cst_189 : f32 to vector<8x32xf32>
    %609 = arith.addf %608, %607 : vector<8x32xf32>
    %610 = arith.divf %608, %609 : vector<8x32xf32>
    %611 = vector.extract_strided_slice %604 {offsets = [0, 32], sizes = [8, 32], strides = [1, 1]} : vector<8x128xf32> to vector<8x32xf32>
    %612 = arith.negf %611 : vector<8x32xf32>
    %613 = math.exp %612 : vector<8x32xf32>
    %cst_190 = arith.constant 1.000000e+00 : f32
    %614 = vector.broadcast %cst_190 : f32 to vector<8x32xf32>
    %615 = arith.addf %614, %613 : vector<8x32xf32>
    %616 = arith.divf %614, %615 : vector<8x32xf32>
    %617 = vector.extract_strided_slice %604 {offsets = [0, 64], sizes = [8, 32], strides = [1, 1]} : vector<8x128xf32> to vector<8x32xf32>
    %618 = math.tanh %617 : vector<8x32xf32>
    %619 = vector.extract_strided_slice %604 {offsets = [0, 96], sizes = [8, 32], strides = [1, 1]} : vector<8x128xf32> to vector<8x32xf32>
    %620 = arith.negf %619 : vector<8x32xf32>
    %621 = math.exp %620 : vector<8x32xf32>
    %cst_191 = arith.constant 1.000000e+00 : f32
    %622 = vector.broadcast %cst_191 : f32 to vector<8x32xf32>
    %623 = arith.addf %622, %621 : vector<8x32xf32>
    %624 = arith.divf %622, %623 : vector<8x32xf32>
    %625 = arith.mulf %616, %596 : vector<8x32xf32>
    %626 = arith.mulf %610, %618 : vector<8x32xf32>
    %627 = arith.addf %625, %626 : vector<8x32xf32>
    %628 = math.tanh %627 : vector<8x32xf32>
    %629 = arith.mulf %624, %628 : vector<8x32xf32>
    %c7_i32_192 = arith.constant 7 : i32
    %630 = arith.subi %c7_i32_192, %c0_i32_183 : i32
    %c8_i32_193 = arith.constant 8 : i32
    %631 = arith.muli %630, %c8_i32_193 : i32
    %632 = tpu.assume_multiple %631, 8 : i32
    %633 = arith.index_cast %632 : i32 to index
    %c0_194 = arith.constant 0 : index
    %634 = vector.load %arg19[%633, %c0_194] : memref<64x128xf32, #tpu.memory_space<vmem>>, vector<8x128xf32>
    %635 = arith.truncf %596 : vector<8x32xf32> to vector<8x32xbf16>
    %c0_195 = arith.constant 0 : index
    %c0_196 = arith.constant 0 : index
    %636 = vector.load %arg11[%c0_195, %c0_196] : memref<32x128xbf16, #tpu.memory_space<vmem>>, vector<32x128xbf16>
    %cst_197 = arith.constant dense<0.000000e+00> : vector<8x128xf32>
    %637 = tpu.matmul %635, %636, %cst_197 {dimension_numbers = #tpu.dot_dimension_numbers<[1], [0], [0], [1], [0, 0, 1, 1], [], []>} : vector<8x32xbf16>, vector<32x128xbf16>, vector<8x128xf32> -> vector<8x128xf32>
    %638 = arith.addf %634, %637 : vector<8x128xf32>
    %639 = vector.extract_strided_slice %638 {offsets = [0, 0], sizes = [8, 32], strides = [1, 1]} : vector<8x128xf32> to vector<8x32xf32>
    %640 = arith.negf %639 : vector<8x32xf32>
    %641 = math.exp %640 : vector<8x32xf32>
    %cst_198 = arith.constant 1.000000e+00 : f32
    %642 = vector.broadcast %cst_198 : f32 to vector<8x32xf32>
    %643 = arith.addf %642, %641 : vector<8x32xf32>
    %644 = arith.divf %642, %643 : vector<8x32xf32>
    %645 = vector.extract_strided_slice %638 {offsets = [0, 32], sizes = [8, 32], strides = [1, 1]} : vector<8x128xf32> to vector<8x32xf32>
    %646 = arith.negf %645 : vector<8x32xf32>
    %647 = math.exp %646 : vector<8x32xf32>
    %cst_199 = arith.constant 1.000000e+00 : f32
    %648 = vector.broadcast %cst_199 : f32 to vector<8x32xf32>
    %649 = arith.addf %648, %647 : vector<8x32xf32>
    %650 = arith.divf %648, %649 : vector<8x32xf32>
    %651 = vector.extract_strided_slice %638 {offsets = [0, 64], sizes = [8, 32], strides = [1, 1]} : vector<8x128xf32> to vector<8x32xf32>
    %652 = math.tanh %651 : vector<8x32xf32>
    %653 = vector.extract_strided_slice %638 {offsets = [0, 96], sizes = [8, 32], strides = [1, 1]} : vector<8x128xf32> to vector<8x32xf32>
    %654 = arith.negf %653 : vector<8x32xf32>
    %655 = math.exp %654 : vector<8x32xf32>
    %cst_200 = arith.constant 1.000000e+00 : f32
    %656 = vector.broadcast %cst_200 : f32 to vector<8x32xf32>
    %657 = arith.addf %656, %655 : vector<8x32xf32>
    %658 = arith.divf %656, %657 : vector<8x32xf32>
    %659 = arith.mulf %650, %596 : vector<8x32xf32>
    %660 = arith.mulf %644, %652 : vector<8x32xf32>
    %661 = arith.addf %659, %660 : vector<8x32xf32>
    %662 = math.tanh %661 : vector<8x32xf32>
    %663 = arith.mulf %658, %662 : vector<8x32xf32>
    %c1_i32_201 = arith.constant 1 : i32
    %c8_i32_202 = arith.constant 8 : i32
    %664 = arith.muli %c1_i32_201, %c8_i32_202 : i32
    %665 = tpu.assume_multiple %664, 8 : i32
    %666 = arith.index_cast %665 : i32 to index
    %c0_203 = arith.constant 0 : index
    %667 = vector.load %arg18[%666, %c0_203] : memref<64x128xf32, #tpu.memory_space<vmem>>, vector<8x128xf32>
    %668 = arith.truncf %629 : vector<8x32xf32> to vector<8x32xbf16>
    %c0_204 = arith.constant 0 : index
    %c0_205 = arith.constant 0 : index
    %669 = vector.load %arg8[%c0_204, %c0_205] : memref<32x128xbf16, #tpu.memory_space<vmem>>, vector<32x128xbf16>
    %cst_206 = arith.constant dense<0.000000e+00> : vector<8x128xf32>
    %670 = tpu.matmul %668, %669, %cst_206 {dimension_numbers = #tpu.dot_dimension_numbers<[1], [0], [0], [1], [0, 0, 1, 1], [], []>} : vector<8x32xbf16>, vector<32x128xbf16>, vector<8x128xf32> -> vector<8x128xf32>
    %671 = arith.addf %667, %670 : vector<8x128xf32>
    %672 = vector.extract_strided_slice %671 {offsets = [0, 0], sizes = [8, 32], strides = [1, 1]} : vector<8x128xf32> to vector<8x32xf32>
    %673 = arith.negf %672 : vector<8x32xf32>
    %674 = math.exp %673 : vector<8x32xf32>
    %cst_207 = arith.constant 1.000000e+00 : f32
    %675 = vector.broadcast %cst_207 : f32 to vector<8x32xf32>
    %676 = arith.addf %675, %674 : vector<8x32xf32>
    %677 = arith.divf %675, %676 : vector<8x32xf32>
    %678 = vector.extract_strided_slice %671 {offsets = [0, 32], sizes = [8, 32], strides = [1, 1]} : vector<8x128xf32> to vector<8x32xf32>
    %679 = arith.negf %678 : vector<8x32xf32>
    %680 = math.exp %679 : vector<8x32xf32>
    %cst_208 = arith.constant 1.000000e+00 : f32
    %681 = vector.broadcast %cst_208 : f32 to vector<8x32xf32>
    %682 = arith.addf %681, %680 : vector<8x32xf32>
    %683 = arith.divf %681, %682 : vector<8x32xf32>
    %684 = vector.extract_strided_slice %671 {offsets = [0, 64], sizes = [8, 32], strides = [1, 1]} : vector<8x128xf32> to vector<8x32xf32>
    %685 = math.tanh %684 : vector<8x32xf32>
    %686 = vector.extract_strided_slice %671 {offsets = [0, 96], sizes = [8, 32], strides = [1, 1]} : vector<8x128xf32> to vector<8x32xf32>
    %687 = arith.negf %686 : vector<8x32xf32>
    %688 = math.exp %687 : vector<8x32xf32>
    %cst_209 = arith.constant 1.000000e+00 : f32
    %689 = vector.broadcast %cst_209 : f32 to vector<8x32xf32>
    %690 = arith.addf %689, %688 : vector<8x32xf32>
    %691 = arith.divf %689, %690 : vector<8x32xf32>
    %692 = arith.mulf %683, %627 : vector<8x32xf32>
    %693 = arith.mulf %677, %685 : vector<8x32xf32>
    %694 = arith.addf %692, %693 : vector<8x32xf32>
    %695 = math.tanh %694 : vector<8x32xf32>
    %696 = arith.mulf %691, %695 : vector<8x32xf32>
    %c7_i32_210 = arith.constant 7 : i32
    %697 = arith.subi %c7_i32_210, %c1_i32_201 : i32
    %c8_i32_211 = arith.constant 8 : i32
    %698 = arith.muli %697, %c8_i32_211 : i32
    %699 = tpu.assume_multiple %698, 8 : i32
    %700 = arith.index_cast %699 : i32 to index
    %c0_212 = arith.constant 0 : index
    %701 = vector.load %arg19[%700, %c0_212] : memref<64x128xf32, #tpu.memory_space<vmem>>, vector<8x128xf32>
    %702 = arith.truncf %663 : vector<8x32xf32> to vector<8x32xbf16>
    %c0_213 = arith.constant 0 : index
    %c0_214 = arith.constant 0 : index
    %703 = vector.load %arg11[%c0_213, %c0_214] : memref<32x128xbf16, #tpu.memory_space<vmem>>, vector<32x128xbf16>
    %cst_215 = arith.constant dense<0.000000e+00> : vector<8x128xf32>
    %704 = tpu.matmul %702, %703, %cst_215 {dimension_numbers = #tpu.dot_dimension_numbers<[1], [0], [0], [1], [0, 0, 1, 1], [], []>} : vector<8x32xbf16>, vector<32x128xbf16>, vector<8x128xf32> -> vector<8x128xf32>
    %705 = arith.addf %701, %704 : vector<8x128xf32>
    %706 = vector.extract_strided_slice %705 {offsets = [0, 0], sizes = [8, 32], strides = [1, 1]} : vector<8x128xf32> to vector<8x32xf32>
    %707 = arith.negf %706 : vector<8x32xf32>
    %708 = math.exp %707 : vector<8x32xf32>
    %cst_216 = arith.constant 1.000000e+00 : f32
    %709 = vector.broadcast %cst_216 : f32 to vector<8x32xf32>
    %710 = arith.addf %709, %708 : vector<8x32xf32>
    %711 = arith.divf %709, %710 : vector<8x32xf32>
    %712 = vector.extract_strided_slice %705 {offsets = [0, 32], sizes = [8, 32], strides = [1, 1]} : vector<8x128xf32> to vector<8x32xf32>
    %713 = arith.negf %712 : vector<8x32xf32>
    %714 = math.exp %713 : vector<8x32xf32>
    %cst_217 = arith.constant 1.000000e+00 : f32
    %715 = vector.broadcast %cst_217 : f32 to vector<8x32xf32>
    %716 = arith.addf %715, %714 : vector<8x32xf32>
    %717 = arith.divf %715, %716 : vector<8x32xf32>
    %718 = vector.extract_strided_slice %705 {offsets = [0, 64], sizes = [8, 32], strides = [1, 1]} : vector<8x128xf32> to vector<8x32xf32>
    %719 = math.tanh %718 : vector<8x32xf32>
    %720 = vector.extract_strided_slice %705 {offsets = [0, 96], sizes = [8, 32], strides = [1, 1]} : vector<8x128xf32> to vector<8x32xf32>
    %721 = arith.negf %720 : vector<8x32xf32>
    %722 = math.exp %721 : vector<8x32xf32>
    %cst_218 = arith.constant 1.000000e+00 : f32
    %723 = vector.broadcast %cst_218 : f32 to vector<8x32xf32>
    %724 = arith.addf %723, %722 : vector<8x32xf32>
    %725 = arith.divf %723, %724 : vector<8x32xf32>
    %726 = arith.mulf %717, %661 : vector<8x32xf32>
    %727 = arith.mulf %711, %719 : vector<8x32xf32>
    %728 = arith.addf %726, %727 : vector<8x32xf32>
    %729 = math.tanh %728 : vector<8x32xf32>
    %730 = arith.mulf %725, %729 : vector<8x32xf32>
    %c2_i32_219 = arith.constant 2 : i32
    %c8_i32_220 = arith.constant 8 : i32
    %731 = arith.muli %c2_i32_219, %c8_i32_220 : i32
    %732 = tpu.assume_multiple %731, 8 : i32
    %733 = arith.index_cast %732 : i32 to index
    %c0_221 = arith.constant 0 : index
    %734 = vector.load %arg18[%733, %c0_221] : memref<64x128xf32, #tpu.memory_space<vmem>>, vector<8x128xf32>
    %735 = arith.truncf %696 : vector<8x32xf32> to vector<8x32xbf16>
    %c0_222 = arith.constant 0 : index
    %c0_223 = arith.constant 0 : index
    %736 = vector.load %arg8[%c0_222, %c0_223] : memref<32x128xbf16, #tpu.memory_space<vmem>>, vector<32x128xbf16>
    %cst_224 = arith.constant dense<0.000000e+00> : vector<8x128xf32>
    %737 = tpu.matmul %735, %736, %cst_224 {dimension_numbers = #tpu.dot_dimension_numbers<[1], [0], [0], [1], [0, 0, 1, 1], [], []>} : vector<8x32xbf16>, vector<32x128xbf16>, vector<8x128xf32> -> vector<8x128xf32>
    %738 = arith.addf %734, %737 : vector<8x128xf32>
    %739 = vector.extract_strided_slice %738 {offsets = [0, 0], sizes = [8, 32], strides = [1, 1]} : vector<8x128xf32> to vector<8x32xf32>
    %740 = arith.negf %739 : vector<8x32xf32>
    %741 = math.exp %740 : vector<8x32xf32>
    %cst_225 = arith.constant 1.000000e+00 : f32
    %742 = vector.broadcast %cst_225 : f32 to vector<8x32xf32>
    %743 = arith.addf %742, %741 : vector<8x32xf32>
    %744 = arith.divf %742, %743 : vector<8x32xf32>
    %745 = vector.extract_strided_slice %738 {offsets = [0, 32], sizes = [8, 32], strides = [1, 1]} : vector<8x128xf32> to vector<8x32xf32>
    %746 = arith.negf %745 : vector<8x32xf32>
    %747 = math.exp %746 : vector<8x32xf32>
    %cst_226 = arith.constant 1.000000e+00 : f32
    %748 = vector.broadcast %cst_226 : f32 to vector<8x32xf32>
    %749 = arith.addf %748, %747 : vector<8x32xf32>
    %750 = arith.divf %748, %749 : vector<8x32xf32>
    %751 = vector.extract_strided_slice %738 {offsets = [0, 64], sizes = [8, 32], strides = [1, 1]} : vector<8x128xf32> to vector<8x32xf32>
    %752 = math.tanh %751 : vector<8x32xf32>
    %753 = vector.extract_strided_slice %738 {offsets = [0, 96], sizes = [8, 32], strides = [1, 1]} : vector<8x128xf32> to vector<8x32xf32>
    %754 = arith.negf %753 : vector<8x32xf32>
    %755 = math.exp %754 : vector<8x32xf32>
    %cst_227 = arith.constant 1.000000e+00 : f32
    %756 = vector.broadcast %cst_227 : f32 to vector<8x32xf32>
    %757 = arith.addf %756, %755 : vector<8x32xf32>
    %758 = arith.divf %756, %757 : vector<8x32xf32>
    %759 = arith.mulf %750, %694 : vector<8x32xf32>
    %760 = arith.mulf %744, %752 : vector<8x32xf32>
    %761 = arith.addf %759, %760 : vector<8x32xf32>
    %762 = math.tanh %761 : vector<8x32xf32>
    %763 = arith.mulf %758, %762 : vector<8x32xf32>
    %c7_i32_228 = arith.constant 7 : i32
    %764 = arith.subi %c7_i32_228, %c2_i32_219 : i32
    %c8_i32_229 = arith.constant 8 : i32
    %765 = arith.muli %764, %c8_i32_229 : i32
    %766 = tpu.assume_multiple %765, 8 : i32
    %767 = arith.index_cast %766 : i32 to index
    %c0_230 = arith.constant 0 : index
    %768 = vector.load %arg19[%767, %c0_230] : memref<64x128xf32, #tpu.memory_space<vmem>>, vector<8x128xf32>
    %769 = arith.truncf %730 : vector<8x32xf32> to vector<8x32xbf16>
    %c0_231 = arith.constant 0 : index
    %c0_232 = arith.constant 0 : index
    %770 = vector.load %arg11[%c0_231, %c0_232] : memref<32x128xbf16, #tpu.memory_space<vmem>>, vector<32x128xbf16>
    %cst_233 = arith.constant dense<0.000000e+00> : vector<8x128xf32>
    %771 = tpu.matmul %769, %770, %cst_233 {dimension_numbers = #tpu.dot_dimension_numbers<[1], [0], [0], [1], [0, 0, 1, 1], [], []>} : vector<8x32xbf16>, vector<32x128xbf16>, vector<8x128xf32> -> vector<8x128xf32>
    %772 = arith.addf %768, %771 : vector<8x128xf32>
    %773 = vector.extract_strided_slice %772 {offsets = [0, 0], sizes = [8, 32], strides = [1, 1]} : vector<8x128xf32> to vector<8x32xf32>
    %774 = arith.negf %773 : vector<8x32xf32>
    %775 = math.exp %774 : vector<8x32xf32>
    %cst_234 = arith.constant 1.000000e+00 : f32
    %776 = vector.broadcast %cst_234 : f32 to vector<8x32xf32>
    %777 = arith.addf %776, %775 : vector<8x32xf32>
    %778 = arith.divf %776, %777 : vector<8x32xf32>
    %779 = vector.extract_strided_slice %772 {offsets = [0, 32], sizes = [8, 32], strides = [1, 1]} : vector<8x128xf32> to vector<8x32xf32>
    %780 = arith.negf %779 : vector<8x32xf32>
    %781 = math.exp %780 : vector<8x32xf32>
    %cst_235 = arith.constant 1.000000e+00 : f32
    %782 = vector.broadcast %cst_235 : f32 to vector<8x32xf32>
    %783 = arith.addf %782, %781 : vector<8x32xf32>
    %784 = arith.divf %782, %783 : vector<8x32xf32>
    %785 = vector.extract_strided_slice %772 {offsets = [0, 64], sizes = [8, 32], strides = [1, 1]} : vector<8x128xf32> to vector<8x32xf32>
    %786 = math.tanh %785 : vector<8x32xf32>
    %787 = vector.extract_strided_slice %772 {offsets = [0, 96], sizes = [8, 32], strides = [1, 1]} : vector<8x128xf32> to vector<8x32xf32>
    %788 = arith.negf %787 : vector<8x32xf32>
    %789 = math.exp %788 : vector<8x32xf32>
    %cst_236 = arith.constant 1.000000e+00 : f32
    %790 = vector.broadcast %cst_236 : f32 to vector<8x32xf32>
    %791 = arith.addf %790, %789 : vector<8x32xf32>
    %792 = arith.divf %790, %791 : vector<8x32xf32>
    %793 = arith.mulf %784, %728 : vector<8x32xf32>
    %794 = arith.mulf %778, %786 : vector<8x32xf32>
    %795 = arith.addf %793, %794 : vector<8x32xf32>
    %796 = math.tanh %795 : vector<8x32xf32>
    %797 = arith.mulf %792, %796 : vector<8x32xf32>
    %c3_i32_237 = arith.constant 3 : i32
    %c8_i32_238 = arith.constant 8 : i32
    %798 = arith.muli %c3_i32_237, %c8_i32_238 : i32
    %799 = tpu.assume_multiple %798, 8 : i32
    %800 = arith.index_cast %799 : i32 to index
    %c0_239 = arith.constant 0 : index
    %801 = vector.load %arg18[%800, %c0_239] : memref<64x128xf32, #tpu.memory_space<vmem>>, vector<8x128xf32>
    %802 = arith.truncf %763 : vector<8x32xf32> to vector<8x32xbf16>
    %c0_240 = arith.constant 0 : index
    %c0_241 = arith.constant 0 : index
    %803 = vector.load %arg8[%c0_240, %c0_241] : memref<32x128xbf16, #tpu.memory_space<vmem>>, vector<32x128xbf16>
    %cst_242 = arith.constant dense<0.000000e+00> : vector<8x128xf32>
    %804 = tpu.matmul %802, %803, %cst_242 {dimension_numbers = #tpu.dot_dimension_numbers<[1], [0], [0], [1], [0, 0, 1, 1], [], []>} : vector<8x32xbf16>, vector<32x128xbf16>, vector<8x128xf32> -> vector<8x128xf32>
    %805 = arith.addf %801, %804 : vector<8x128xf32>
    %806 = vector.extract_strided_slice %805 {offsets = [0, 0], sizes = [8, 32], strides = [1, 1]} : vector<8x128xf32> to vector<8x32xf32>
    %807 = arith.negf %806 : vector<8x32xf32>
    %808 = math.exp %807 : vector<8x32xf32>
    %cst_243 = arith.constant 1.000000e+00 : f32
    %809 = vector.broadcast %cst_243 : f32 to vector<8x32xf32>
    %810 = arith.addf %809, %808 : vector<8x32xf32>
    %811 = arith.divf %809, %810 : vector<8x32xf32>
    %812 = vector.extract_strided_slice %805 {offsets = [0, 32], sizes = [8, 32], strides = [1, 1]} : vector<8x128xf32> to vector<8x32xf32>
    %813 = arith.negf %812 : vector<8x32xf32>
    %814 = math.exp %813 : vector<8x32xf32>
    %cst_244 = arith.constant 1.000000e+00 : f32
    %815 = vector.broadcast %cst_244 : f32 to vector<8x32xf32>
    %816 = arith.addf %815, %814 : vector<8x32xf32>
    %817 = arith.divf %815, %816 : vector<8x32xf32>
    %818 = vector.extract_strided_slice %805 {offsets = [0, 64], sizes = [8, 32], strides = [1, 1]} : vector<8x128xf32> to vector<8x32xf32>
    %819 = math.tanh %818 : vector<8x32xf32>
    %820 = vector.extract_strided_slice %805 {offsets = [0, 96], sizes = [8, 32], strides = [1, 1]} : vector<8x128xf32> to vector<8x32xf32>
    %821 = arith.negf %820 : vector<8x32xf32>
    %822 = math.exp %821 : vector<8x32xf32>
    %cst_245 = arith.constant 1.000000e+00 : f32
    %823 = vector.broadcast %cst_245 : f32 to vector<8x32xf32>
    %824 = arith.addf %823, %822 : vector<8x32xf32>
    %825 = arith.divf %823, %824 : vector<8x32xf32>
    %826 = arith.mulf %817, %761 : vector<8x32xf32>
    %827 = arith.mulf %811, %819 : vector<8x32xf32>
    %828 = arith.addf %826, %827 : vector<8x32xf32>
    %829 = math.tanh %828 : vector<8x32xf32>
    %830 = arith.mulf %825, %829 : vector<8x32xf32>
    %c7_i32_246 = arith.constant 7 : i32
    %831 = arith.subi %c7_i32_246, %c3_i32_237 : i32
    %c8_i32_247 = arith.constant 8 : i32
    %832 = arith.muli %831, %c8_i32_247 : i32
    %833 = tpu.assume_multiple %832, 8 : i32
    %834 = arith.index_cast %833 : i32 to index
    %c0_248 = arith.constant 0 : index
    %835 = vector.load %arg19[%834, %c0_248] : memref<64x128xf32, #tpu.memory_space<vmem>>, vector<8x128xf32>
    %836 = arith.truncf %797 : vector<8x32xf32> to vector<8x32xbf16>
    %c0_249 = arith.constant 0 : index
    %c0_250 = arith.constant 0 : index
    %837 = vector.load %arg11[%c0_249, %c0_250] : memref<32x128xbf16, #tpu.memory_space<vmem>>, vector<32x128xbf16>
    %cst_251 = arith.constant dense<0.000000e+00> : vector<8x128xf32>
    %838 = tpu.matmul %836, %837, %cst_251 {dimension_numbers = #tpu.dot_dimension_numbers<[1], [0], [0], [1], [0, 0, 1, 1], [], []>} : vector<8x32xbf16>, vector<32x128xbf16>, vector<8x128xf32> -> vector<8x128xf32>
    %839 = arith.addf %835, %838 : vector<8x128xf32>
    %840 = vector.extract_strided_slice %839 {offsets = [0, 0], sizes = [8, 32], strides = [1, 1]} : vector<8x128xf32> to vector<8x32xf32>
    %841 = arith.negf %840 : vector<8x32xf32>
    %842 = math.exp %841 : vector<8x32xf32>
    %cst_252 = arith.constant 1.000000e+00 : f32
    %843 = vector.broadcast %cst_252 : f32 to vector<8x32xf32>
    %844 = arith.addf %843, %842 : vector<8x32xf32>
    %845 = arith.divf %843, %844 : vector<8x32xf32>
    %846 = vector.extract_strided_slice %839 {offsets = [0, 32], sizes = [8, 32], strides = [1, 1]} : vector<8x128xf32> to vector<8x32xf32>
    %847 = arith.negf %846 : vector<8x32xf32>
    %848 = math.exp %847 : vector<8x32xf32>
    %cst_253 = arith.constant 1.000000e+00 : f32
    %849 = vector.broadcast %cst_253 : f32 to vector<8x32xf32>
    %850 = arith.addf %849, %848 : vector<8x32xf32>
    %851 = arith.divf %849, %850 : vector<8x32xf32>
    %852 = vector.extract_strided_slice %839 {offsets = [0, 64], sizes = [8, 32], strides = [1, 1]} : vector<8x128xf32> to vector<8x32xf32>
    %853 = math.tanh %852 : vector<8x32xf32>
    %854 = vector.extract_strided_slice %839 {offsets = [0, 96], sizes = [8, 32], strides = [1, 1]} : vector<8x128xf32> to vector<8x32xf32>
    %855 = arith.negf %854 : vector<8x32xf32>
    %856 = math.exp %855 : vector<8x32xf32>
    %cst_254 = arith.constant 1.000000e+00 : f32
    %857 = vector.broadcast %cst_254 : f32 to vector<8x32xf32>
    %858 = arith.addf %857, %856 : vector<8x32xf32>
    %859 = arith.divf %857, %858 : vector<8x32xf32>
    %860 = arith.mulf %851, %795 : vector<8x32xf32>
    %861 = arith.mulf %845, %853 : vector<8x32xf32>
    %862 = arith.addf %860, %861 : vector<8x32xf32>
    %863 = math.tanh %862 : vector<8x32xf32>
    %864 = arith.mulf %859, %863 : vector<8x32xf32>
    %c4_i32_255 = arith.constant 4 : i32
    %c8_i32_256 = arith.constant 8 : i32
    %865 = arith.muli %c4_i32_255, %c8_i32_256 : i32
    %866 = tpu.assume_multiple %865, 8 : i32
    %867 = arith.index_cast %866 : i32 to index
    %c0_257 = arith.constant 0 : index
    %868 = vector.load %arg18[%867, %c0_257] : memref<64x128xf32, #tpu.memory_space<vmem>>, vector<8x128xf32>
    %869 = arith.truncf %830 : vector<8x32xf32> to vector<8x32xbf16>
    %c0_258 = arith.constant 0 : index
    %c0_259 = arith.constant 0 : index
    %870 = vector.load %arg8[%c0_258, %c0_259] : memref<32x128xbf16, #tpu.memory_space<vmem>>, vector<32x128xbf16>
    %cst_260 = arith.constant dense<0.000000e+00> : vector<8x128xf32>
    %871 = tpu.matmul %869, %870, %cst_260 {dimension_numbers = #tpu.dot_dimension_numbers<[1], [0], [0], [1], [0, 0, 1, 1], [], []>} : vector<8x32xbf16>, vector<32x128xbf16>, vector<8x128xf32> -> vector<8x128xf32>
    %872 = arith.addf %868, %871 : vector<8x128xf32>
    %873 = vector.extract_strided_slice %872 {offsets = [0, 0], sizes = [8, 32], strides = [1, 1]} : vector<8x128xf32> to vector<8x32xf32>
    %874 = arith.negf %873 : vector<8x32xf32>
    %875 = math.exp %874 : vector<8x32xf32>
    %cst_261 = arith.constant 1.000000e+00 : f32
    %876 = vector.broadcast %cst_261 : f32 to vector<8x32xf32>
    %877 = arith.addf %876, %875 : vector<8x32xf32>
    %878 = arith.divf %876, %877 : vector<8x32xf32>
    %879 = vector.extract_strided_slice %872 {offsets = [0, 32], sizes = [8, 32], strides = [1, 1]} : vector<8x128xf32> to vector<8x32xf32>
    %880 = arith.negf %879 : vector<8x32xf32>
    %881 = math.exp %880 : vector<8x32xf32>
    %cst_262 = arith.constant 1.000000e+00 : f32
    %882 = vector.broadcast %cst_262 : f32 to vector<8x32xf32>
    %883 = arith.addf %882, %881 : vector<8x32xf32>
    %884 = arith.divf %882, %883 : vector<8x32xf32>
    %885 = vector.extract_strided_slice %872 {offsets = [0, 64], sizes = [8, 32], strides = [1, 1]} : vector<8x128xf32> to vector<8x32xf32>
    %886 = math.tanh %885 : vector<8x32xf32>
    %887 = vector.extract_strided_slice %872 {offsets = [0, 96], sizes = [8, 32], strides = [1, 1]} : vector<8x128xf32> to vector<8x32xf32>
    %888 = arith.negf %887 : vector<8x32xf32>
    %889 = math.exp %888 : vector<8x32xf32>
    %cst_263 = arith.constant 1.000000e+00 : f32
    %890 = vector.broadcast %cst_263 : f32 to vector<8x32xf32>
    %891 = arith.addf %890, %889 : vector<8x32xf32>
    %892 = arith.divf %890, %891 : vector<8x32xf32>
    %893 = arith.mulf %884, %828 : vector<8x32xf32>
    %894 = arith.mulf %878, %886 : vector<8x32xf32>
    %895 = arith.addf %893, %894 : vector<8x32xf32>
    %896 = math.tanh %895 : vector<8x32xf32>
    %897 = arith.mulf %892, %896 : vector<8x32xf32>
    %c7_i32_264 = arith.constant 7 : i32
    %898 = arith.subi %c7_i32_264, %c4_i32_255 : i32
    %c8_i32_265 = arith.constant 8 : i32
    %899 = arith.muli %898, %c8_i32_265 : i32
    %900 = tpu.assume_multiple %899, 8 : i32
    %901 = arith.index_cast %900 : i32 to index
    %c0_266 = arith.constant 0 : index
    %902 = vector.load %arg19[%901, %c0_266] : memref<64x128xf32, #tpu.memory_space<vmem>>, vector<8x128xf32>
    %903 = arith.truncf %864 : vector<8x32xf32> to vector<8x32xbf16>
    %c0_267 = arith.constant 0 : index
    %c0_268 = arith.constant 0 : index
    %904 = vector.load %arg11[%c0_267, %c0_268] : memref<32x128xbf16, #tpu.memory_space<vmem>>, vector<32x128xbf16>
    %cst_269 = arith.constant dense<0.000000e+00> : vector<8x128xf32>
    %905 = tpu.matmul %903, %904, %cst_269 {dimension_numbers = #tpu.dot_dimension_numbers<[1], [0], [0], [1], [0, 0, 1, 1], [], []>} : vector<8x32xbf16>, vector<32x128xbf16>, vector<8x128xf32> -> vector<8x128xf32>
    %906 = arith.addf %902, %905 : vector<8x128xf32>
    %907 = vector.extract_strided_slice %906 {offsets = [0, 0], sizes = [8, 32], strides = [1, 1]} : vector<8x128xf32> to vector<8x32xf32>
    %908 = arith.negf %907 : vector<8x32xf32>
    %909 = math.exp %908 : vector<8x32xf32>
    %cst_270 = arith.constant 1.000000e+00 : f32
    %910 = vector.broadcast %cst_270 : f32 to vector<8x32xf32>
    %911 = arith.addf %910, %909 : vector<8x32xf32>
    %912 = arith.divf %910, %911 : vector<8x32xf32>
    %913 = vector.extract_strided_slice %906 {offsets = [0, 32], sizes = [8, 32], strides = [1, 1]} : vector<8x128xf32> to vector<8x32xf32>
    %914 = arith.negf %913 : vector<8x32xf32>
    %915 = math.exp %914 : vector<8x32xf32>
    %cst_271 = arith.constant 1.000000e+00 : f32
    %916 = vector.broadcast %cst_271 : f32 to vector<8x32xf32>
    %917 = arith.addf %916, %915 : vector<8x32xf32>
    %918 = arith.divf %916, %917 : vector<8x32xf32>
    %919 = vector.extract_strided_slice %906 {offsets = [0, 64], sizes = [8, 32], strides = [1, 1]} : vector<8x128xf32> to vector<8x32xf32>
    %920 = math.tanh %919 : vector<8x32xf32>
    %921 = vector.extract_strided_slice %906 {offsets = [0, 96], sizes = [8, 32], strides = [1, 1]} : vector<8x128xf32> to vector<8x32xf32>
    %922 = arith.negf %921 : vector<8x32xf32>
    %923 = math.exp %922 : vector<8x32xf32>
    %cst_272 = arith.constant 1.000000e+00 : f32
    %924 = vector.broadcast %cst_272 : f32 to vector<8x32xf32>
    %925 = arith.addf %924, %923 : vector<8x32xf32>
    %926 = arith.divf %924, %925 : vector<8x32xf32>
    %927 = arith.mulf %918, %862 : vector<8x32xf32>
    %928 = arith.mulf %912, %920 : vector<8x32xf32>
    %929 = arith.addf %927, %928 : vector<8x32xf32>
    %930 = math.tanh %929 : vector<8x32xf32>
    %931 = arith.mulf %926, %930 : vector<8x32xf32>
    %c5_i32_273 = arith.constant 5 : i32
    %c8_i32_274 = arith.constant 8 : i32
    %932 = arith.muli %c5_i32_273, %c8_i32_274 : i32
    %933 = tpu.assume_multiple %932, 8 : i32
    %934 = arith.index_cast %933 : i32 to index
    %c0_275 = arith.constant 0 : index
    %935 = vector.load %arg18[%934, %c0_275] : memref<64x128xf32, #tpu.memory_space<vmem>>, vector<8x128xf32>
    %936 = arith.truncf %897 : vector<8x32xf32> to vector<8x32xbf16>
    %c0_276 = arith.constant 0 : index
    %c0_277 = arith.constant 0 : index
    %937 = vector.load %arg8[%c0_276, %c0_277] : memref<32x128xbf16, #tpu.memory_space<vmem>>, vector<32x128xbf16>
    %cst_278 = arith.constant dense<0.000000e+00> : vector<8x128xf32>
    %938 = tpu.matmul %936, %937, %cst_278 {dimension_numbers = #tpu.dot_dimension_numbers<[1], [0], [0], [1], [0, 0, 1, 1], [], []>} : vector<8x32xbf16>, vector<32x128xbf16>, vector<8x128xf32> -> vector<8x128xf32>
    %939 = arith.addf %935, %938 : vector<8x128xf32>
    %940 = vector.extract_strided_slice %939 {offsets = [0, 0], sizes = [8, 32], strides = [1, 1]} : vector<8x128xf32> to vector<8x32xf32>
    %941 = arith.negf %940 : vector<8x32xf32>
    %942 = math.exp %941 : vector<8x32xf32>
    %cst_279 = arith.constant 1.000000e+00 : f32
    %943 = vector.broadcast %cst_279 : f32 to vector<8x32xf32>
    %944 = arith.addf %943, %942 : vector<8x32xf32>
    %945 = arith.divf %943, %944 : vector<8x32xf32>
    %946 = vector.extract_strided_slice %939 {offsets = [0, 32], sizes = [8, 32], strides = [1, 1]} : vector<8x128xf32> to vector<8x32xf32>
    %947 = arith.negf %946 : vector<8x32xf32>
    %948 = math.exp %947 : vector<8x32xf32>
    %cst_280 = arith.constant 1.000000e+00 : f32
    %949 = vector.broadcast %cst_280 : f32 to vector<8x32xf32>
    %950 = arith.addf %949, %948 : vector<8x32xf32>
    %951 = arith.divf %949, %950 : vector<8x32xf32>
    %952 = vector.extract_strided_slice %939 {offsets = [0, 64], sizes = [8, 32], strides = [1, 1]} : vector<8x128xf32> to vector<8x32xf32>
    %953 = math.tanh %952 : vector<8x32xf32>
    %954 = vector.extract_strided_slice %939 {offsets = [0, 96], sizes = [8, 32], strides = [1, 1]} : vector<8x128xf32> to vector<8x32xf32>
    %955 = arith.negf %954 : vector<8x32xf32>
    %956 = math.exp %955 : vector<8x32xf32>
    %cst_281 = arith.constant 1.000000e+00 : f32
    %957 = vector.broadcast %cst_281 : f32 to vector<8x32xf32>
    %958 = arith.addf %957, %956 : vector<8x32xf32>
    %959 = arith.divf %957, %958 : vector<8x32xf32>
    %960 = arith.mulf %951, %895 : vector<8x32xf32>
    %961 = arith.mulf %945, %953 : vector<8x32xf32>
    %962 = arith.addf %960, %961 : vector<8x32xf32>
    %963 = math.tanh %962 : vector<8x32xf32>
    %964 = arith.mulf %959, %963 : vector<8x32xf32>
    %c7_i32_282 = arith.constant 7 : i32
    %965 = arith.subi %c7_i32_282, %c5_i32_273 : i32
    %c8_i32_283 = arith.constant 8 : i32
    %966 = arith.muli %965, %c8_i32_283 : i32
    %967 = tpu.assume_multiple %966, 8 : i32
    %968 = arith.index_cast %967 : i32 to index
    %c0_284 = arith.constant 0 : index
    %969 = vector.load %arg19[%968, %c0_284] : memref<64x128xf32, #tpu.memory_space<vmem>>, vector<8x128xf32>
    %970 = arith.truncf %931 : vector<8x32xf32> to vector<8x32xbf16>
    %c0_285 = arith.constant 0 : index
    %c0_286 = arith.constant 0 : index
    %971 = vector.load %arg11[%c0_285, %c0_286] : memref<32x128xbf16, #tpu.memory_space<vmem>>, vector<32x128xbf16>
    %cst_287 = arith.constant dense<0.000000e+00> : vector<8x128xf32>
    %972 = tpu.matmul %970, %971, %cst_287 {dimension_numbers = #tpu.dot_dimension_numbers<[1], [0], [0], [1], [0, 0, 1, 1], [], []>} : vector<8x32xbf16>, vector<32x128xbf16>, vector<8x128xf32> -> vector<8x128xf32>
    %973 = arith.addf %969, %972 : vector<8x128xf32>
    %974 = vector.extract_strided_slice %973 {offsets = [0, 0], sizes = [8, 32], strides = [1, 1]} : vector<8x128xf32> to vector<8x32xf32>
    %975 = arith.negf %974 : vector<8x32xf32>
    %976 = math.exp %975 : vector<8x32xf32>
    %cst_288 = arith.constant 1.000000e+00 : f32
    %977 = vector.broadcast %cst_288 : f32 to vector<8x32xf32>
    %978 = arith.addf %977, %976 : vector<8x32xf32>
    %979 = arith.divf %977, %978 : vector<8x32xf32>
    %980 = vector.extract_strided_slice %973 {offsets = [0, 32], sizes = [8, 32], strides = [1, 1]} : vector<8x128xf32> to vector<8x32xf32>
    %981 = arith.negf %980 : vector<8x32xf32>
    %982 = math.exp %981 : vector<8x32xf32>
    %cst_289 = arith.constant 1.000000e+00 : f32
    %983 = vector.broadcast %cst_289 : f32 to vector<8x32xf32>
    %984 = arith.addf %983, %982 : vector<8x32xf32>
    %985 = arith.divf %983, %984 : vector<8x32xf32>
    %986 = vector.extract_strided_slice %973 {offsets = [0, 64], sizes = [8, 32], strides = [1, 1]} : vector<8x128xf32> to vector<8x32xf32>
    %987 = math.tanh %986 : vector<8x32xf32>
    %988 = vector.extract_strided_slice %973 {offsets = [0, 96], sizes = [8, 32], strides = [1, 1]} : vector<8x128xf32> to vector<8x32xf32>
    %989 = arith.negf %988 : vector<8x32xf32>
    %990 = math.exp %989 : vector<8x32xf32>
    %cst_290 = arith.constant 1.000000e+00 : f32
    %991 = vector.broadcast %cst_290 : f32 to vector<8x32xf32>
    %992 = arith.addf %991, %990 : vector<8x32xf32>
    %993 = arith.divf %991, %992 : vector<8x32xf32>
    %994 = arith.mulf %985, %929 : vector<8x32xf32>
    %995 = arith.mulf %979, %987 : vector<8x32xf32>
    %996 = arith.addf %994, %995 : vector<8x32xf32>
    %997 = math.tanh %996 : vector<8x32xf32>
    %998 = arith.mulf %993, %997 : vector<8x32xf32>
    %c6_i32_291 = arith.constant 6 : i32
    %c8_i32_292 = arith.constant 8 : i32
    %999 = arith.muli %c6_i32_291, %c8_i32_292 : i32
    %1000 = tpu.assume_multiple %999, 8 : i32
    %1001 = arith.index_cast %1000 : i32 to index
    %c0_293 = arith.constant 0 : index
    %1002 = vector.load %arg18[%1001, %c0_293] : memref<64x128xf32, #tpu.memory_space<vmem>>, vector<8x128xf32>
    %1003 = arith.truncf %964 : vector<8x32xf32> to vector<8x32xbf16>
    %c0_294 = arith.constant 0 : index
    %c0_295 = arith.constant 0 : index
    %1004 = vector.load %arg8[%c0_294, %c0_295] : memref<32x128xbf16, #tpu.memory_space<vmem>>, vector<32x128xbf16>
    %cst_296 = arith.constant dense<0.000000e+00> : vector<8x128xf32>
    %1005 = tpu.matmul %1003, %1004, %cst_296 {dimension_numbers = #tpu.dot_dimension_numbers<[1], [0], [0], [1], [0, 0, 1, 1], [], []>} : vector<8x32xbf16>, vector<32x128xbf16>, vector<8x128xf32> -> vector<8x128xf32>
    %1006 = arith.addf %1002, %1005 : vector<8x128xf32>
    %1007 = vector.extract_strided_slice %1006 {offsets = [0, 0], sizes = [8, 32], strides = [1, 1]} : vector<8x128xf32> to vector<8x32xf32>
    %1008 = arith.negf %1007 : vector<8x32xf32>
    %1009 = math.exp %1008 : vector<8x32xf32>
    %cst_297 = arith.constant 1.000000e+00 : f32
    %1010 = vector.broadcast %cst_297 : f32 to vector<8x32xf32>
    %1011 = arith.addf %1010, %1009 : vector<8x32xf32>
    %1012 = arith.divf %1010, %1011 : vector<8x32xf32>
    %1013 = vector.extract_strided_slice %1006 {offsets = [0, 32], sizes = [8, 32], strides = [1, 1]} : vector<8x128xf32> to vector<8x32xf32>
    %1014 = arith.negf %1013 : vector<8x32xf32>
    %1015 = math.exp %1014 : vector<8x32xf32>
    %cst_298 = arith.constant 1.000000e+00 : f32
    %1016 = vector.broadcast %cst_298 : f32 to vector<8x32xf32>
    %1017 = arith.addf %1016, %1015 : vector<8x32xf32>
    %1018 = arith.divf %1016, %1017 : vector<8x32xf32>
    %1019 = vector.extract_strided_slice %1006 {offsets = [0, 64], sizes = [8, 32], strides = [1, 1]} : vector<8x128xf32> to vector<8x32xf32>
    %1020 = math.tanh %1019 : vector<8x32xf32>
    %1021 = vector.extract_strided_slice %1006 {offsets = [0, 96], sizes = [8, 32], strides = [1, 1]} : vector<8x128xf32> to vector<8x32xf32>
    %1022 = arith.negf %1021 : vector<8x32xf32>
    %1023 = math.exp %1022 : vector<8x32xf32>
    %cst_299 = arith.constant 1.000000e+00 : f32
    %1024 = vector.broadcast %cst_299 : f32 to vector<8x32xf32>
    %1025 = arith.addf %1024, %1023 : vector<8x32xf32>
    %1026 = arith.divf %1024, %1025 : vector<8x32xf32>
    %1027 = arith.mulf %1018, %962 : vector<8x32xf32>
    %1028 = arith.mulf %1012, %1020 : vector<8x32xf32>
    %1029 = arith.addf %1027, %1028 : vector<8x32xf32>
    %1030 = math.tanh %1029 : vector<8x32xf32>
    %1031 = arith.mulf %1026, %1030 : vector<8x32xf32>
    %c7_i32_300 = arith.constant 7 : i32
    %1032 = arith.subi %c7_i32_300, %c6_i32_291 : i32
    %c8_i32_301 = arith.constant 8 : i32
    %1033 = arith.muli %1032, %c8_i32_301 : i32
    %1034 = tpu.assume_multiple %1033, 8 : i32
    %1035 = arith.index_cast %1034 : i32 to index
    %c0_302 = arith.constant 0 : index
    %1036 = vector.load %arg19[%1035, %c0_302] : memref<64x128xf32, #tpu.memory_space<vmem>>, vector<8x128xf32>
    %1037 = arith.truncf %998 : vector<8x32xf32> to vector<8x32xbf16>
    %c0_303 = arith.constant 0 : index
    %c0_304 = arith.constant 0 : index
    %1038 = vector.load %arg11[%c0_303, %c0_304] : memref<32x128xbf16, #tpu.memory_space<vmem>>, vector<32x128xbf16>
    %cst_305 = arith.constant dense<0.000000e+00> : vector<8x128xf32>
    %1039 = tpu.matmul %1037, %1038, %cst_305 {dimension_numbers = #tpu.dot_dimension_numbers<[1], [0], [0], [1], [0, 0, 1, 1], [], []>} : vector<8x32xbf16>, vector<32x128xbf16>, vector<8x128xf32> -> vector<8x128xf32>
    %1040 = arith.addf %1036, %1039 : vector<8x128xf32>
    %1041 = vector.extract_strided_slice %1040 {offsets = [0, 0], sizes = [8, 32], strides = [1, 1]} : vector<8x128xf32> to vector<8x32xf32>
    %1042 = arith.negf %1041 : vector<8x32xf32>
    %1043 = math.exp %1042 : vector<8x32xf32>
    %cst_306 = arith.constant 1.000000e+00 : f32
    %1044 = vector.broadcast %cst_306 : f32 to vector<8x32xf32>
    %1045 = arith.addf %1044, %1043 : vector<8x32xf32>
    %1046 = arith.divf %1044, %1045 : vector<8x32xf32>
    %1047 = vector.extract_strided_slice %1040 {offsets = [0, 32], sizes = [8, 32], strides = [1, 1]} : vector<8x128xf32> to vector<8x32xf32>
    %1048 = arith.negf %1047 : vector<8x32xf32>
    %1049 = math.exp %1048 : vector<8x32xf32>
    %cst_307 = arith.constant 1.000000e+00 : f32
    %1050 = vector.broadcast %cst_307 : f32 to vector<8x32xf32>
    %1051 = arith.addf %1050, %1049 : vector<8x32xf32>
    %1052 = arith.divf %1050, %1051 : vector<8x32xf32>
    %1053 = vector.extract_strided_slice %1040 {offsets = [0, 64], sizes = [8, 32], strides = [1, 1]} : vector<8x128xf32> to vector<8x32xf32>
    %1054 = math.tanh %1053 : vector<8x32xf32>
    %1055 = vector.extract_strided_slice %1040 {offsets = [0, 96], sizes = [8, 32], strides = [1, 1]} : vector<8x128xf32> to vector<8x32xf32>
    %1056 = arith.negf %1055 : vector<8x32xf32>
    %1057 = math.exp %1056 : vector<8x32xf32>
    %cst_308 = arith.constant 1.000000e+00 : f32
    %1058 = vector.broadcast %cst_308 : f32 to vector<8x32xf32>
    %1059 = arith.addf %1058, %1057 : vector<8x32xf32>
    %1060 = arith.divf %1058, %1059 : vector<8x32xf32>
    %1061 = arith.mulf %1052, %996 : vector<8x32xf32>
    %1062 = arith.mulf %1046, %1054 : vector<8x32xf32>
    %1063 = arith.addf %1061, %1062 : vector<8x32xf32>
    %1064 = math.tanh %1063 : vector<8x32xf32>
    %1065 = arith.mulf %1060, %1064 : vector<8x32xf32>
    %c7_i32_309 = arith.constant 7 : i32
    %c8_i32_310 = arith.constant 8 : i32
    %1066 = arith.muli %c7_i32_309, %c8_i32_310 : i32
    %1067 = tpu.assume_multiple %1066, 8 : i32
    %1068 = arith.index_cast %1067 : i32 to index
    %c0_311 = arith.constant 0 : index
    %1069 = vector.load %arg18[%1068, %c0_311] : memref<64x128xf32, #tpu.memory_space<vmem>>, vector<8x128xf32>
    %1070 = arith.truncf %1031 : vector<8x32xf32> to vector<8x32xbf16>
    %c0_312 = arith.constant 0 : index
    %c0_313 = arith.constant 0 : index
    %1071 = vector.load %arg8[%c0_312, %c0_313] : memref<32x128xbf16, #tpu.memory_space<vmem>>, vector<32x128xbf16>
    %cst_314 = arith.constant dense<0.000000e+00> : vector<8x128xf32>
    %1072 = tpu.matmul %1070, %1071, %cst_314 {dimension_numbers = #tpu.dot_dimension_numbers<[1], [0], [0], [1], [0, 0, 1, 1], [], []>} : vector<8x32xbf16>, vector<32x128xbf16>, vector<8x128xf32> -> vector<8x128xf32>
    %1073 = arith.addf %1069, %1072 : vector<8x128xf32>
    %1074 = vector.extract_strided_slice %1073 {offsets = [0, 0], sizes = [8, 32], strides = [1, 1]} : vector<8x128xf32> to vector<8x32xf32>
    %1075 = arith.negf %1074 : vector<8x32xf32>
    %1076 = math.exp %1075 : vector<8x32xf32>
    %cst_315 = arith.constant 1.000000e+00 : f32
    %1077 = vector.broadcast %cst_315 : f32 to vector<8x32xf32>
    %1078 = arith.addf %1077, %1076 : vector<8x32xf32>
    %1079 = arith.divf %1077, %1078 : vector<8x32xf32>
    %1080 = vector.extract_strided_slice %1073 {offsets = [0, 32], sizes = [8, 32], strides = [1, 1]} : vector<8x128xf32> to vector<8x32xf32>
    %1081 = arith.negf %1080 : vector<8x32xf32>
    %1082 = math.exp %1081 : vector<8x32xf32>
    %cst_316 = arith.constant 1.000000e+00 : f32
    %1083 = vector.broadcast %cst_316 : f32 to vector<8x32xf32>
    %1084 = arith.addf %1083, %1082 : vector<8x32xf32>
    %1085 = arith.divf %1083, %1084 : vector<8x32xf32>
    %1086 = vector.extract_strided_slice %1073 {offsets = [0, 64], sizes = [8, 32], strides = [1, 1]} : vector<8x128xf32> to vector<8x32xf32>
    %1087 = math.tanh %1086 : vector<8x32xf32>
    %1088 = vector.extract_strided_slice %1073 {offsets = [0, 96], sizes = [8, 32], strides = [1, 1]} : vector<8x128xf32> to vector<8x32xf32>
    %1089 = arith.negf %1088 : vector<8x32xf32>
    %1090 = math.exp %1089 : vector<8x32xf32>
    %cst_317 = arith.constant 1.000000e+00 : f32
    %1091 = vector.broadcast %cst_317 : f32 to vector<8x32xf32>
    %1092 = arith.addf %1091, %1090 : vector<8x32xf32>
    %1093 = arith.divf %1091, %1092 : vector<8x32xf32>
    %1094 = arith.mulf %1085, %1029 : vector<8x32xf32>
    %1095 = arith.mulf %1079, %1087 : vector<8x32xf32>
    %1096 = arith.addf %1094, %1095 : vector<8x32xf32>
    %1097 = math.tanh %1096 : vector<8x32xf32>
    %1098 = arith.mulf %1093, %1097 : vector<8x32xf32>
    %c7_i32_318 = arith.constant 7 : i32
    %1099 = arith.subi %c7_i32_318, %c7_i32_309 : i32
    %c8_i32_319 = arith.constant 8 : i32
    %1100 = arith.muli %1099, %c8_i32_319 : i32
    %1101 = tpu.assume_multiple %1100, 8 : i32
    %1102 = arith.index_cast %1101 : i32 to index
    %c0_320 = arith.constant 0 : index
    %1103 = vector.load %arg19[%1102, %c0_320] : memref<64x128xf32, #tpu.memory_space<vmem>>, vector<8x128xf32>
    %1104 = arith.truncf %1065 : vector<8x32xf32> to vector<8x32xbf16>
    %c0_321 = arith.constant 0 : index
    %c0_322 = arith.constant 0 : index
    %1105 = vector.load %arg11[%c0_321, %c0_322] : memref<32x128xbf16, #tpu.memory_space<vmem>>, vector<32x128xbf16>
    %cst_323 = arith.constant dense<0.000000e+00> : vector<8x128xf32>
    %1106 = tpu.matmul %1104, %1105, %cst_323 {dimension_numbers = #tpu.dot_dimension_numbers<[1], [0], [0], [1], [0, 0, 1, 1], [], []>} : vector<8x32xbf16>, vector<32x128xbf16>, vector<8x128xf32> -> vector<8x128xf32>
    %1107 = arith.addf %1103, %1106 : vector<8x128xf32>
    %1108 = vector.extract_strided_slice %1107 {offsets = [0, 0], sizes = [8, 32], strides = [1, 1]} : vector<8x128xf32> to vector<8x32xf32>
    %1109 = arith.negf %1108 : vector<8x32xf32>
    %1110 = math.exp %1109 : vector<8x32xf32>
    %cst_324 = arith.constant 1.000000e+00 : f32
    %1111 = vector.broadcast %cst_324 : f32 to vector<8x32xf32>
    %1112 = arith.addf %1111, %1110 : vector<8x32xf32>
    %1113 = arith.divf %1111, %1112 : vector<8x32xf32>
    %1114 = vector.extract_strided_slice %1107 {offsets = [0, 32], sizes = [8, 32], strides = [1, 1]} : vector<8x128xf32> to vector<8x32xf32>
    %1115 = arith.negf %1114 : vector<8x32xf32>
    %1116 = math.exp %1115 : vector<8x32xf32>
    %cst_325 = arith.constant 1.000000e+00 : f32
    %1117 = vector.broadcast %cst_325 : f32 to vector<8x32xf32>
    %1118 = arith.addf %1117, %1116 : vector<8x32xf32>
    %1119 = arith.divf %1117, %1118 : vector<8x32xf32>
    %1120 = vector.extract_strided_slice %1107 {offsets = [0, 64], sizes = [8, 32], strides = [1, 1]} : vector<8x128xf32> to vector<8x32xf32>
    %1121 = math.tanh %1120 : vector<8x32xf32>
    %1122 = vector.extract_strided_slice %1107 {offsets = [0, 96], sizes = [8, 32], strides = [1, 1]} : vector<8x128xf32> to vector<8x32xf32>
    %1123 = arith.negf %1122 : vector<8x32xf32>
    %1124 = math.exp %1123 : vector<8x32xf32>
    %cst_326 = arith.constant 1.000000e+00 : f32
    %1125 = vector.broadcast %cst_326 : f32 to vector<8x32xf32>
    %1126 = arith.addf %1125, %1124 : vector<8x32xf32>
    %1127 = arith.divf %1125, %1126 : vector<8x32xf32>
    %1128 = arith.mulf %1119, %1063 : vector<8x32xf32>
    %1129 = arith.mulf %1113, %1121 : vector<8x32xf32>
    %1130 = arith.addf %1128, %1129 : vector<8x32xf32>
    %1131 = math.tanh %1130 : vector<8x32xf32>
    %1132 = arith.mulf %1127, %1131 : vector<8x32xf32>
    %c8_i32_327 = arith.constant 8 : i32
    %1133 = arith.truncf %1098 : vector<8x32xf32> to vector<8x32xbf16>
    %c0_328 = arith.constant 0 : index
    %c0_329 = arith.constant 0 : index
    %1134 = vector.load %arg13[%c0_328, %c0_329] : memref<32x128xbf16, #tpu.memory_space<vmem>>, vector<32x128xbf16>
    %cst_330 = arith.constant dense<0.000000e+00> : vector<8x128xf32>
    %1135 = tpu.matmul %1133, %1134, %cst_330 {dimension_numbers = #tpu.dot_dimension_numbers<[1], [0], [0], [1], [0, 0, 1, 1], [], []>} : vector<8x32xbf16>, vector<32x128xbf16>, vector<8x128xf32> -> vector<8x128xf32>
    %1136 = arith.truncf %1132 : vector<8x32xf32> to vector<8x32xbf16>
    %c0_331 = arith.constant 0 : index
    %c0_332 = arith.constant 0 : index
    %1137 = vector.load %arg14[%c0_331, %c0_332] : memref<32x128xbf16, #tpu.memory_space<vmem>>, vector<32x128xbf16>
    %cst_333 = arith.constant dense<0.000000e+00> : vector<8x128xf32>
    %1138 = tpu.matmul %1136, %1137, %cst_333 {dimension_numbers = #tpu.dot_dimension_numbers<[1], [0], [0], [1], [0, 0, 1, 1], [], []>} : vector<8x32xbf16>, vector<32x128xbf16>, vector<8x128xf32> -> vector<8x128xf32>
    %1139 = arith.addf %1135, %1138 : vector<8x128xf32>
    %c0_334 = arith.constant 0 : index
    %c0_335 = arith.constant 0 : index
    %1140 = vector.load %arg15[%c0_334, %c0_335] : memref<1x128xf32, #tpu.memory_space<vmem>>, vector<1x128xf32>
    %1141 = vector.broadcast %1140 : vector<1x128xf32> to vector<8x128xf32>
    %1142 = arith.addf %1139, %1141 : vector<8x128xf32>
    %c0_336 = arith.constant 0 : index
    %c0_337 = arith.constant 0 : index
    %1143 = vector.load %arg16[%c0_336, %c0_337] : memref<8x128xf32, #tpu.memory_space<vmem>>, vector<8x128xf32>
    tpu.vector_store %arg16[%c0_336, %c0_337], %1142 {strides = array<i32>} : memref<8x128xf32, #tpu.memory_space<vmem>>, vector<8x128xf32>,
    return
  }
}

</mosaic_0001>

<bundles_post_ra>
// kernel: tpu_custom_call.1
= control target key start
LH: loop header
LB: loop body
LE: loop exit
PB: predicated region body
PF: predicated region fallthrough
CT: control target
= control target key end

     0   :  { %s4534_s0 = inlined_call_operand.vmem [shape: bf16[64,16], index: 0, kind: input, shape index: {}]   ;;  %s4535_s1 = inlined_call_operand.hbm [shape: bf16[16,128], index: 1, kind: input, shape index: {}]   ;;  %s4536_s2 = inlined_call_operand.hbm [shape: bf16[32,128], index: 2, kind: input, shape index: {}]   ;;  %s4537_s3 = inlined_call_operand.hbm [shape: f32[1,128], index: 3, kind: input, shape index: {}]   ;;  %s4538_s4 = inlined_call_operand.hbm [shape: bf16[16,128], index: 4, kind: input, shape index: {}]   ;;  %s4539_s5 = inlined_call_operand.hbm [shape: bf16[32,128], index: 5, kind: input, shape index: {}]   ;;  %s4540_s6 = inlined_call_operand.hbm [shape: f32[1,128], index: 6, kind: input, shape index: {}]   ;;  %s4541_s7 = inlined_call_operand.vmem [shape: bf16[64,128], index: 7, kind: input, shape index: {}]   ;;  %s4542_s8 = inlined_call_operand.hbm [shape: bf16[32,128], index: 8, kind: input, shape index: {}]   ;;  %s4543_s9 = inlined_call_operand.hbm [shape: f32[1,128], index: 9, kind: input, shape index: {}]   ;;  %s4544_s10 = inlined_call_operand.hbm [shape: bf16[64,128], index: 10, kind: input, shape index: {}]   ;;  %s4545_s11 = inlined_call_operand.vmem [shape: bf16[32,128], index: 11, kind: input, shape index: {}]   ;;  %s4546_s12 = inlined_call_operand.vmem [shape: f32[1,128], index: 12, kind: input, shape index: {}]   ;;  %s4547_s13 = inlined_call_operand.hbm [shape: bf16[32,128], index: 13, kind: input, shape index: {}]   ;;  %s4548_s14 = inlined_call_operand.hbm [shape: bf16[32,128], index: 14, kind: input, shape index: {}]   ;;  %s4549_s15 = inlined_call_operand.vmem [shape: f32[1,128], index: 15, kind: input, shape index: {}]   ;;  %s4550_s16 = inlined_call_operand.hbm [shape: f32[8,128], index: 16, kind: output, shape index: {}]  }
   0x1   :  { %4552 = sst [smem:[#allocation31_spill]] %s4534_s0 }
   0x2   :  { %21 = vsyncpa [#allocation6], 0 }
   0x3   :  { %22 = vsyncpa [#allocation9], 0 }
   0x4   :  { %23 = vsyncpa [#allocation12], 0 }
   0x5   :  { %24 = vsyncpa [#allocation15], 0 }
   0x6   :  { %25 = vsyncpa [#allocation18], 0 }
   0x7   :  { %26 = vsyncpa [#allocation21], 0 }
   0x8   :  { %27 = vsyncpa [#allocation7], 0  ;;  %s47_s23 = sshll.u32 %s4536_s2, 4  ;;  %s3814_s24 = smov [#allocation8]   ;;  %s48_s23 = int_to_ptr.hbm [resolvable:$true] %s47_s23 }
   0x9   :  { %s49_s25 = sshll.u32 %s3814_s24, 4  ;;  %s71_s28 = sshll.u32 %s4538_s4, 4  ;;  %s50_s25 = int_to_ptr.vmem [resolvable:$true] %s49_s25  ;;  %s72_s28 = int_to_ptr.hbm [resolvable:$true] %s71_s28 }
   0xa   :  { %s3815_s29 = smov 64   ;;  %s3816_s30 = smov 4  }
   0xb   :  { %55 = dma.hbm_to_vmem [thread:$0]  %s48_s23, 256, %s50_s25, [#allocation9], %s3815_s29, %s3815_s29, %s3816_s30  }
   0xc   :  { %s3817_s0 = smov [#allocation11]   ;;  %s98_s2 = sshll.u32 %s4540_s6, 4  ;;  %s99_s2 = int_to_ptr.hbm [resolvable:$true] %s98_s2 }
   0xd   :  { %s73_s17 = sshll.u32 %s3817_s0, 4  ;;  %s124_s21 = sshll.u32 %s4543_s9, 4  ;;  %s74_s17 = int_to_ptr.vmem [resolvable:$true] %s73_s17  ;;  %s125_s21 = int_to_ptr.hbm [resolvable:$true] %s124_s21 }
   0xe   :  { %79 = dma.hbm_to_vmem [thread:$0]  %s72_s28, 128, %s74_s17, [#allocation12], %s3815_s29, %s3815_s29, %s3816_s30  }
   0xf   :  { %s3818_s22 = smov [#allocation14]   ;;  %s3819_s23 = smov [#allocation17]  }
  0x10   :  { %s100_s24 = sshll.u32 %s3818_s22, 4  ;;  %s126_s25 = sshll.u32 %s3819_s23, 4  ;;  %s101_s24 = int_to_ptr.vmem [resolvable:$true] %s100_s24  ;;  %s127_s25 = int_to_ptr.vmem [resolvable:$true] %s126_s25 }
  0x11   :  { %103 = dma.hbm_to_vmem [thread:$0]  %s99_s2, 16, %s101_s24, [#allocation15]  }
  0x12   :  { %s151_s6 = sshll.u32 %s4547_s13, 4  ;;  %s34_s17 = sshll.u32 %s4535_s1, 4  ;;  %s152_s6 = int_to_ptr.hbm [resolvable:$true] %s151_s6  ;;  %s35_s17 = int_to_ptr.hbm [resolvable:$true] %s34_s17 }
  0x13   :  { %129 = dma.hbm_to_vmem [thread:$0]  %s125_s21, 16, %s127_s25, [#allocation18]  }
  0x14   :  { %s3820_s18 = smov [#allocation20]   ;;  %s3821_s19 = smov [#allocation5]  }
  0x15   :  { %s153_s9 = sshll.u32 %s3820_s18, 4  ;;  %s36_s2 = sshll.u32 %s3821_s19, 4  ;;  %s154_s9 = int_to_ptr.vmem [resolvable:$true] %s153_s9  ;;  %s37_s2 = int_to_ptr.vmem [resolvable:$true] %s36_s2 }
  0x16   :  { %159 = dma.hbm_to_vmem [thread:$0]  %s152_s6, 256, %s154_s9, [#allocation21], %s3815_s29, %s3815_s29, %s3816_s30  }
  0x17   :  { %s61_s13 = sshll.u32 %s4537_s3, 4  ;;  %s84_s22 = sshll.u32 %s4539_s5, 4  ;;  %s62_s13 = int_to_ptr.hbm [resolvable:$true] %s61_s13  ;;  %s85_s22 = int_to_ptr.hbm [resolvable:$true] %s84_s22 }
  0x18   :  { %42 = dma.hbm_to_vmem [thread:$0]  %s35_s17, 128, %s37_s2, [#allocation6], %s3815_s29, %s3815_s29, %s3816_s30  }
  0x19   :  { %s3822_s24 = smov [#allocation10]   ;;  %s3823_s25 = smov [#allocation13]  }
  0x1a   :  { %s63_s23 = sshll.u32 %s3822_s24, 4  ;;  %s86_s26 = sshll.u32 %s3823_s25, 4  ;;  %s64_s23 = int_to_ptr.vmem [resolvable:$true] %s63_s23  ;;  %s87_s26 = int_to_ptr.vmem [resolvable:$true] %s86_s26 }
  0x1b   :  { %66 = dma.hbm_to_vmem [thread:$0]  %s62_s13, 16, %s64_s23, [#allocation9]  }
  0x1c   :  { %s110_s3 = sshll.u32 %s4542_s8, 4  ;;  %s134_s5 = sshll.u32 %s4544_s10, 4  ;;  %s111_s3 = int_to_ptr.hbm [resolvable:$true] %s110_s3  ;;  %s135_s5 = int_to_ptr.hbm [resolvable:$true] %s134_s5 }
  0x1d   :  { %92 = dma.hbm_to_vmem [thread:$0]  %s85_s22, 256, %s87_s26, [#allocation12], %s3815_s29, %s3815_s29, %s3816_s30  }
  0x1e   :  { %s3824_s17 = smov [#allocation16]   ;;  %s3825_s9 = smov [#allocation19]  }
  0x1f   :  { %s112_s18 = sshll.u32 %s3824_s17, 4  ;;  %s136_s8 = sshll.u32 %s3825_s9, 4  ;;  %s113_s18 = int_to_ptr.vmem [resolvable:$true] %s112_s18  ;;  %s137_s8 = int_to_ptr.vmem [resolvable:$true] %s136_s8 }
  0x20   :  { %118 = dma.hbm_to_vmem [thread:$0]  %s111_s3, 256, %s113_s18, [#allocation15], %s3815_s29, %s3815_s29, %s3816_s30  }
  0x21   :  { %s164_s4 = sshll.u32 %s4548_s14, 4  ;;  %s3826_s10 = smov [#allocation22]   ;;  %s165_s4 = int_to_ptr.hbm [resolvable:$true] %s164_s4 }
  0x22   :  { %142 = dma.hbm_to_vmem [thread:$0]  %s135_s5, 512, %s137_s8, [#allocation18], %s3815_s29, %s3815_s29, %s3816_s30  }
  0x23   :  { %s166_s20 = sshll.u32 %s3826_s10, 4  ;;  %s167_s20 = int_to_ptr.vmem [resolvable:$true] %s166_s20 }
  0x24   :  { %172 = dma.hbm_to_vmem [thread:$0]  %s165_s4, 256, %s167_s20, [#allocation21], %s3815_s29, %s3815_s29, %s3816_s30  }
  0x25   :  { %3800 = dma.done.wait [#allocation6], 128  }
  0x26   :  { %3801 = vsyncadd [#allocation6], 4294967168 }
  0x27   :  { %3802 = dma.done.wait [#allocation9], 272  }
  0x28   :  { %3803 = vsyncadd [#allocation9], 4294967024 }
  0x29   :  { %3804 = dma.done.wait [#allocation12], 384  }
  0x2a   :  { %3805 = vsyncadd [#allocation12], 4294966912 }
  0x2b   :  { %3806 = dma.done.wait [#allocation15], 272  }
  0x2c   :  { %3807 = vsyncadd [#allocation15], 4294967024 }
  0x2d   :  { %3808 = dma.done.wait [#allocation18], 528  }
  0x2e   :  { %3809 = vsyncadd [#allocation18], 4294966768 }
  0x2f   :  { %3810 = dma.done.wait [#allocation21], 512  }
  0x30   :  { %3811 = vsyncadd [#allocation21], 4294966784  ;;  %v3183_v0 = vld [vmem:[#allocation11] sm:$0xff]  ;;  %v3185_v1 = vld [vmem:[#allocation8 + $0x8] sm:$0xff]  ;;  %s4553_s1 = sld [smem:[#allocation31_spill]]  ;;  %vm260_vm0 = vcmask 130048  }
  0x31   :  { %v3182_v3 = vld [vmem:[#allocation5] sm:$0xff]  ;;  %329 = vmatpush.bf16.msra.mxu1 %v3183_v0  ;;  %386 = vmatpush.bf16.msra.mxu2 %v3185_v1  ;;  %v3184_v4 = vld [vmem:[#allocation8] sm:$0xff]  ;;  %v3827_v7 = vmov 0   ;;  %v3248_v11 = vld [vmem:[#allocation14] ss:$0 sm:$0xff]  ;;  %s3828_s26 = smov 32  }
  0x32   :  { %280 = vmatpush.bf16.msra.mxu0 %v3182_v3  ;;  %v3187_v5 = vld [vmem:[#allocation13 + $0x8] sm:$0xff]  ;;  %v3186_v6 = vld [vmem:[#allocation13] sm:$0xff]  ;;  %v3996_v14 = vld [vmem:[#allocation10] ss:$0 sm:$0xff]  ;;  %vm376_vm9 = vcmask 261120   ;;  %s3829_s4 = smov [#allocation23]  }
  0x33   :  { %460 = vmatpush.bf16.msra.mxu3 %v3187_v5  ;;  %s2867_s10 = sshll.u32 %s3829_s4, 4  ;;  %s2869_s13 = sshll.u32 %s4550_s16, 4  ;;  %s2868_s10 = int_to_ptr.vmem [resolvable:$true] %s2867_s10  ;;  %s2870_s13 = int_to_ptr.hbm [resolvable:$true] %s2869_s13 }
  0x35   :  { %387 = vmatpush.bf16.msra.mxu2 %v3184_v4 }
  0x36   :  { %v3178_v2 = vld [vmem:[%s4553_s1] sm:$0xff]  ;;  %v3179_v8 = vld [vmem:[%s4553_s1 + $0x8] sm:$0xff]  ;;  %v3180_v9 = vld [vmem:[%s4553_s1 + $0x10] sm:$0xff] }
  0x37   :  { %2912 = vmatmul.msk.bf16.vlgmr.msra.gmra.mxu1 %vm260_vm0, %v3178_v2  ;;  %2904 = vmatmul.msk.bf16.vlgmr.msra.gmra.mxu0 %vm260_vm0, %v3178_v2  ;;  %v3181_v10 = vld [vmem:[%s4553_s1 + $0x18] sm:$0xff] }
  0x38   :  { %388 = vmatmul.bf16.vlgmr.msra.gmra.mxu2 %v3827_v7  ;;  %461 = vmatpush.bf16.msra.mxu3 %v3186_v6 }
  0x3b   :  { %462 = vmatmul.bf16.vlgmr.msra.gmra.mxu3 %v3827_v7 }
  0x47   :  { %2913 = vmatmul.msk.bf16.gmra.mxu1 %vm260_vm0, %v3179_v8  ;;  %2905 = vmatmul.msk.bf16.gmra.mxu0 %vm260_vm0, %v3179_v8 }
  0x57   :  { %2914 = vmatmul.msk.bf16.gmra.mxu1 %vm260_vm0, %v3180_v9  ;;  %2906 = vmatmul.msk.bf16.gmra.mxu0 %vm260_vm0, %v3180_v9 }
  0x67   :  { %2915 = vmatmul.msk.bf16.gmra.mxu1 %vm260_vm0, %v3181_v10  ;;  %2907 = vmatmul.msk.bf16.gmra.mxu0 %vm260_vm0, %v3181_v10 }
  0xb4   :  { %v331_v12 = vpop.f32.mrf.mxu1  ;;  %v282_v15 = vpop.f32.mrf.mxu0 }
  0xb5   :  { %v3994_v13 = vadd.f32 %v3248_v11, %v331_v12  ;;  %v283_v16 = vadd.f32 %v3996_v14, %v282_v15  ;;  %v3191_v15 = vld [vmem:[#allocation13 + $0x8] sm:$0xff] }
  0xb6   :  { %625 = vmatpush.bf16.msrb.mxu3 %v3191_v15 }
  0xbb   :  { %v389_v18 = vpop.f32.mrf.mxu2 }
  0xbc   :  { %v3999_v17 = vpop.f32.mrf.mxu1  ;;  %v393_v19 = vadd.f32 %v389_v18, %v283_v16  ;;  %v3189_v16 = vld [vmem:[#allocation8 + $0x8] sm:$0xff]  ;;  %v3190_v18 = vld [vmem:[#allocation13] sm:$0xff] }
  0xbd   :  { %543 = vmatpush.bf16.msrb.mxu2 %v3189_v16  ;;  %626 = vmatpush.bf16.msrb.mxu3 %v3190_v18 }
  0xbe   :  { %3253 = vtanh.f32 %v393_v19  ;;  %v463_v22 = vpop.f32.mrf.mxu3  ;;  %v2924_v38 = vmul.f32 -1.442695, %v393_v19  ;;  %v3188_v19 = vld [vmem:[#allocation8] sm:$0xff] }
  0xc1   :  { %544 = vmatpush.bf16.msrb.mxu2 %v3188_v19 }
  0xc3   :  { %v391_v23 = vpop.f32.mrf.mxu2 }
  0xc4   :  { %v336_v20 = vpop.f32.mrf.mxu1  ;;  %v3254_v24 = vpop.eup %3253 }
  0xc5   :  { %v4001_v21 = vadd.f32 %v3248_v11, %v336_v20  ;;  %416 = vrot.lane.b32.xlu1 %v3254_v24, %s3815_s29 }
  0xc6   :  { %v465_v27 = vpop.f32.mrf.mxu3 }
  0xcc   :  { %v338_v25 = vpop.f32.mrf.mxu1 }
  0xcd   :  { %v4004_v26 = vadd.f32 %v3248_v11, %v338_v25 }
  0xd4   :  { %v341_v28 = vpop.f32.mrf.mxu1 }
  0xd5   :  { %v4006_v29 = vadd.f32 %v3248_v11, %v341_v28 }
  0xdc   :  { %v343_v30 = vpop.f32.mrf.mxu1 }
  0xdd   :  { %v4008_v31 = vadd.f32 %v3248_v11, %v343_v30 }
  0xe4   :  { %v346_v32 = vpop.f32.mrf.mxu1 }
  0xe5   :  { %v4010_v33 = vadd.f32 %v3248_v11, %v346_v32  ;;  %v284_v32 = vpop.f32.mrf.mxu0 }
  0xec   :  { %v348_v34 = vpop.f32.mrf.mxu1 }
  0xed   :  { %v349_v35 = vadd.f32 %v3248_v11, %v348_v34  ;;  %v285_v34 = vadd.f32 %v3996_v14, %v284_v32 }
  0xef   :  { %v467_v36 = vadd.f32 %v463_v22, %v349_v35 }
  0xf1   :  { %3255 = vtanh.f32 %v467_v36  ;;  %v2933_v53 = vmul.f32 -1.442695, %v467_v36 }
  0xf2   :  { %3257 = vpow2.f32 %v2924_v38 }
  0xf7   :  { %v3256_v37 = vpop.eup %3255 }
  0xf8   :  { %490 = vrot.lane.b32.xlu0 %v3256_v37, %s3815_s29  ;;  %v3258_v39 = vpop.eup %3257 }
  0xf9   :  { %v397_v40 = vadd.f32 1.0, %v3258_v39 }
  0xfb   :  { %3259 = vrcp.f32 %v397_v40  ;;  %vm403_vm1 = vweird.f32 %v397_v40  ;;  %v409_v45 = vand.u32 2147483648, %v397_v40  ;;  %v407_v47 = vand.u32 2147483647, %v397_v40 }
  0xfc   :  { %3261 = vpow2.f32 %v2933_v53 }
  0xfd   :  { %v410_v48 = vor.u32 1.1754944e-38, %v409_v45  ;;  %vm408_vm4 = vcmp.eq.f32.partialorder %v407_v47, 8.507059e+37 }
 0x101   :  { %v3260_v41 = vpop.eup %3259 }
 0x102   :  { %v399_v42 = vmul.f32 %v3260_v41, %v397_v40  ;;  %vm404_vm2 = vweird.f32 %v3260_v41  ;;  %v3262_v54 = vpop.eup %3261 }
 0x103   :  { %vm405_vm3 = vmor %vm403_vm1, %vm404_vm2  ;;  %v471_v55 = vadd.f32 1.0, %v3262_v54 }
 0x104   :  { %v400_v43 = vsub.f32 1.0, %v399_v42 }
 0x105   :  { %3263 = vrcp.f32 %v471_v55  ;;  %v483_v61 = vand.u32 2147483648, %v471_v55  ;;  %vm477_vm6 = vweird.f32 %v471_v55  ;;  %v481_v62 = vand.u32 2147483647, %v471_v55 }
 0x106   :  { %v401_v44 = vmul.f32 %v3260_v41, %v400_v43 }
 0x107   :  { %v484_v0 = vor.u32 1.1754944e-38, %v483_v61  ;;  %vm482_vm8 = vcmp.eq.f32.partialorder %v481_v62, 8.507059e+37 }
 0x108   :  { %v402_v46 = vadd.f32 %v3260_v41, %v401_v44 }
 0x10a   :  { %v406_v49 = vsel %vm405_vm3, %v3260_v41, %v402_v46 }
 0x10b   :  { %v411_v51 = vsel %vm408_vm4, %v410_v48, %v406_v49  ;;  %v3264_v56 = vpop.eup %3263 }
 0x10c   :  { %v473_v57 = vmul.f32 %v3264_v56, %v471_v55  ;;  %vm478_vm5 = vweird.f32 %v3264_v56  ;;  %v414_v4 = vmul.f32 0.0, %v411_v51 }
 0x10d   :  { %vm479_vm7 = vmor %vm477_vm6, %vm478_vm5 }
 0x10e   :  { %v474_v58 = vsub.f32 1.0, %v473_v57 }
 0x110   :  { %v475_v59 = vmul.f32 %v3264_v56, %v474_v58 }
 0x112   :  { %v476_v60 = vadd.f32 %v3264_v56, %v475_v59 }
 0x114   :  { %v480_v63 = vsel %vm479_vm7, %v3264_v56, %v476_v60 }
 0x115   :  { %v485_v2 = vsel %vm482_vm8, %v484_v0, %v480_v63 }
 0x116   :  { %v488_v9 = vmul.f32 0.0, %v485_v2 }
 0x137   :  { %v417_v50 = vpop.permute.xlu1 %416 }
 0x138   :  { %v419_v52 = vmul.f32 %v417_v50, %v411_v51 }
 0x13a   :  { %421 = vrot.lane.b32.xlu1 %v419_v52, %s3828_s26 }
 0x16a   :  { %v491_v1 = vpop.permute.xlu0 %490 }
 0x16b   :  { %v493_v3 = vmul.f32 %v491_v1, %v485_v2 }
 0x16d   :  { %495 = vrot.lane.b32.xlu0 %v493_v3, %s3828_s26 }
 0x1ac   :  { %v422_v5 = vpop.permute.xlu1 %421 }
 0x1ad   :  { %v4015_v6 = vadd.f32 %v422_v5, %v414_v4 }
 0x1af   :  { %3265 = vtanh.f32 %v4015_v6 }
 0x1b5   :  { %v3266_v8 = vpop.eup %3265 }
 0x1b6   :  { %427 = vrot.lane.b32.xlu0 %v3266_v8, %s3815_s29 }
 0x1df   :  { %v496_v10 = vpop.permute.xlu0 %495 }
 0x1e0   :  { %v4019_v11 = vadd.f32 %v496_v10, %v488_v9 }
 0x1e2   :  { %3267 = vtanh.f32 %v4019_v11 }
 0x1e8   :  { %v3268_v12 = vpop.eup %3267 }
 0x1e9   :  { %501 = vrot.lane.b32.xlu2 %v3268_v12, %s3815_s29 }
 0x228   :  { %v428_v20 = vpop.permute.xlu0 %427 }
 0x229   :  { %v4023_v22 = vmul.f32 %v428_v20, %v411_v51 }
 0x22b   :  { %v514_v23 = vpack.c.bf16 %v4023_v22, %v4023_v22 }
 0x22d   :  { %520 = vrot.lane.b32.xlu1 %v514_v23, %s3828_s26 }
 0x243   :  { %v502_v24 = vpop.permute.xlu2 %501 }
 0x244   :  { %v4028_v25 = vmul.f32 %v502_v24, %v485_v2  ;;  %v3193_v24 = vld [vmem:[#allocation8 + $0x8] sm:$0xff] }
 0x245   :  { %707 = vmatpush.bf16.msra.mxu2 %v3193_v24 }
 0x246   :  { %v596_v27 = vpack.c.bf16 %v4028_v25, %v4028_v25 }
 0x248   :  { %602 = vrot.lane.b32.xlu2 %v596_v27, %s3828_s26  ;;  %v3192_v27 = vld [vmem:[#allocation8] sm:$0xff] }
 0x249   :  { %708 = vmatpush.bf16.msra.mxu2 %v3192_v27 }
 0x29f   :  { %v521_v30 = vpop.permute.xlu1 %520 }
 0x2a0   :  { %2942 = vmatmul.msk.bf16.vlgmr.msrb.gmra.mxu2 %vm376_vm9, %v521_v30 }
 0x2a2   :  { %v603_v28 = vpop.permute.xlu2 %602 }
 0x2a3   :  { %2952 = vmatmul.msk.bf16.vlgmr.msrb.gmra.mxu3 %vm376_vm9, %v603_v28 }
 0x323   :  { %v546_v35 = vpop.f32.mrf.mxu2 }
 0x324   :  { %v550_v37 = vadd.f32 %v546_v35, %v285_v34  ;;  %v3195_v35 = vld [vmem:[#allocation13 + $0x8] sm:$0xff] }
 0x325   :  { %789 = vmatpush.bf16.msra.mxu3 %v3195_v35 }
 0x326   :  { %v628_v36 = vpop.f32.mrf.mxu3  ;;  %3269 = vtanh.f32 %v550_v37  ;;  %v2943_v47 = vmul.f32 -1.442695, %v550_v37 }
 0x327   :  { %v632_v38 = vadd.f32 %v628_v36, %v4010_v33  ;;  %v3194_v36 = vld [vmem:[#allocation13] sm:$0xff] }
 0x329   :  { %3271 = vtanh.f32 %v632_v38  ;;  %v2953_v43 = vmul.f32 -1.442695, %v632_v38  ;;  %790 = vmatpush.bf16.msra.mxu3 %v3194_v36  ;;  %v3199_v36 = vld [vmem:[#allocation13 + $0x8] sm:$0xff] }
 0x32b   :  { %v548_v39 = vpop.f32.mrf.mxu2  ;;  %3273 = vpow2.f32 %v2953_v43 }
 0x32c   :  { %v3270_v41 = vpop.eup %3269  ;;  %v287_v39 = vpop.f32.mrf.mxu0 }
 0x32d   :  { %573 = vrot.lane.b32.xlu1 %v3270_v41, %s3815_s29  ;;  %953 = vmatpush.bf16.msrb.mxu3 %v3199_v36 }
 0x32e   :  { %v630_v40 = vpop.f32.mrf.mxu3 }
 0x32f   :  { %v3272_v42 = vpop.eup %3271  ;;  %v288_v40 = vadd.f32 %v3996_v14, %v287_v39 }
 0x330   :  { %655 = vrot.lane.b32.xlu2 %v3272_v42, %s3815_s29 }
 0x331   :  { %v3274_v44 = vpop.eup %3273 }
 0x332   :  { %v636_v45 = vadd.f32 1.0, %v3274_v44 }
 0x334   :  { %3275 = vrcp.f32 %v636_v45  ;;  %v648_v53 = vand.u32 2147483648, %v636_v45  ;;  %vm642_vm11 = vweird.f32 %v636_v45  ;;  %v646_v54 = vand.u32 2147483647, %v636_v45 }
 0x335   :  { %3277 = vpow2.f32 %v2943_v47 }
 0x336   :  { %v649_v56 = vor.u32 1.1754944e-38, %v648_v53  ;;  %vm647_vm13 = vcmp.eq.f32.partialorder %v646_v54, 8.507059e+37 }
 0x33a   :  { %v3276_v46 = vpop.eup %3275 }
 0x33b   :  { %v638_v48 = vmul.f32 %v3276_v46, %v636_v45  ;;  %v3278_v49 = vpop.eup %3277  ;;  %vm643_vm10 = vweird.f32 %v3276_v46 }
 0x33c   :  { %v554_v51 = vadd.f32 1.0, %v3278_v49  ;;  %vm644_vm12 = vmor %vm642_vm11, %vm643_vm10 }
 0x33d   :  { %v639_v33 = vsub.f32 1.0, %v638_v48 }
 0x33e   :  { %3279 = vrcp.f32 %v554_v51  ;;  %v566_v1 = vand.u32 2147483648, %v554_v51  ;;  %vm560_vm15 = vweird.f32 %v554_v51  ;;  %v564_v2 = vand.u32 2147483647, %v554_v51 }
 0x33f   :  { %v640_v50 = vmul.f32 %v3276_v46, %v639_v33 }
 0x340   :  { %v567_v4 = vor.u32 1.1754944e-38, %v566_v1  ;;  %vm565_vm1 = vcmp.eq.f32.partialorder %v564_v2, 8.507059e+37 }
 0x341   :  { %v641_v52 = vadd.f32 %v3276_v46, %v640_v50 }
 0x343   :  { %v645_v55 = vsel %vm644_vm12, %v3276_v46, %v641_v52 }
 0x344   :  { %v650_v58 = vsel %vm647_vm13, %v649_v56, %v645_v55  ;;  %v3280_v59 = vpop.eup %3279 }
 0x345   :  { %v556_v61 = vmul.f32 %v3280_v59, %v554_v51  ;;  %vm561_vm14 = vweird.f32 %v3280_v59  ;;  %v653_v15 = vmul.f32 %v650_v58, %v4019_v11 }
 0x346   :  { %vm562_vm0 = vmor %vm560_vm15, %vm561_vm14 }
 0x347   :  { %v557_v62 = vsub.f32 1.0, %v556_v61 }
 0x349   :  { %v558_v63 = vmul.f32 %v3280_v59, %v557_v62 }
 0x34b   :  { %v559_v0 = vadd.f32 %v3280_v59, %v558_v63 }
 0x34d   :  { %v563_v3 = vsel %vm562_vm0, %v3280_v59, %v559_v0 }
 0x34e   :  { %v568_v8 = vsel %vm565_vm1, %v567_v4, %v563_v3 }
 0x34f   :  { %v571_v10 = vmul.f32 %v568_v8, %v4015_v6 }
 0x38a   :  { %v656_v57 = vpop.permute.xlu2 %655 }
 0x38b   :  { %v658_v60 = vmul.f32 %v656_v57, %v650_v58 }
 0x38d   :  { %660 = vrot.lane.b32.xlu0 %v658_v60, %s3828_s26 }
 0x39f   :  { %v574_v5 = vpop.permute.xlu1 %573 }
 0x3a0   :  { %v576_v9 = vmul.f32 %v574_v5, %v568_v8 }
 0x3a2   :  { %578 = vrot.lane.b32.xlu2 %v576_v9, %s3828_s26 }
 0x3fc   :  { %v579_v12 = vpop.permute.xlu2 %578 }
 0x3fd   :  { %v4043_v16 = vadd.f32 %v579_v12, %v571_v10 }
 0x3ff   :  { %v661_v18 = vpop.permute.xlu0 %660  ;;  %3281 = vtanh.f32 %v4043_v16 }
 0x400   :  { %v4045_v19 = vadd.f32 %v661_v18, %v653_v15 }
 0x402   :  { %3283 = vtanh.f32 %v4045_v19 }
 0x405   :  { %v3282_v20 = vpop.eup %3281 }
 0x406   :  { %584 = vrot.lane.b32.xlu2 %v3282_v20, %s3815_s29 }
 0x408   :  { %v3284_v23 = vpop.eup %3283 }
 0x409   :  { %666 = vrot.lane.b32.xlu0 %v3284_v23, %s3815_s29 }
 0x460   :  { %v585_v6 = vpop.permute.xlu2 %584 }
 0x461   :  { %v4051_v11 = vmul.f32 %v585_v6, %v568_v8 }
 0x463   :  { %v678_v28 = vpack.c.bf16 %v4051_v11, %v4051_v11 }
 0x465   :  { %684 = vrot.lane.b32.xlu0 %v678_v28, %s3828_s26 }
 0x47b   :  { %v667_v30 = vpop.permute.xlu0 %666 }
 0x47c   :  { %v4056_v32 = vmul.f32 %v667_v30, %v650_v58 }
 0x47e   :  { %v760_v34 = vpack.c.bf16 %v4056_v32, %v4056_v32 }
 0x480   :  { %766 = vrot.lane.b32.xlu1 %v760_v34, %s3828_s26 }
 0x4d7   :  { %v685_v37 = vpop.permute.xlu0 %684 }
 0x4d8   :  { %2962 = vmatmul.msk.bf16.vlgmr.msra.gmra.mxu2 %vm376_vm9, %v685_v37  ;;  %v3196_v37 = vld [vmem:[#allocation8] sm:$0xff] }
 0x4f2   :  { %v767_v38 = vpop.permute.xlu1 %766 }
 0x4f3   :  { %2972 = vmatmul.msk.bf16.vlgmr.msra.gmra.mxu3 %vm376_vm9, %v767_v38 }
 0x55b   :  { %v710_v41 = vpop.f32.mrf.mxu2 }
 0x55c   :  { %v714_v42 = vadd.f32 %v710_v41, %v288_v40 }
 0x55e   :  { %3285 = vtanh.f32 %v714_v42  ;;  %v2963_v33 = vmul.f32 -1.442695, %v714_v42 }
 0x563   :  { %v712_v43 = vpop.f32.mrf.mxu2 }
 0x564   :  { %v3286_v44 = vpop.eup %3285 }
 0x565   :  { %737 = vrot.lane.b32.xlu0 %v3286_v44, %s3815_s29 }
 0x576   :  { %v792_v45 = vpop.f32.mrf.mxu3 }
 0x577   :  { %v796_v46 = vadd.f32 %v792_v45, %v4008_v31 }
 0x579   :  { %3287 = vtanh.f32 %v796_v46  ;;  %v2973_v52 = vmul.f32 -1.442695, %v796_v46  ;;  %v289_v46 = vpop.f32.mrf.mxu0 }
 0x57a   :  { %3289 = vpow2.f32 %v2963_v33 }
 0x57e   :  { %v794_v47 = vpop.f32.mrf.mxu3 }
 0x57f   :  { %v3288_v48 = vpop.eup %3287  ;;  %v290_v47 = vadd.f32 %v3996_v14, %v289_v46  ;;  %v3202_v46 = vld [vmem:[#allocation13] sm:$0xff] }
 0x580   :  { %819 = vrot.lane.b32.xlu1 %v3288_v48, %s3815_s29  ;;  %v3290_v49 = vpop.eup %3289 }
 0x581   :  { %v718_v50 = vadd.f32 1.0, %v3290_v49 }
 0x583   :  { %3291 = vrcp.f32 %v718_v50  ;;  %v730_v31 = vand.u32 2147483648, %v718_v50  ;;  %vm724_vm3 = vweird.f32 %v718_v50  ;;  %v728_v59 = vand.u32 2147483647, %v718_v50 }
 0x584   :  { %3293 = vpow2.f32 %v2973_v52 }
 0x585   :  { %v731_v61 = vor.u32 1.1754944e-38, %v730_v31  ;;  %vm729_vm5 = vcmp.eq.f32.partialorder %v728_v59, 8.507059e+37 }
 0x589   :  { %v3292_v51 = vpop.eup %3291 }
 0x58a   :  { %v720_v53 = vmul.f32 %v3292_v51, %v718_v50  ;;  %v3294_v56 = vpop.eup %3293  ;;  %vm725_vm2 = vweird.f32 %v3292_v51 }
 0x58b   :  { %v800_v57 = vadd.f32 1.0, %v3294_v56  ;;  %vm726_vm4 = vmor %vm724_vm3, %vm725_vm2 }
 0x58c   :  { %v721_v54 = vsub.f32 1.0, %v720_v53 }
 0x58d   :  { %3295 = vrcp.f32 %v800_v57  ;;  %v812_v8 = vand.u32 2147483648, %v800_v57  ;;  %vm806_vm7 = vweird.f32 %v800_v57  ;;  %v810_v9 = vand.u32 2147483647, %v800_v57 }
 0x58e   :  { %v722_v55 = vmul.f32 %v3292_v51, %v721_v54 }
 0x58f   :  { %v813_v12 = vor.u32 1.1754944e-38, %v812_v8  ;;  %vm811_vm10 = vcmp.eq.f32.partialorder %v810_v9, 8.507059e+37 }
 0x590   :  { %v723_v58 = vadd.f32 %v3292_v51, %v722_v55 }
 0x592   :  { %v727_v60 = vsel %vm726_vm4, %v3292_v51, %v723_v58 }
 0x593   :  { %v732_v63 = vsel %vm729_vm5, %v731_v61, %v727_v60  ;;  %v3296_v1 = vpop.eup %3295 }
 0x594   :  { %v802_v2 = vmul.f32 %v3296_v1, %v800_v57  ;;  %vm807_vm6 = vweird.f32 %v3296_v1  ;;  %v735_v23 = vmul.f32 %v732_v63, %v4043_v16  ;;  %v3197_v16 = vld [vmem:[#allocation8 + $0x8] sm:$0xff] }
 0x595   :  { %vm808_vm8 = vmor %vm806_vm7, %vm807_vm6  ;;  %871 = vmatpush.bf16.msrb.mxu2 %v3197_v16 }
 0x596   :  { %v803_v3 = vsub.f32 1.0, %v802_v2 }
 0x598   :  { %v804_v4 = vmul.f32 %v3296_v1, %v803_v3 }
 0x599   :  { %872 = vmatpush.bf16.msrb.mxu2 %v3196_v37 }
 0x59a   :  { %v805_v5 = vadd.f32 %v3296_v1, %v804_v4 }
 0x59c   :  { %v809_v10 = vsel %vm808_vm8, %v3296_v1, %v805_v5 }
 0x59d   :  { %v814_v18 = vsel %vm811_vm10, %v813_v12, %v809_v10 }
 0x59e   :  { %v817_v24 = vmul.f32 %v814_v18, %v4045_v19  ;;  %v3198_v19 = vld [vmem:[#allocation13] sm:$0xff] }
 0x59f   :  { %954 = vmatpush.bf16.msrb.mxu3 %v3198_v19 }
 0x5d7   :  { %v738_v62 = vpop.permute.xlu0 %737 }
 0x5d8   :  { %v740_v0 = vmul.f32 %v738_v62, %v732_v63 }
 0x5da   :  { %742 = vrot.lane.b32.xlu1 %v740_v0, %s3828_s26 }
 0x5f2   :  { %v820_v15 = vpop.permute.xlu1 %819 }
 0x5f3   :  { %v822_v20 = vmul.f32 %v820_v15, %v814_v18 }
 0x5f5   :  { %824 = vrot.lane.b32.xlu2 %v822_v20, %s3828_s26 }
 0x64c   :  { %v743_v6 = vpop.permute.xlu1 %742 }
 0x64d   :  { %v4071_v28 = vadd.f32 %v743_v6, %v735_v23 }
 0x64f   :  { %v825_v27 = vpop.permute.xlu2 %824  ;;  %3297 = vtanh.f32 %v4071_v28 }
 0x650   :  { %v4073_v30 = vadd.f32 %v825_v27, %v817_v24 }
 0x652   :  { %3299 = vtanh.f32 %v4073_v30 }
 0x655   :  { %v3298_v34 = vpop.eup %3297 }
 0x656   :  { %748 = vrot.lane.b32.xlu1 %v3298_v34, %s3815_s29 }
 0x658   :  { %v3300_v35 = vpop.eup %3299 }
 0x659   :  { %830 = vrot.lane.b32.xlu2 %v3300_v35, %s3815_s29 }
 0x6b3   :  { %v831_v38 = vpop.permute.xlu2 %830 }
 0x6b4   :  { %v4079_v39 = vmul.f32 %v831_v38, %v814_v18 }
 0x6b6   :  { %v924_v40 = vpack.c.bf16 %v4079_v39, %v4079_v39 }
 0x6b8   :  { %930 = vrot.lane.b32.xlu0 %v924_v40, %s3828_s26 }
 0x6c8   :  { %v749_v41 = vpop.permute.xlu1 %748 }
 0x6c9   :  { %v4084_v42 = vmul.f32 %v749_v41, %v732_v63 }
 0x6cb   :  { %v842_v43 = vpack.c.bf16 %v4084_v42, %v4084_v42 }
 0x6cd   :  { %848 = vrot.lane.b32.xlu2 %v842_v43, %s3828_s26 }
 0x727   :  { %v849_v44 = vpop.permute.xlu2 %848 }
 0x728   :  { %2982 = vmatmul.msk.bf16.vlgmr.msrb.gmra.mxu2 %vm376_vm9, %v849_v44  ;;  %v3203_v44 = vld [vmem:[#allocation13 + $0x8] sm:$0xff] }
 0x729   :  { %1116 = vmatpush.bf16.msrb.mxu1 %v3203_v44 }
 0x72a   :  { %v931_v45 = vpop.permute.xlu0 %930 }
 0x72b   :  { %2992 = vmatmul.msk.bf16.vlgmr.msrb.gmra.mxu3 %vm376_vm9, %v931_v45 }
 0x72d   :  { %1117 = vmatpush.bf16.msrb.mxu1 %v3202_v46 }
 0x7ab   :  { %v874_v48 = vpop.f32.mrf.mxu2 }
 0x7ac   :  { %v878_v33 = vadd.f32 %v874_v48, %v290_v47  ;;  %v3200_v47 = vld [vmem:[#allocation8] sm:$0xff] }
 0x7ae   :  { %v956_v49 = vpop.f32.mrf.mxu3  ;;  %3301 = vtanh.f32 %v878_v33  ;;  %v2983_v55 = vmul.f32 -1.442695, %v878_v33 }
 0x7af   :  { %v960_v50 = vadd.f32 %v956_v49, %v4006_v29 }
 0x7b1   :  { %3303 = vtanh.f32 %v960_v50  ;;  %v2993_v31 = vmul.f32 -1.442695, %v960_v50 }
 0x7b2   :  { %3305 = vpow2.f32 %v2983_v55 }
 0x7b3   :  { %v876_v51 = vpop.f32.mrf.mxu2 }
 0x7b4   :  { %v3302_v52 = vpop.eup %3301 }
 0x7b5   :  { %901 = vrot.lane.b32.xlu2 %v3302_v52, %s3815_s29 }
 0x7b6   :  { %v958_v53 = vpop.f32.mrf.mxu3 }
 0x7b7   :  { %v3304_v54 = vpop.eup %3303  ;;  %v292_v53 = vpop.f32.mrf.mxu0 }
 0x7b8   :  { %983 = vrot.lane.b32.xlu0 %v3304_v54, %s3815_s29  ;;  %v3306_v56 = vpop.eup %3305 }
 0x7b9   :  { %v882_v57 = vadd.f32 1.0, %v3306_v56 }
 0x7bb   :  { %3307 = vrcp.f32 %v882_v57  ;;  %v894_v0 = vand.u32 2147483648, %v882_v57  ;;  %vm888_vm12 = vweird.f32 %v882_v57  ;;  %v892_v1 = vand.u32 2147483647, %v882_v57 }
 0x7bc   :  { %3309 = vpow2.f32 %v2993_v31 }
 0x7bd   :  { %v895_v3 = vor.u32 1.1754944e-38, %v894_v0  ;;  %vm893_vm14 = vcmp.eq.f32.partialorder %v892_v1, 8.507059e+37 }
 0x7bf   :  { %v4119_v54 = vpop.f32.mrf.mxu0 }
 0x7c1   :  { %v3308_v58 = vpop.eup %3307 }
 0x7c2   :  { %v884_v59 = vmul.f32 %v3308_v58, %v882_v57  ;;  %v3310_v61 = vpop.eup %3309  ;;  %vm889_vm11 = vweird.f32 %v3308_v58  ;;  %v293_v57 = vadd.f32 %v3996_v14, %v292_v53 }
 0x7c3   :  { %v964_v62 = vadd.f32 1.0, %v3310_v61  ;;  %vm890_vm13 = vmor %vm888_vm12, %vm889_vm11 }
 0x7c4   :  { %v885_v29 = vsub.f32 1.0, %v884_v59 }
 0x7c5   :  { %3311 = vrcp.f32 %v964_v62  ;;  %v976_v20 = vand.u32 2147483648, %v964_v62  ;;  %vm970_vm0 = vweird.f32 %v964_v62  ;;  %v974_v23 = vand.u32 2147483647, %v964_v62 }
 0x7c6   :  { %v886_v60 = vmul.f32 %v3308_v58, %v885_v29 }
 0x7c7   :  { %v977_v6 = vor.u32 1.1754944e-38, %v976_v20  ;;  %vm975_vm2 = vcmp.eq.f32.partialorder %v974_v23, 8.507059e+37  ;;  %v4121_v55 = vpop.f32.mrf.mxu0 }
 0x7c8   :  { %v887_v63 = vadd.f32 %v3308_v58, %v886_v60 }
 0x7ca   :  { %v891_v2 = vsel %vm890_vm13, %v3308_v58, %v887_v63 }
 0x7cb   :  { %v896_v5 = vsel %vm893_vm14, %v895_v3, %v891_v2  ;;  %v3312_v9 = vpop.eup %3311 }
 0x7cc   :  { %v966_v10 = vmul.f32 %v3312_v9, %v964_v62  ;;  %vm971_vm15 = vweird.f32 %v3312_v9  ;;  %v899_v36 = vmul.f32 %v896_v5, %v4071_v28  ;;  %v3201_v28 = vld [vmem:[#allocation8 + $0x8] sm:$0xff] }
 0x7cd   :  { %vm972_vm1 = vmor %vm970_vm0, %vm971_vm15  ;;  %1035 = vmatpush.bf16.msrb.mxu0 %v3201_v28 }
 0x7ce   :  { %v967_v12 = vsub.f32 1.0, %v966_v10 }
 0x7cf   :  { %v4123_v56 = vpop.f32.mrf.mxu0 }
 0x7d0   :  { %v968_v15 = vmul.f32 %v3312_v9, %v967_v12 }
 0x7d1   :  { %1036 = vmatpush.bf16.msrb.mxu0 %v3200_v47 }
 0x7d2   :  { %v969_v18 = vadd.f32 %v3312_v9, %v968_v15 }
 0x7d4   :  { %v973_v24 = vsel %vm972_vm1, %v3312_v9, %v969_v18 }
 0x7d5   :  { %v978_v34 = vsel %vm975_vm2, %v977_v6, %v973_v24 }
 0x7d6   :  { %v981_v38 = vmul.f32 %v978_v34, %v4073_v30 }
 0x80f   :  { %v902_v4 = vpop.permute.xlu2 %901 }
 0x810   :  { %v904_v8 = vmul.f32 %v902_v4, %v896_v5 }
 0x812   :  { %906 = vrot.lane.b32.xlu0 %v904_v8, %s3828_s26 }
 0x82a   :  { %v984_v27 = vpop.permute.xlu0 %983 }
 0x82b   :  { %v986_v35 = vmul.f32 %v984_v27, %v978_v34 }
 0x82d   :  { %988 = vrot.lane.b32.xlu1 %v986_v35, %s3828_s26 }
 0x884   :  { %v907_v16 = vpop.permute.xlu0 %906 }
 0x885   :  { %v4098_v19 = vadd.f32 %v907_v16, %v899_v36 }
 0x887   :  { %3313 = vtanh.f32 %v4098_v19 }
 0x88d   :  { %v3314_v37 = vpop.eup %3313 }
 0x88e   :  { %912 = vrot.lane.b32.xlu0 %v3314_v37, %s3815_s29 }
 0x89f   :  { %v989_v40 = vpop.permute.xlu1 %988 }
 0x8a0   :  { %v4103_v41 = vadd.f32 %v989_v40, %v981_v38 }
 0x8a2   :  { %3315 = vtanh.f32 %v4103_v41 }
 0x8a8   :  { %v3316_v43 = vpop.eup %3315 }
 0x8a9   :  { %994 = vrot.lane.b32.xlu1 %v3316_v43, %s3815_s29 }
 0x900   :  { %v913_v45 = vpop.permute.xlu0 %912 }
 0x901   :  { %v4107_v48 = vmul.f32 %v913_v45, %v896_v5 }
 0x903   :  { %v1006_v30 = vpack.c.bf16 %v4107_v48, %v4107_v48 }
 0x905   :  { %1012 = vrot.lane.b32.xlu1 %v1006_v30, %s3828_s26 }
 0x91b   :  { %v995_v33 = vpop.permute.xlu1 %994 }
 0x91c   :  { %v4112_v49 = vmul.f32 %v995_v33, %v978_v34 }
 0x91e   :  { %v1087_v50 = vpack.c.bf16 %v4112_v49, %v4112_v49 }
 0x920   :  { %1093 = vrot.lane.b32.xlu2 %v1087_v50, %s3828_s26 }
 0x977   :  { %v1013_v51 = vpop.permute.xlu1 %1012 }
 0x978   :  { %3002 = vmatmul.msk.bf16.vlgmr.msrb.gmra.mxu0 %vm376_vm9, %v1013_v51 }
 0x97a   :  { %v1094_v52 = vpop.permute.xlu2 %1093 }
 0x97b   :  { %3012 = vmatmul.msk.bf16.vlgmr.msrb.gmra.mxu1 %vm376_vm9, %v1094_v52 }
 0x9f5   :  { %v1038_v58 = vpop.f32.mrf.mxu0 }
 0x9f6   :  { %v1042_v31 = vadd.f32 %v1038_v58, %v293_v57  ;;  %v3205_v58 = vld [vmem:[#allocation8 + $0x8] sm:$0xff] }
 0x9f7   :  { %1197 = vmatpush.bf16.msra.mxu2 %v3205_v58 }
 0x9f8   :  { %v1119_v59 = vpop.f32.mrf.mxu1  ;;  %3317 = vtanh.f32 %v1042_v31  ;;  %v3003_v4 = vmul.f32 -1.442695, %v1042_v31  ;;  %v3204_v31 = vld [vmem:[#allocation8] sm:$0xff] }
 0x9f9   :  { %v1123_v29 = vadd.f32 %v1119_v59, %v4004_v26 }
 0x9fb   :  { %3319 = vtanh.f32 %v1123_v29  ;;  %v3013_v0 = vmul.f32 -1.442695, %v1123_v29  ;;  %1198 = vmatpush.bf16.msra.mxu2 %v3204_v31 }
 0x9fd   :  { %v1040_v60 = vpop.f32.mrf.mxu0  ;;  %3321 = vpow2.f32 %v3013_v0 }
 0x9fe   :  { %v3318_v61 = vpop.eup %3317 }
 0x9ff   :  { %1065 = vrot.lane.b32.xlu1 %v3318_v61, %s3815_s29 }
 0xa00   :  { %v1121_v62 = vpop.f32.mrf.mxu1 }
 0xa01   :  { %v3320_v63 = vpop.eup %3319  ;;  %v3207_v62 = vld [vmem:[#allocation13 + $0x8] sm:$0xff] }
 0xa02   :  { %1146 = vrot.lane.b32.xlu2 %v3320_v63, %s3815_s29  ;;  %1278 = vmatpush.bf16.msra.mxu3 %v3207_v62  ;;  %v3206_v63 = vld [vmem:[#allocation13] sm:$0xff] }
 0xa03   :  { %v3322_v1 = vpop.eup %3321 }
 0xa04   :  { %v1127_v2 = vadd.f32 1.0, %v3322_v1 }
 0xa06   :  { %3323 = vrcp.f32 %v1127_v2  ;;  %v1139_v15 = vand.u32 2147483648, %v1127_v2  ;;  %vm1133_vm4 = vweird.f32 %v1127_v2  ;;  %v1137_v18 = vand.u32 2147483647, %v1127_v2  ;;  %1279 = vmatpush.bf16.msra.mxu3 %v3206_v63 }
 0xa07   :  { %3325 = vpow2.f32 %v3003_v4 }
 0xa08   :  { %v1140_v23 = vor.u32 1.1754944e-38, %v1139_v15  ;;  %vm1138_vm6 = vcmp.eq.f32.partialorder %v1137_v18, 8.507059e+37 }
 0xa0c   :  { %v3324_v3 = vpop.eup %3323 }
 0xa0d   :  { %v1129_v5 = vmul.f32 %v3324_v3, %v1127_v2  ;;  %v3326_v8 = vpop.eup %3325  ;;  %vm1134_vm3 = vweird.f32 %v3324_v3  ;;  %v295_v2 = vadd.f32 %v3996_v14, %v4119_v54 }
 0xa0e   :  { %v1046_v10 = vadd.f32 1.0, %v3326_v8  ;;  %vm1135_vm5 = vmor %vm1133_vm4, %vm1134_vm3 }
 0xa0f   :  { %v1130_v26 = vsub.f32 1.0, %v1129_v5 }
 0xa10   :  { %3327 = vrcp.f32 %v1046_v10  ;;  %v1058_v38 = vand.u32 2147483648, %v1046_v10  ;;  %vm1052_vm8 = vweird.f32 %v1046_v10  ;;  %v1056_v40 = vand.u32 2147483647, %v1046_v10 }
 0xa11   :  { %v1131_v9 = vmul.f32 %v3324_v3, %v1130_v26 }
 0xa12   :  { %v1059_v44 = vor.u32 1.1754944e-38, %v1058_v38  ;;  %vm1057_vm11 = vcmp.eq.f32.partialorder %v1056_v40, 8.507059e+37 }
 0xa13   :  { %v1132_v12 = vadd.f32 %v3324_v3, %v1131_v9 }
 0xa15   :  { %v1136_v20 = vsel %vm1135_vm5, %v3324_v3, %v1132_v12 }
 0xa16   :  { %v1141_v6 = vsel %vm1138_vm6, %v1140_v23, %v1136_v20  ;;  %v3328_v27 = vpop.eup %3327 }
 0xa17   :  { %v1048_v35 = vmul.f32 %v3328_v27, %v1046_v10  ;;  %vm1053_vm7 = vweird.f32 %v3328_v27  ;;  %v1144_v33 = vmul.f32 %v1141_v6, %v4103_v41 }
 0xa18   :  { %vm1054_vm10 = vmor %vm1052_vm8, %vm1053_vm7 }
 0xa19   :  { %v1049_v36 = vsub.f32 1.0, %v1048_v35 }
 0xa1b   :  { %v1050_v16 = vmul.f32 %v3328_v27, %v1049_v36 }
 0xa1d   :  { %v1051_v37 = vadd.f32 %v3328_v27, %v1050_v16 }
 0xa1f   :  { %v1055_v43 = vsel %vm1054_vm10, %v3328_v27, %v1051_v37 }
 0xa20   :  { %v1060_v45 = vsel %vm1057_vm11, %v1059_v44, %v1055_v43 }
 0xa21   :  { %v1063_v47 = vmul.f32 %v1060_v45, %v4098_v19 }
 0xa5c   :  { %v1147_v24 = vpop.permute.xlu2 %1146 }
 0xa5d   :  { %v1149_v34 = vmul.f32 %v1147_v24, %v1141_v6 }
 0xa5f   :  { %1151 = vrot.lane.b32.xlu0 %v1149_v34, %s3828_s26 }
 0xa71   :  { %v1066_v28 = vpop.permute.xlu1 %1065 }
 0xa72   :  { %v1068_v46 = vmul.f32 %v1066_v28, %v1060_v45 }
 0xa74   :  { %1070 = vrot.lane.b32.xlu2 %v1068_v46, %s3828_s26 }
 0xace   :  { %v1071_v30 = vpop.permute.xlu2 %1070 }
 0xacf   :  { %v4133_v50 = vadd.f32 %v1071_v30, %v1063_v47 }
 0xad1   :  { %v1152_v51 = vpop.permute.xlu0 %1151  ;;  %3329 = vtanh.f32 %v4133_v50 }
 0xad2   :  { %v4135_v52 = vadd.f32 %v1152_v51, %v1144_v33 }
 0xad4   :  { %3331 = vtanh.f32 %v4135_v52 }
 0xad7   :  { %v3330_v53 = vpop.eup %3329 }
 0xad8   :  { %1076 = vrot.lane.b32.xlu2 %v3330_v53, %s3815_s29 }
 0xada   :  { %v3332_v57 = vpop.eup %3331 }
 0xadb   :  { %1157 = vrot.lane.b32.xlu0 %v3332_v57, %s3815_s29 }
 0xb32   :  { %v1077_v19 = vpop.permute.xlu2 %1076 }
 0xb33   :  { %v4141_v41 = vmul.f32 %v1077_v19, %v1060_v45 }
 0xb35   :  { %v1168_v59 = vpack.c.bf16 %v4141_v41, %v4141_v41 }
 0xb37   :  { %1174 = vrot.lane.b32.xlu0 %v1168_v59, %s3828_s26 }
 0xb4d   :  { %v1158_v29 = vpop.permute.xlu0 %1157 }
 0xb4e   :  { %v4146_v60 = vmul.f32 %v1158_v29, %v1141_v6 }
 0xb50   :  { %v1249_v61 = vpack.c.bf16 %v4146_v60, %v4146_v60 }
 0xb52   :  { %1255 = vrot.lane.b32.xlu1 %v1249_v61, %s3828_s26 }
 0xba9   :  { %v1175_v0 = vpop.permute.xlu0 %1174 }
 0xbaa   :  { %3022 = vmatmul.msk.bf16.vlgmr.msra.gmra.mxu2 %vm376_vm9, %v1175_v0 }
 0xbc4   :  { %v1256_v1 = vpop.permute.xlu1 %1255 }
 0xbc5   :  { %3032 = vmatmul.msk.bf16.vlgmr.msra.gmra.mxu3 %vm376_vm9, %v1256_v1 }
 0xc2d   :  { %v1200_v3 = vpop.f32.mrf.mxu2 }
 0xc2e   :  { %v1204_v4 = vadd.f32 %v1200_v3, %v295_v2  ;;  %v3211_v2 = vld [vmem:[#allocation13 + $0x8] sm:$0xff] }
 0xc2f   :  { %1440 = vmatpush.bf16.msra.mxu1 %v3211_v2  ;;  %v3208_v3 = vld [vmem:[#allocation8] sm:$0xff] }
 0xc30   :  { %3333 = vtanh.f32 %v1204_v4  ;;  %v3023_v15 = vmul.f32 -1.442695, %v1204_v4 }
 0xc35   :  { %v1202_v5 = vpop.f32.mrf.mxu2 }
 0xc36   :  { %v3334_v26 = vpop.eup %3333 }
 0xc37   :  { %1227 = vrot.lane.b32.xlu0 %v3334_v26, %s3815_s29 }
 0xc48   :  { %v1281_v8 = vpop.f32.mrf.mxu3 }
 0xc49   :  { %v1285_v9 = vadd.f32 %v1281_v8, %v4001_v21 }
 0xc4b   :  { %3335 = vtanh.f32 %v1285_v9  ;;  %v3033_v54 = vmul.f32 -1.442695, %v1285_v9 }
 0xc4c   :  { %3337 = vpow2.f32 %v3023_v15 }
 0xc50   :  { %v1283_v10 = vpop.f32.mrf.mxu3 }
 0xc51   :  { %v3336_v12 = vpop.eup %3335 }
 0xc52   :  { %1308 = vrot.lane.b32.xlu1 %v3336_v12, %s3815_s29  ;;  %v3338_v18 = vpop.eup %3337 }
 0xc53   :  { %v1208_v20 = vadd.f32 1.0, %v3338_v18  ;;  %v4182_v18 = vld [vmem:[#allocation10] ss:$0 sm:$0xff] }
 0xc55   :  { %3339 = vrcp.f32 %v1208_v20  ;;  %v1220_v21 = vand.u32 2147483648, %v1208_v20  ;;  %vm1214_vm13 = vweird.f32 %v1208_v20  ;;  %v1218_v36 = vand.u32 2147483647, %v1208_v20 }
 0xc56   :  { %3341 = vpow2.f32 %v3033_v54 }
 0xc57   :  { %v1221_v37 = vor.u32 1.1754944e-38, %v1220_v21  ;;  %vm1219_vm15 = vcmp.eq.f32.partialorder %v1218_v36, 8.507059e+37 }
 0xc5b   :  { %v3340_v14 = vpop.eup %3339 }
 0xc5c   :  { %v1210_v23 = vmul.f32 %v3340_v14, %v1208_v20  ;;  %v3342_v27 = vpop.eup %3341  ;;  %vm1215_vm12 = vweird.f32 %v3340_v14  ;;  %v298_v20 = vadd.f32 %v4182_v18, %v4121_v55 }
 0xc5d   :  { %v1289_v34 = vadd.f32 1.0, %v3342_v27  ;;  %vm1216_vm14 = vmor %vm1214_vm13, %vm1215_vm12 }
 0xc5e   :  { %v1211_v24 = vsub.f32 1.0, %v1210_v23 }
 0xc5f   :  { %3343 = vrcp.f32 %v1289_v34  ;;  %v1301_v30 = vand.u32 2147483648, %v1289_v34  ;;  %vm1295_vm1 = vweird.f32 %v1289_v34  ;;  %v1299_v33 = vand.u32 2147483647, %v1289_v34 }
 0xc60   :  { %v1212_v6 = vmul.f32 %v3340_v14, %v1211_v24 }
 0xc61   :  { %v1302_v53 = vor.u32 1.1754944e-38, %v1301_v30  ;;  %vm1300_vm3 = vcmp.eq.f32.partialorder %v1299_v33, 8.507059e+37 }
 0xc62   :  { %v1213_v35 = vadd.f32 %v3340_v14, %v1212_v6 }
 0xc64   :  { %v1217_v16 = vsel %vm1216_vm14, %v3340_v14, %v1213_v35  ;;  %v3510_v14 = vld [vmem:[#allocation14] ss:$0 sm:$0xff] }
 0xc65   :  { %v1222_v40 = vsel %vm1219_vm15, %v1221_v37, %v1217_v16  ;;  %v3344_v44 = vpop.eup %3343  ;;  %v334_v54 = vadd.f32 %v3510_v14, %v3999_v17 }
 0xc66   :  { %v1291_v28 = vmul.f32 %v3344_v44, %v1289_v34  ;;  %vm1296_vm0 = vweird.f32 %v3344_v44  ;;  %v1225_v31 = vmul.f32 %v1222_v40, %v4133_v50  ;;  %v3209_v50 = vld [vmem:[#allocation8 + $0x8] sm:$0xff] }
 0xc67   :  { %vm1297_vm2 = vmor %vm1295_vm1, %vm1296_vm0  ;;  %1359 = vmatpush.bf16.msra.mxu0 %v3209_v50 }
 0xc68   :  { %v1292_v45 = vsub.f32 1.0, %v1291_v28 }
 0xc6a   :  { %v1293_v46 = vmul.f32 %v3344_v44, %v1292_v45 }
 0xc6b   :  { %1360 = vmatpush.bf16.msra.mxu0 %v3208_v3 }
 0xc6c   :  { %v1294_v47 = vadd.f32 %v3344_v44, %v1293_v46 }
 0xc6e   :  { %v1298_v51 = vsel %vm1297_vm2, %v3344_v44, %v1294_v47 }
 0xc6f   :  { %v1303_v58 = vsel %vm1300_vm3, %v1302_v53, %v1298_v51 }
 0xc70   :  { %v1306_v59 = vmul.f32 %v1303_v58, %v4135_v52  ;;  %v3210_v52 = vld [vmem:[#allocation13] sm:$0xff] }
 0xc71   :  { %1441 = vmatpush.bf16.msra.mxu1 %v3210_v52 }
 0xca9   :  { %v1228_v38 = vpop.permute.xlu0 %1227 }
 0xcaa   :  { %v1230_v43 = vmul.f32 %v1228_v38, %v1222_v40 }
 0xcac   :  { %1232 = vrot.lane.b32.xlu1 %v1230_v43, %s3828_s26 }
 0xcc4   :  { %v1309_v57 = vpop.permute.xlu1 %1308 }
 0xcc5   :  { %v1311_v19 = vmul.f32 %v1309_v57, %v1303_v58 }
 0xcc7   :  { %1313 = vrot.lane.b32.xlu2 %v1311_v19, %s3828_s26 }
 0xd1e   :  { %v1233_v29 = vpop.permute.xlu1 %1232 }
 0xd1f   :  { %v4162_v62 = vadd.f32 %v1233_v29, %v1225_v31 }
 0xd21   :  { %v1314_v61 = vpop.permute.xlu2 %1313  ;;  %3345 = vtanh.f32 %v4162_v62 }
 0xd22   :  { %v4164_v63 = vadd.f32 %v1314_v61, %v1306_v59 }
 0xd24   :  { %3347 = vtanh.f32 %v4164_v63 }
 0xd27   :  { %v3346_v0 = vpop.eup %3345 }
 0xd28   :  { %1238 = vrot.lane.b32.xlu1 %v3346_v0, %s3815_s29 }
 0xd2a   :  { %v3348_v1 = vpop.eup %3347 }
 0xd2b   :  { %1319 = vrot.lane.b32.xlu2 %v3348_v1, %s3815_s29 }
 0xd85   :  { %v1320_v4 = vpop.permute.xlu2 %1319 }
 0xd86   :  { %v4170_v5 = vmul.f32 %v1320_v4, %v1303_v58 }
 0xd88   :  { %v1411_v26 = vpack.c.bf16 %v4170_v5, %v4170_v5 }
 0xd8a   :  { %1417 = vrot.lane.b32.xlu0 %v1411_v26, %s3828_s26 }
 0xd9a   :  { %v1239_v8 = vpop.permute.xlu1 %1238 }
 0xd9b   :  { %v4175_v9 = vmul.f32 %v1239_v8, %v1222_v40 }
 0xd9d   :  { %v1330_v10 = vpack.c.bf16 %v4175_v9, %v4175_v9 }
 0xd9f   :  { %1336 = vrot.lane.b32.xlu2 %v1330_v10, %s3828_s26 }
 0xdf9   :  { %v1337_v12 = vpop.permute.xlu2 %1336 }
 0xdfa   :  { %3042 = vmatmul.msk.bf16.vlgmr.msra.gmra.mxu0 %vm376_vm9, %v1337_v12 }
 0xdfc   :  { %v1418_v15 = vpop.permute.xlu0 %1417 }
 0xdfd   :  { %3052 = vmatmul.msk.bf16.vlgmr.msra.gmra.mxu1 %vm376_vm9, %v1418_v15 }
 0xe77   :  { %v1362_v23 = vpop.f32.mrf.mxu0 }
 0xe78   :  { %v1366_v24 = vadd.f32 %v1362_v23, %v298_v20  ;;  %v3215_v23 = vld [vmem:[#allocation13 + $0x8] sm:$0xff] }
 0xe79   :  { %1601 = vmatpush.bf16.msrb.mxu3 %v3215_v23 }
 0xe7a   :  { %v1443_v6 = vpop.f32.mrf.mxu1  ;;  %3349 = vtanh.f32 %v1366_v24  ;;  %v3043_v16 = vmul.f32 -1.442695, %v1366_v24 }
 0xe7b   :  { %v1447_v27 = vadd.f32 %v1443_v6, %v334_v54  ;;  %v3214_v6 = vld [vmem:[#allocation13] sm:$0xff] }
 0xe7d   :  { %3351 = vtanh.f32 %v1447_v27  ;;  %v3053_v38 = vmul.f32 -1.442695, %v1447_v27  ;;  %v3212_v27 = vld [vmem:[#allocation8] sm:$0xff]  ;;  %1602 = vmatpush.bf16.msrb.mxu3 %v3214_v6 }
 0xe7e   :  { %3353 = vpow2.f32 %v3043_v16 }
 0xe7f   :  { %v1364_v34 = vpop.f32.mrf.mxu0 }
 0xe80   :  { %v3350_v35 = vpop.eup %3349 }
 0xe81   :  { %1389 = vrot.lane.b32.xlu2 %v3350_v35, %s3815_s29 }
 0xe82   :  { %v1445_v21 = vpop.f32.mrf.mxu1 }
 0xe83   :  { %v3352_v36 = vpop.eup %3351 }
 0xe84   :  { %1470 = vrot.lane.b32.xlu0 %v3352_v36, %s3815_s29  ;;  %v3354_v55 = vpop.eup %3353 }
 0xe85   :  { %v1370_v37 = vadd.f32 1.0, %v3354_v55 }
 0xe87   :  { %3355 = vrcp.f32 %v1370_v37  ;;  %v1382_v47 = vand.u32 2147483648, %v1370_v37  ;;  %vm1376_vm5 = vweird.f32 %v1370_v37  ;;  %v1380_v30 = vand.u32 2147483647, %v1370_v37 }
 0xe88   :  { %3357 = vpow2.f32 %v3053_v38 }
 0xe89   :  { %v1383_v51 = vor.u32 1.1754944e-38, %v1382_v47  ;;  %vm1381_vm7 = vcmp.eq.f32.partialorder %v1380_v30, 8.507059e+37 }
 0xe8d   :  { %v3356_v17 = vpop.eup %3355 }
 0xe8e   :  { %v1372_v40 = vmul.f32 %v3356_v17, %v1370_v37  ;;  %v3358_v28 = vpop.eup %3357  ;;  %vm1377_vm4 = vweird.f32 %v3356_v17  ;;  %v300_v37 = vadd.f32 %v4182_v18, %v4123_v56 }
 0xe8f   :  { %v1451_v45 = vadd.f32 1.0, %v3358_v28  ;;  %vm1378_vm6 = vmor %vm1376_vm5, %vm1377_vm4  ;;  %vm510_vm5 = vcmask 523520  }
 0xe90   :  { %v1373_v43 = vsub.f32 1.0, %v1372_v40 }
 0xe91   :  { %3359 = vrcp.f32 %v1451_v45  ;;  %v1463_v0 = vand.u32 2147483648, %v1451_v45  ;;  %vm1457_vm10 = vweird.f32 %v1451_v45  ;;  %v1461_v1 = vand.u32 2147483647, %v1451_v45 }
 0xe92   :  { %v1374_v44 = vmul.f32 %v3356_v17, %v1373_v43 }
 0xe93   :  { %v1464_v50 = vor.u32 1.1754944e-38, %v1463_v0  ;;  %vm1462_vm12 = vcmp.eq.f32.partialorder %v1461_v1, 8.507059e+37 }
 0xe94   :  { %v1375_v46 = vadd.f32 %v3356_v17, %v1374_v44 }
 0xe96   :  { %v1379_v33 = vsel %vm1378_vm6, %v3356_v17, %v1375_v46  ;;  %vm1699_vm6 = vcmask 523264  }
 0xe97   :  { %v1384_v57 = vsel %vm1381_vm7, %v1383_v51, %v1379_v33  ;;  %v3360_v19 = vpop.eup %3359 }
 0xe98   :  { %v1453_v31 = vmul.f32 %v3360_v19, %v1451_v45  ;;  %vm1458_vm8 = vweird.f32 %v3360_v19  ;;  %v1387_v26 = vmul.f32 %v1384_v57, %v4162_v62  ;;  %v3213_v62 = vld [vmem:[#allocation8 + $0x8] sm:$0xff] }
 0xe99   :  { %vm1459_vm11 = vmor %vm1457_vm10, %vm1458_vm8  ;;  %1521 = vmatpush.bf16.msrb.mxu2 %v3213_v62 }
 0xe9a   :  { %v1454_v59 = vsub.f32 1.0, %v1453_v31 }
 0xe9c   :  { %v1455_v29 = vmul.f32 %v3360_v19, %v1454_v59 }
 0xe9d   :  { %1522 = vmatpush.bf16.msrb.mxu2 %v3212_v27 }
 0xe9e   :  { %v1456_v61 = vadd.f32 %v3360_v19, %v1455_v29 }
 0xea0   :  { %v1460_v2 = vsel %vm1459_vm11, %v3360_v19, %v1456_v61 }
 0xea1   :  { %v1465_v3 = vsel %vm1462_vm12, %v1464_v50, %v1460_v2 }
 0xea2   :  { %v1468_v15 = vmul.f32 %v1465_v3, %v4164_v63 }
 0xedb   :  { %v1390_v53 = vpop.permute.xlu2 %1389 }
 0xedc   :  { %v1392_v58 = vmul.f32 %v1390_v53, %v1384_v57 }
 0xede   :  { %1394 = vrot.lane.b32.xlu0 %v1392_v58, %s3828_s26 }
 0xef6   :  { %v1471_v52 = vpop.permute.xlu0 %1470 }
 0xef7   :  { %v1473_v4 = vmul.f32 %v1471_v52, %v1465_v3 }
 0xef9   :  { %1475 = vrot.lane.b32.xlu1 %v1473_v4, %s3828_s26 }
 0xf50   :  { %v1395_v8 = vpop.permute.xlu0 %1394 }
 0xf51   :  { %v4192_v10 = vadd.f32 %v1395_v8, %v1387_v26 }
 0xf53   :  { %3361 = vtanh.f32 %v4192_v10 }
 0xf59   :  { %v3362_v12 = vpop.eup %3361 }
 0xf5a   :  { %1400 = vrot.lane.b32.xlu0 %v3362_v12, %s3815_s29 }
 0xf6b   :  { %v1476_v20 = vpop.permute.xlu1 %1475 }
 0xf6c   :  { %v4197_v14 = vadd.f32 %v1476_v20, %v1468_v15 }
 0xf6e   :  { %3363 = vtanh.f32 %v4197_v14 }
 0xf74   :  { %v3364_v54 = vpop.eup %3363 }
 0xf75   :  { %1481 = vrot.lane.b32.xlu1 %v3364_v54, %s3815_s29 }
 0xfcc   :  { %v1401_v24 = vpop.permute.xlu0 %1400 }
 0xfcd   :  { %v4201_v34 = vmul.f32 %v1401_v24, %v1384_v57 }
 0xfcf   :  { %v1492_v63 = vpack.c.bf16 %v4201_v34, %v4201_v34 }
 0xfd1   :  { %1498 = vrot.lane.b32.xlu1 %v1492_v63, %s3828_s26 }
 0xfe7   :  { %v1482_v35 = vpop.permute.xlu1 %1481 }
 0xfe8   :  { %v4206_v21 = vmul.f32 %v1482_v35, %v1465_v3 }
 0xfea   :  { %v1572_v36 = vpack.c.bf16 %v4206_v21, %v4206_v21 }
 0xfec   :  { %1578 = vrot.lane.b32.xlu2 %v1572_v36, %s3828_s26 }
0x1043   :  { %v1499_v16 = vpop.permute.xlu1 %1498 }
0x1044   :  { %3062 = vmatmul.msk.bf16.vlgmr.msrb.gmra.mxu2 %vm376_vm9, %v1499_v16 }
0x1046   :  { %v1579_v55 = vpop.permute.xlu2 %1578 }
0x1047   :  { %3072 = vmatmul.msk.bf16.vlgmr.msrb.gmra.mxu3 %vm376_vm9, %v1579_v55 }
0x10c7   :  { %v1524_v17 = vpop.f32.mrf.mxu2 }
0x10c8   :  { %v1528_v38 = vadd.f32 %v1524_v17, %v300_v37  ;;  %v3223_v17 = vld [vmem:[#allocation19 + $0x18] sm:$0xff] }
0x10c9   :  { %1789 = vmatpush.bf16.msrb.mxu1 %v3223_v17 }
0x10ca   :  { %v1604_v40 = vpop.f32.mrf.mxu3  ;;  %3365 = vtanh.f32 %v1528_v38 }
0x10cb   :  { %v1608_v43 = vadd.f32 %v1604_v40, %v3994_v13  ;;  %v3063_v13 = vmul.f32 -1.442695, %v1528_v38  ;;  %v4265_v38 = vld [vmem:[#allocation16 + $0x8] sm:$0xff] }
0x10cc   :  { %1845 = vmatpush.bf16.msra.mxu2 %v4265_v38 }
0x10cd   :  { %3367 = vtanh.f32 %v1608_v43  ;;  %v3073_v47 = vmul.f32 -1.442695, %v1608_v43  ;;  %v3221_v43 = vld [vmem:[#allocation19 + $0x8] sm:$0xff] }
0x10cf   :  { %v1526_v44 = vpop.f32.mrf.mxu2  ;;  %3369 = vpow2.f32 %v3073_v47 }
0x10d0   :  { %v3366_v28 = vpop.eup %3365  ;;  %v3217_v44 = vld [vmem:[%s4541_s7 + $0x8] sm:$0xff] }
0x10d1   :  { %1551 = vrot.lane.b32.xlu1 %v3366_v28, %s3815_s29  ;;  %v4276_v28 = vld [vmem:[#allocation16] sm:$0xff] }
0x10d2   :  { %v1606_v45 = vpop.f32.mrf.mxu3  ;;  %1846 = vmatpush.bf16.msra.mxu2 %v4276_v28 }
0x10d3   :  { %v3368_v46 = vpop.eup %3367  ;;  %v3220_v45 = vld [vmem:[#allocation19] sm:$0xff] }
0x10d4   :  { %1631 = vrot.lane.b32.xlu2 %v3368_v46, %s3815_s29  ;;  %v3216_v46 = vld [vmem:[%s4541_s7] sm:$0xff] }
0x10d5   :  { %v3370_v56 = vpop.eup %3369  ;;  %1847 = vmatmul.bf16.vlgmr.msra.gmra.mxu2 %v3827_v7 }
0x10d6   :  { %v1612_v18 = vadd.f32 1.0, %v3370_v56  ;;  %1972 = vmatpush.bf16.msrb.mxu2 %v4265_v38 }
0x10d8   :  { %3371 = vrcp.f32 %v1612_v18  ;;  %v1624_v31 = vand.u32 2147483648, %v1612_v18  ;;  %vm1618_vm14 = vweird.f32 %v1612_v18  ;;  %v1622_v59 = vand.u32 2147483647, %v1612_v18 }
0x10d9   :  { %432 = vrot.lane.b32.xlu1 %v4023_v22, %s3828_s26  ;;  %3373 = vpow2.f32 %v3063_v13 }
0x10da   :  { %v1625_v29 = vor.u32 1.1754944e-38, %v1624_v31  ;;  %vm1623_vm0 = vcmp.eq.f32.partialorder %v1622_v59, 8.507059e+37  ;;  %1973 = vmatpush.bf16.msrb.mxu2 %v4276_v28 }
0x10de   :  { %v3372_v30 = vpop.eup %3371  ;;  %2090 = vmatpush.bf16.msra.mxu2 %v4265_v38 }
0x10df   :  { %v1614_v33 = vmul.f32 %v3372_v30, %v1612_v18  ;;  %v3374_v53 = vpop.eup %3373  ;;  %vm1619_vm13 = vweird.f32 %v3372_v30 }
0x10e0   :  { %v1532_v58 = vadd.f32 1.0, %v3374_v53  ;;  %vm1620_vm15 = vmor %vm1618_vm14, %vm1619_vm13 }
0x10e1   :  { %v1615_v51 = vsub.f32 1.0, %v1614_v33  ;;  %v4297_v33 = vld [vmem:[%s4545_s11 + $0x8] sm:$0xff] }
0x10e2   :  { %3375 = vrcp.f32 %v1532_v58  ;;  %v1544_v26 = vand.u32 2147483648, %v1532_v58  ;;  %vm1538_vm2 = vweird.f32 %v1532_v58  ;;  %v1542_v8 = vand.u32 2147483647, %v1532_v58  ;;  %2091 = vmatpush.bf16.msra.mxu2 %v4276_v28  ;;  %1913 = vmatpush.bf16.msra.mxu3 %v4297_v33 }
0x10e3   :  { %v1616_v57 = vmul.f32 %v3372_v30, %v1615_v51  ;;  %v4304_v51 = vld [vmem:[%s4545_s11] sm:$0xff] }
0x10e4   :  { %v1545_v15 = vor.u32 1.1754944e-38, %v1544_v26  ;;  %vm1543_vm4 = vcmp.eq.f32.partialorder %v1542_v8, 8.507059e+37 }
0x10e5   :  { %v1617_v19 = vadd.f32 %v3372_v30, %v1616_v57 }
0x10e6   :  { %1914 = vmatpush.bf16.msra.mxu3 %v4304_v51 }
0x10e7   :  { %v1621_v22 = vsel %vm1620_vm15, %v3372_v30, %v1617_v19 }
0x10e8   :  { %v1626_v0 = vsel %vm1623_vm0, %v1625_v29, %v1621_v22  ;;  %v3376_v1 = vpop.eup %3375 }
0x10e9   :  { %v1534_v50 = vmul.f32 %v3376_v1, %v1532_v58  ;;  %vm1539_vm1 = vweird.f32 %v3376_v1  ;;  %v1629_v6 = vmul.f32 %v1626_v0, %v4197_v14  ;;  %1915 = vmatmul.bf16.vlgmr.msra.gmra.mxu3 %v3827_v7 }
0x10ea   :  { %vm1540_vm3 = vmor %vm1538_vm2, %vm1539_vm1  ;;  %2031 = vmatpush.bf16.msrb.mxu3 %v4297_v33 }
0x10eb   :  { %v1535_v52 = vsub.f32 1.0, %v1534_v50 }
0x10ed   :  { %v1536_v3 = vmul.f32 %v3376_v1, %v1535_v52  ;;  %v4326_v52 = vld [vmem:[#allocation17] ss:$0 sm:$0xff] }
0x10ee   :  { %2032 = vmatpush.bf16.msrb.mxu3 %v4304_v51 }
0x10ef   :  { %v1537_v4 = vadd.f32 %v3376_v1, %v1536_v3  ;;  %v3251_v3 = vld [vmem:[%s4546_s12] ss:$0 sm:$0xff] }
0x10f1   :  { %v1541_v12 = vsel %vm1540_vm3, %v3376_v1, %v1537_v4 }
0x10f2   :  { %v1546_v54 = vsel %vm1543_vm4, %v1545_v15, %v1541_v12  ;;  %2149 = vmatpush.bf16.msra.mxu3 %v4297_v33 }
0x10f3   :  { %v1549_v24 = vmul.f32 %v1546_v54, %v4192_v10 }
0x10f6   :  { %2150 = vmatpush.bf16.msra.mxu3 %v4304_v51 }
0x112e   :  { %v1632_v61 = vpop.permute.xlu2 %1631 }
0x112f   :  { %v1634_v2 = vmul.f32 %v1632_v61, %v1626_v0 }
0x1131   :  { %1636 = vrot.lane.b32.xlu0 %v1634_v2, %s3828_s26 }
0x1143   :  { %v1552_v20 = vpop.permute.xlu1 %1551 }
0x1144   :  { %v1554_v23 = vmul.f32 %v1552_v20, %v1546_v54 }
0x1146   :  { %1556 = vrot.lane.b32.xlu2 %v1554_v23, %s3828_s26 }
0x114b   :  { %v433_v62 = vpop.permute.xlu1 %432 }
0x114c   :  { %435 = vst.msk [vmem:[#allocation2] sm:$0xff] %vm376_vm9, %v433_v62 }
0x114e   :  { %589 = vrot.lane.b32.xlu2 %v4051_v11, %s3828_s26 }
0x1158   :  { %v1848_v2 = vpop.f32.mrf.mxu2 }
0x1160   :  { %v1850_v50 = vpop.f32.mrf.mxu2 }
0x11a0   :  { %v1557_v27 = vpop.permute.xlu2 %1556 }
0x11a1   :  { %v1559_v35 = vadd.f32 %v1557_v27, %v1549_v24 }
0x11a3   :  { %v1637_v63 = vpop.permute.xlu0 %1636  ;;  %3377 = vtanh.f32 %v1559_v35 }
0x11a4   :  { %v1639_v36 = vadd.f32 %v1637_v63, %v1629_v6  ;;  %v1916_v63 = vpop.f32.mrf.mxu3 }
0x11a6   :  { %3379 = vtanh.f32 %v1639_v36 }
0x11a8   :  { %v590_v16 = vpop.permute.xlu2 %589 }
0x11a9   :  { %v3378_v55 = vpop.eup %3377  ;;  %593 = vst.msk [vmem:[#allocation2 + $0x8] sm:$0xff] %vm376_vm9, %v590_v16 }
0x11aa   :  { %1562 = vrot.lane.b32.xlu2 %v3378_v55, %s3815_s29 }
0x11ac   :  { %v3380_v37 = vpop.eup %3379  ;;  %v1918_v55 = vpop.f32.mrf.mxu3 }
0x11ad   :  { %1642 = vrot.lane.b32.xlu0 %v3380_v37, %s3815_s29 }
0x11b2   :  { %1162 = vrot.lane.b32.xlu2 %v4146_v60, %s3815_s29 }
0x11b5   :  { %1486 = vrot.lane.b32.xlu0 %v4206_v21, %s3815_s29 }
0x11ba   :  { %999 = vrot.lane.b32.xlu2 %v4112_v49, %s3815_s29 }
0x11bd   :  { %753 = vrot.lane.b32.xlu0 %v4084_v42, %s3828_s26 }
0x11c2   :  { %506 = vrot.lane.b32.xlu2 %v4028_v25, %s3815_s29 }
0x11c5   :  { %1324 = vrot.lane.b32.xlu0 %v4170_v5, %s3815_s29 }
0x11cd   :  { %1081 = vrot.lane.b32.xlu0 %v4141_v41, %s3828_s26 }
0x11d5   :  { %671 = vrot.lane.b32.xlu0 %v4056_v32, %s3815_s29 }
0x1204   :  { %v1563_v11 = vpop.permute.xlu2 %1562 }
0x1205   :  { %v1565_v60 = vmul.f32 %v1563_v11, %v1546_v54 }
0x1207   :  { %1567 = vrot.lane.b32.xlu2 %v1565_v60, %s3828_s26 }
0x120c   :  { %v1163_v49 = vpop.permute.xlu2 %1162 }
0x1214   :  { %v1000_v10 = vpop.permute.xlu2 %999 }
0x1215   :  { %1003 = vst.msk [vmem:[#allocation2 + $0x20] sm:$0xff] %vm510_vm5, %v1000_v10 }
0x121c   :  { %v507_v42 = vpop.permute.xlu2 %506 }
0x121d   :  { %511 = vst.msk [vmem:[#allocation2 + $0x38] sm:$0xff] %vm510_vm5, %v507_v42 }
0x121f   :  { %v1643_v25 = vpop.permute.xlu0 %1642 }
0x1220   :  { %v1645_v5 = vmul.f32 %v1643_v25, %v1626_v0 }
0x1222   :  { %1647 = vrot.lane.b32.xlu1 %v1645_v5, %s3815_s29 }
0x1227   :  { %v1487_v41 = vpop.permute.xlu0 %1486 }
0x1228   :  { %1489 = vst.msk [vmem:[#allocation2 + $0x8] sm:$0xff] %vm510_vm5, %v1487_v41 }
0x122a   :  { %917 = vrot.lane.b32.xlu1 %v4107_v48, %s3828_s26  ;;  %v3219_v48 = vld [vmem:[%s4541_s7 + $0x18] sm:$0xff] }
0x122b   :  { %1716 = vmatpush.bf16.msrb.mxu0 %v3219_v48 }
0x122f   :  { %v754_v32 = vpop.permute.xlu0 %753  ;;  %v1652_v30 = vld [vmem:[#allocation2 + $0x8] sm:$0xff] }
0x1230   :  { %757 = vst.msk [vmem:[#allocation2 + $0x10] sm:$0xff] %vm376_vm9, %v754_v32 }
0x1232   :  { %835 = vrot.lane.b32.xlu1 %v4079_v39, %s3815_s29  ;;  %v3222_v39 = vld [vmem:[#allocation19 + $0x10] sm:$0xff] }
0x1233   :  { %1790 = vmatpush.bf16.msrb.mxu1 %v3222_v39 }
0x1237   :  { %v1325_v14 = vpop.permute.xlu0 %1324  ;;  %1791 = vmatpush.bf16.msrb.mxu1 %v3221_v43 }
0x1238   :  { %1327 = vst.msk [vmem:[#allocation2 + $0x10] sm:$0xff] %vm510_vm5, %v1325_v14 }
0x123a   :  { %1243 = vrot.lane.b32.xlu1 %v4175_v9, %s3828_s26  ;;  %v3218_v9 = vld [vmem:[%s4541_s7 + $0x10] sm:$0xff] }
0x123b   :  { %1717 = vmatpush.bf16.msrb.mxu0 %v3218_v9  ;;  %1792 = vmatpush.bf16.msrb.mxu1 %v3220_v45 }
0x123f   :  { %v1082_v21 = vpop.permute.xlu0 %1081  ;;  %1718 = vmatpush.bf16.msrb.mxu0 %v3217_v44  ;;  %2385 = vmatpush.bf16.msra.mxu1 %v4297_v33  ;;  %v1653_v19 = vld [vmem:[#allocation2 + $0x10] sm:$0xff] }
0x1240   :  { %1084 = vst.msk [vmem:[#allocation2 + $0x20] sm:$0xff] %vm376_vm9, %v1082_v21 }
0x1242   :  { %1405 = vrot.lane.b32.xlu1 %v4201_v34, %s3828_s26 }
0x1243   :  { %1719 = vmatpush.bf16.msrb.mxu0 %v3216_v46  ;;  %2386 = vmatpush.bf16.msra.mxu1 %v4304_v51 }
0x1247   :  { %v672_v40 = vpop.permute.xlu0 %671  ;;  %2326 = vmatpush.bf16.msra.mxu0 %v4265_v38  ;;  %v1655_v22 = vld [vmem:[#allocation2 + $0x20] sm:$0xff] }
0x1248   :  { %675 = vst.msk [vmem:[#allocation2 + $0x30] sm:$0xff] %vm510_vm5, %v672_v40 }
0x124b   :  { %2327 = vmatpush.bf16.msra.mxu0 %v4276_v28 }
0x1261   :  { %v1568_v34 = vpop.permute.xlu2 %1567 }
0x1262   :  { %1570 = vst.msk [vmem:[#allocation2 + $0x38] sm:$0xff] %vm376_vm9, %v1568_v34 }
0x1269   :  { %v1658_v0 = vld [vmem:[#allocation2 + $0x38] sm:$0xff] }
0x1294   :  { %v1648_v47 = vpop.permute.xlu1 %1647 }
0x1295   :  { %1650 = vst.msk [vmem:[#allocation2] sm:$0xff] %vm510_vm5, %v1648_v47 }
0x129c   :  { %v918_v56 = vpop.permute.xlu1 %917  ;;  %v1651_v18 = vld [vmem:[#allocation2] sm:$0xff] }
0x129d   :  { %921 = vst.msk [vmem:[#allocation2 + $0x18] sm:$0xff] %vm376_vm9, %v918_v56  ;;  %v1659_v13 = vpack.c.bf16 %v1652_v30, %v1651_v18 }
0x129e   :  { %1165 = vst.msk [vmem:[#allocation2 + $0x18] sm:$0xff] %vm510_vm5, %v1163_v49 }
0x129f   :  { %3090 = vmatmul.msk.bf16.vlgmr.msrb.gmra.mxu0 %vm1699_vm6, %v1659_v13  ;;  %3110 = vmatmul.msk.bf16.vlgmr.msrb.gmra.mxu1 %vm1699_vm6, %v1659_v13 }
0x12a0   :  { %2562 = vmatpush.bf16.msrb.mxu0 %v4265_v38  ;;  %2621 = vmatpush.bf16.msrb.mxu1 %v4297_v33 }
0x12a4   :  { %v836_v53 = vpop.permute.xlu1 %835  ;;  %2563 = vmatpush.bf16.msrb.mxu0 %v4276_v28  ;;  %2622 = vmatpush.bf16.msrb.mxu1 %v4304_v51 }
0x12a5   :  { %839 = vst.msk [vmem:[#allocation2 + $0x28] sm:$0xff] %vm510_vm5, %v836_v53  ;;  %v1654_v57 = vld [vmem:[#allocation2 + $0x18] sm:$0xff] }
0x12a6   :  { %v1660_v31 = vpack.c.bf16 %v1654_v57, %v1653_v19 }
0x12ac   :  { %v1244_v58 = vpop.permute.xlu1 %1243 }
0x12ad   :  { %1246 = vst.msk [vmem:[#allocation2 + $0x28] sm:$0xff] %vm376_vm9, %v1244_v58 }
0x12af   :  { %3091 = vmatmul.msk.bf16.gmra.mxu0 %vm1699_vm6, %v1660_v31  ;;  %3111 = vmatmul.msk.bf16.gmra.mxu1 %vm1699_vm6, %v1660_v31 }
0x12b4   :  { %v1406_v59 = vpop.permute.xlu1 %1405  ;;  %v1656_v7 = vld [vmem:[#allocation2 + $0x28] sm:$0xff] }
0x12b5   :  { %1408 = vst.msk [vmem:[#allocation2 + $0x30] sm:$0xff] %vm376_vm9, %v1406_v59  ;;  %v1661_v29 = vpack.c.bf16 %v1656_v7, %v1655_v22 }
0x12bc   :  { %v1657_v61 = vld [vmem:[#allocation2 + $0x30] sm:$0xff] }
0x12bd   :  { %v1662_v1 = vpack.c.bf16 %v1658_v0, %v1657_v61 }
0x12bf   :  { %3092 = vmatmul.msk.bf16.gmra.mxu0 %vm1699_vm6, %v1661_v29  ;;  %3112 = vmatmul.msk.bf16.gmra.mxu1 %vm1699_vm6, %v1661_v29 }
0x12cf   :  { %3093 = vmatmul.msk.bf16.gmra.mxu0 %vm1699_vm6, %v1662_v1  ;;  %3113 = vmatmul.msk.bf16.gmra.mxu1 %vm1699_vm6, %v1662_v1 }
0x131c   :  { %v1721_v4 = vpop.f32.mrf.mxu0  ;;  %v1794_v26 = vpop.f32.mrf.mxu1 }
0x131d   :  { %v1722_v8 = vadd.f32 %v4326_v52, %v1721_v4  ;;  %v4332_v12 = vadd.f32 %v3251_v3, %v1794_v26 }
0x131f   :  { %v1852_v15 = vadd.f32 %v1848_v2, %v1722_v8 }
0x1321   :  { %3381 = vtanh.f32 %v1852_v15  ;;  %v3122_v9 = vmul.f32 -1.442695, %v1852_v15 }
0x1324   :  { %v4334_v20 = vpop.f32.mrf.mxu0  ;;  %v1796_v54 = vpop.f32.mrf.mxu1 }
0x1325   :  { %v4336_v23 = vadd.f32 %v3251_v3, %v1796_v54 }
0x1327   :  { %v3382_v62 = vpop.eup %3381 }
0x1328   :  { %1875 = vrot.lane.b32.xlu0 %v3382_v62, %s3815_s29 }
0x132c   :  { %v4339_v24 = vpop.f32.mrf.mxu0  ;;  %v1799_v6 = vpop.f32.mrf.mxu1 }
0x132d   :  { %v4341_v27 = vadd.f32 %v3251_v3, %v1799_v6 }
0x1334   :  { %v4343_v35 = vpop.f32.mrf.mxu0  ;;  %v1801_v36 = vpop.f32.mrf.mxu1 }
0x1335   :  { %v4345_v16 = vadd.f32 %v3251_v3, %v1801_v36 }
0x133c   :  { %v4347_v37 = vpop.f32.mrf.mxu0  ;;  %v1804_v11 = vpop.f32.mrf.mxu1 }
0x133d   :  { %v4349_v60 = vadd.f32 %v3251_v3, %v1804_v11 }
0x1344   :  { %v1733_v49 = vpop.f32.mrf.mxu0  ;;  %v1806_v10 = vpop.f32.mrf.mxu1 }
0x1345   :  { %v4352_v42 = vadd.f32 %v4326_v52, %v1733_v49  ;;  %v4354_v25 = vadd.f32 %v3251_v3, %v1806_v10 }
0x134c   :  { %v1736_v5 = vpop.f32.mrf.mxu0  ;;  %v1809_v41 = vpop.f32.mrf.mxu1 }
0x134d   :  { %v4357_v32 = vadd.f32 %v4326_v52, %v1736_v5  ;;  %v4359_v14 = vadd.f32 %v3251_v3, %v1809_v41 }
0x1354   :  { %v1811_v21 = vpop.f32.mrf.mxu1 }
0x1355   :  { %v1812_v17 = vadd.f32 %v3251_v3, %v1811_v21 }
0x1357   :  { %v1920_v48 = vadd.f32 %v1916_v63, %v1812_v17 }
0x1359   :  { %3383 = vtanh.f32 %v1920_v48  ;;  %v3131_v19 = vmul.f32 -1.442695, %v1920_v48 }
0x135a   :  { %3385 = vpow2.f32 %v3122_v9  ;;  %v1724_v9 = vadd.f32 %v4326_v52, %v4334_v20 }
0x135f   :  { %v3384_v39 = vpop.eup %3383 }
0x1360   :  { %1943 = vrot.lane.b32.xlu1 %v3384_v39, %s3815_s29  ;;  %v3386_v40 = vpop.eup %3385 }
0x1361   :  { %v1856_v34 = vadd.f32 1.0, %v3386_v40 }
0x1363   :  { %3387 = vrcp.f32 %v1856_v34  ;;  %v1868_v56 = vand.u32 2147483648, %v1856_v34  ;;  %vm1862_vm8 = vweird.f32 %v1856_v34  ;;  %v1866_v18 = vand.u32 2147483647, %v1856_v34 }
0x1364   :  { %3389 = vpow2.f32 %v3131_v19 }
0x1365   :  { %v1869_v13 = vor.u32 1.1754944e-38, %v1868_v56  ;;  %vm1867_vm11 = vcmp.eq.f32.partialorder %v1866_v18, 8.507059e+37 }
0x1369   :  { %v3388_v43 = vpop.eup %3387 }
0x136a   :  { %v1858_v44 = vmul.f32 %v3388_v43, %v1856_v34  ;;  %vm1863_vm7 = vweird.f32 %v3388_v43  ;;  %v3390_v31 = vpop.eup %3389 }
0x136b   :  { %vm1864_vm10 = vmor %vm1862_vm8, %vm1863_vm7  ;;  %v1924_v59 = vadd.f32 1.0, %v3390_v31 }
0x136c   :  { %v1859_v45 = vsub.f32 1.0, %v1858_v44 }
0x136d   :  { %3391 = vrcp.f32 %v1924_v59  ;;  %v1936_v1 = vand.u32 2147483648, %v1924_v59  ;;  %vm1930_vm13 = vweird.f32 %v1924_v59  ;;  %v1934_v2 = vand.u32 2147483647, %v1924_v59 }
0x136e   :  { %v1860_v46 = vmul.f32 %v3388_v43, %v1859_v45 }
0x136f   :  { %v1937_v3 = vor.u32 1.1754944e-38, %v1936_v1  ;;  %vm1935_vm15 = vcmp.eq.f32.partialorder %v1934_v2, 8.507059e+37 }
0x1370   :  { %v1861_v47 = vadd.f32 %v3388_v43, %v1860_v46 }
0x1372   :  { %v1865_v30 = vsel %vm1864_vm10, %v3388_v43, %v1861_v47 }
0x1373   :  { %v1870_v57 = vsel %vm1867_vm11, %v1869_v13, %v1865_v30  ;;  %v3392_v7 = vpop.eup %3391 }
0x1374   :  { %v1926_v22 = vmul.f32 %v3392_v7, %v1924_v59  ;;  %vm1931_vm12 = vweird.f32 %v3392_v7  ;;  %v1873_v15 = vmul.f32 0.0, %v1870_v57 }
0x1375   :  { %vm1932_vm14 = vmor %vm1930_vm13, %vm1931_vm12 }
0x1376   :  { %v1927_v29 = vsub.f32 1.0, %v1926_v22 }
0x1378   :  { %v1928_v61 = vmul.f32 %v3392_v7, %v1927_v29 }
0x137a   :  { %v1929_v0 = vadd.f32 %v3392_v7, %v1928_v61 }
0x137c   :  { %v1933_v50 = vsel %vm1932_vm14, %v3392_v7, %v1929_v0 }
0x137d   :  { %v1938_v26 = vsel %vm1935_vm15, %v1937_v3, %v1933_v50 }
0x137e   :  { %v1941_v63 = vmul.f32 0.0, %v1938_v26 }
0x139a   :  { %v1876_v53 = vpop.permute.xlu0 %1875 }
0x139b   :  { %v1878_v58 = vmul.f32 %v1876_v53, %v1870_v57 }
0x139d   :  { %1880 = vrot.lane.b32.xlu2 %v1878_v58, %s3828_s26 }
0x13d2   :  { %v1944_v4 = vpop.permute.xlu1 %1943 }
0x13d3   :  { %v1946_v8 = vmul.f32 %v1944_v4, %v1938_v26 }
0x13d5   :  { %1948 = vrot.lane.b32.xlu0 %v1946_v8, %s3828_s26 }
0x13f7   :  { %v1881_v54 = vpop.permute.xlu2 %1880 }
0x13f8   :  { %v4364_v62 = vadd.f32 %v1881_v54, %v1873_v15 }
0x13fa   :  { %3393 = vtanh.f32 %v4364_v62 }
0x1400   :  { %v3394_v6 = vpop.eup %3393 }
0x1401   :  { %1886 = vrot.lane.b32.xlu1 %v3394_v6, %s3815_s29 }
0x1447   :  { %v1949_v36 = vpop.permute.xlu0 %1948 }
0x1448   :  { %v4368_v55 = vadd.f32 %v1949_v36, %v1941_v63 }
0x144a   :  { %3395 = vtanh.f32 %v4368_v55 }
0x1450   :  { %v3396_v11 = vpop.eup %3395 }
0x1451   :  { %1954 = vrot.lane.b32.xlu2 %v3396_v11, %s3815_s29 }
0x1473   :  { %v1887_v49 = vpop.permute.xlu1 %1886 }
0x1474   :  { %v1889_v10 = vmul.f32 %v1887_v49, %v1870_v57 }
0x1476   :  { %v1959_v5 = vpack.c.bf16 %v1889_v10, %v1889_v10 }
0x1478   :  { %1961 = vrot.lane.b32.xlu0 %v1959_v5, %s3828_s26 }
0x14ab   :  { %v1955_v41 = vpop.permute.xlu2 %1954 }
0x14ac   :  { %v1957_v21 = vmul.f32 %v1955_v41, %v1938_v26 }
0x14ae   :  { %v2018_v17 = vpack.c.bf16 %v1957_v21, %v1957_v21 }
0x14b0   :  { %2020 = vrot.lane.b32.xlu1 %v2018_v17, %s3828_s26 }
0x14ea   :  { %v1962_v48 = vpop.permute.xlu0 %1961 }
0x14eb   :  { %3132 = vmatmul.msk.bf16.vlgmr.msrb.gmra.mxu2 %vm376_vm9, %v1962_v48 }
0x14ec   :  { %2208 = vmatpush.bf16.msrb.mxu2 %v4265_v38 }
0x14f0   :  { %2209 = vmatpush.bf16.msrb.mxu2 %v4276_v28 }
0x1522   :  { %v2021_v39 = vpop.permute.xlu1 %2020 }
0x1523   :  { %3134 = vmatmul.msk.bf16.vlgmr.msrb.gmra.mxu3 %vm376_vm9, %v2021_v39 }
0x1524   :  { %2267 = vmatpush.bf16.msrb.mxu3 %v4297_v33 }
0x1528   :  { %2268 = vmatpush.bf16.msrb.mxu3 %v4304_v51 }
0x156e   :  { %v1975_v40 = vpop.f32.mrf.mxu2 }
0x156f   :  { %v1979_v34 = vadd.f32 %v1975_v40, %v1724_v9 }
0x1571   :  { %3397 = vtanh.f32 %v1979_v34  ;;  %v3133_v45 = vmul.f32 -1.442695, %v1979_v34 }
0x1573   :  { %3399 = vpow2.f32 %v3133_v45 }
0x1576   :  { %v1977_v43 = vpop.f32.mrf.mxu2 }
0x1577   :  { %v3398_v44 = vpop.eup %3397 }
0x1578   :  { %2002 = vrot.lane.b32.xlu2 %v3398_v44, %s3815_s29 }
0x1579   :  { %v3400_v56 = vpop.eup %3399 }
0x157a   :  { %v1983_v13 = vadd.f32 1.0, %v3400_v56 }
0x157c   :  { %v1995_v31 = vand.u32 2147483648, %v1983_v13  ;;  %vm1989_vm1 = vweird.f32 %v1983_v13  ;;  %v1993_v59 = vand.u32 2147483647, %v1983_v13 }
0x157e   :  { %v1996_v7 = vor.u32 1.1754944e-38, %v1995_v31  ;;  %vm1994_vm3 = vcmp.eq.f32.partialorder %v1993_v59, 8.507059e+37 }
0x15a6   :  { %v2034_v46 = vpop.f32.mrf.mxu3 }
0x15a7   :  { %v2038_v47 = vadd.f32 %v2034_v46, %v4359_v14 }
0x15a9   :  { %3401 = vtanh.f32 %v2038_v47  ;;  %v3135_v0 = vmul.f32 -1.442695, %v2038_v47  ;;  %v1727_v47 = vadd.f32 %v4326_v52, %v4339_v24 }
0x15aa   :  { %3403 = vrcp.f32 %v1983_v13 }
0x15ab   :  { %3405 = vpow2.f32 %v3135_v0 }
0x15ae   :  { %v2036_v18 = vpop.f32.mrf.mxu3 }
0x15af   :  { %v3402_v30 = vpop.eup %3401 }
0x15b0   :  { %2061 = vrot.lane.b32.xlu0 %v3402_v30, %s3815_s29  ;;  %v3404_v20 = vpop.eup %3403 }
0x15b1   :  { %v1985_v53 = vmul.f32 %v3404_v20, %v1983_v13  ;;  %vm1990_vm0 = vweird.f32 %v3404_v20  ;;  %v3406_v1 = vpop.eup %3405 }
0x15b2   :  { %vm1991_vm2 = vmor %vm1989_vm1, %vm1990_vm0  ;;  %v2042_v2 = vadd.f32 1.0, %v3406_v1 }
0x15b3   :  { %v1986_v57 = vsub.f32 1.0, %v1985_v53 }
0x15b4   :  { %3407 = vrcp.f32 %v2042_v2  ;;  %v2054_v15 = vand.u32 2147483648, %v2042_v2  ;;  %vm2048_vm5 = vweird.f32 %v2042_v2  ;;  %v2052_v54 = vand.u32 2147483647, %v2042_v2 }
0x15b5   :  { %v1987_v58 = vmul.f32 %v3404_v20, %v1986_v57 }
0x15b6   :  { %v2055_v63 = vor.u32 1.1754944e-38, %v2054_v15  ;;  %vm2053_vm7 = vcmp.eq.f32.partialorder %v2052_v54, 8.507059e+37 }
0x15b7   :  { %v1988_v19 = vadd.f32 %v3404_v20, %v1987_v58 }
0x15b9   :  { %v1992_v14 = vsel %vm1991_vm2, %v3404_v20, %v1988_v19 }
0x15ba   :  { %v1997_v29 = vsel %vm1994_vm3, %v1996_v7, %v1992_v14  ;;  %v3408_v50 = vpop.eup %3407 }
0x15bb   :  { %v2044_v3 = vmul.f32 %v3408_v50, %v2042_v2  ;;  %vm2049_vm4 = vweird.f32 %v3408_v50  ;;  %v2000_v10 = vmul.f32 %v1997_v29, %v4364_v62 }
0x15bc   :  { %vm2050_vm6 = vmor %vm2048_vm5, %vm2049_vm4 }
0x15bd   :  { %v2045_v4 = vsub.f32 1.0, %v2044_v3 }
0x15bf   :  { %v2046_v26 = vmul.f32 %v3408_v50, %v2045_v4 }
0x15c1   :  { %v2047_v8 = vadd.f32 %v3408_v50, %v2046_v26 }
0x15c3   :  { %v2051_v6 = vsel %vm2050_vm6, %v3408_v50, %v2047_v8 }
0x15c4   :  { %v2056_v11 = vsel %vm2053_vm7, %v2055_v63, %v2051_v6 }
0x15c5   :  { %v2059_v17 = vmul.f32 %v2056_v11, %v4368_v55 }
0x15d2   :  { %v2003_v22 = vpop.permute.xlu2 %2002 }
0x15d3   :  { %v2005_v61 = vmul.f32 %v2003_v22, %v1997_v29 }
0x15d5   :  { %2007 = vrot.lane.b32.xlu1 %v2005_v61, %s3828_s26 }
0x1622   :  { %v2062_v36 = vpop.permute.xlu0 %2061 }
0x1623   :  { %v2064_v49 = vmul.f32 %v2062_v36, %v2056_v11 }
0x1625   :  { %2066 = vrot.lane.b32.xlu2 %v2064_v49, %s3828_s26 }
0x1647   :  { %v2008_v5 = vpop.permute.xlu1 %2007 }
0x1648   :  { %v4388_v41 = vadd.f32 %v2008_v5, %v2000_v10 }
0x164a   :  { %3409 = vtanh.f32 %v4388_v41 }
0x1650   :  { %v3410_v21 = vpop.eup %3409 }
0x1651   :  { %2013 = vrot.lane.b32.xlu0 %v3410_v21, %s3815_s29 }
0x167f   :  { %v2067_v48 = vpop.permute.xlu2 %2066 }
0x1680   :  { %v4393_v39 = vadd.f32 %v2067_v48, %v2059_v17 }
0x1682   :  { %3411 = vtanh.f32 %v4393_v39 }
0x1688   :  { %v3412_v9 = vpop.eup %3411 }
0x1689   :  { %2072 = vrot.lane.b32.xlu1 %v3412_v9, %s3815_s29 }
0x16c3   :  { %v2014_v40 = vpop.permute.xlu0 %2013 }
0x16c4   :  { %v2016_v62 = vmul.f32 %v2014_v40, %v1997_v29 }
0x16c6   :  { %v2077_v34 = vpack.c.bf16 %v2016_v62, %v2016_v62 }
0x16c8   :  { %2079 = vrot.lane.b32.xlu2 %v2077_v34, %s3828_s26 }
0x16fb   :  { %v2073_v43 = vpop.permute.xlu1 %2072 }
0x16fc   :  { %v2075_v44 = vmul.f32 %v2073_v43, %v2056_v11 }
0x16fe   :  { %v2136_v45 = vpack.c.bf16 %v2075_v44, %v2075_v44 }
0x1700   :  { %2138 = vrot.lane.b32.xlu0 %v2136_v45, %s3828_s26 }
0x1722   :  { %v2080_v46 = vpop.permute.xlu2 %2079 }
0x1723   :  { %3136 = vmatmul.msk.bf16.vlgmr.msra.gmra.mxu2 %vm376_vm9, %v2080_v46 }
0x1724   :  { %2444 = vmatpush.bf16.msra.mxu2 %v4265_v38 }
0x1728   :  { %2445 = vmatpush.bf16.msra.mxu2 %v4276_v28 }
0x1772   :  { %v2139_v55 = vpop.permute.xlu0 %2138 }
0x1773   :  { %3138 = vmatmul.msk.bf16.vlgmr.msra.gmra.mxu3 %vm376_vm9, %v2139_v55 }
0x1774   :  { %2503 = vmatpush.bf16.msra.mxu3 %v4297_v33 }
0x1778   :  { %2504 = vmatpush.bf16.msra.mxu3 %v4304_v51 }
0x17a6   :  { %v2093_v56 = vpop.f32.mrf.mxu2 }
0x17a7   :  { %v2097_v18 = vadd.f32 %v2093_v56, %v1727_v47 }
0x17a9   :  { %3413 = vtanh.f32 %v2097_v18  ;;  %v3137_v20 = vmul.f32 -1.442695, %v2097_v18 }
0x17ab   :  { %3415 = vpow2.f32 %v3137_v20  ;;  %v1729_v20 = vadd.f32 %v4326_v52, %v4343_v35 }
0x17ae   :  { %v2095_v30 = vpop.f32.mrf.mxu2 }
0x17af   :  { %v3414_v13 = vpop.eup %3413 }
0x17b0   :  { %2120 = vrot.lane.b32.xlu1 %v3414_v13, %s3815_s29 }
0x17b1   :  { %v3416_v58 = vpop.eup %3415 }
0x17b2   :  { %v2101_v59 = vadd.f32 1.0, %v3416_v58 }
0x17b4   :  { %v2113_v61 = vand.u32 2147483648, %v2101_v59  ;;  %vm2107_vm10 = vweird.f32 %v2101_v59  ;;  %v2111_v0 = vand.u32 2147483647, %v2101_v59 }
0x17b6   :  { %v2114_v1 = vor.u32 1.1754944e-38, %v2113_v61  ;;  %vm2112_vm12 = vcmp.eq.f32.partialorder %v2111_v0, 8.507059e+37 }
0x17f6   :  { %v2152_v53 = vpop.f32.mrf.mxu3 }
0x17f7   :  { %v2156_v57 = vadd.f32 %v2152_v53, %v4354_v25 }
0x17f9   :  { %3417 = vtanh.f32 %v2156_v57  ;;  %v3139_v4 = vmul.f32 -1.442695, %v2156_v57 }
0x17fa   :  { %3419 = vrcp.f32 %v2101_v59 }
0x17fb   :  { %3421 = vpow2.f32 %v3139_v4 }
0x17fe   :  { %v2154_v19 = vpop.f32.mrf.mxu3 }
0x17ff   :  { %v3418_v31 = vpop.eup %3417 }
0x1800   :  { %2179 = vrot.lane.b32.xlu2 %v3418_v31, %s3815_s29  ;;  %v3420_v24 = vpop.eup %3419 }
0x1801   :  { %v2103_v14 = vmul.f32 %v3420_v24, %v2101_v59  ;;  %vm2108_vm8 = vweird.f32 %v3420_v24  ;;  %v3422_v26 = vpop.eup %3421 }
0x1802   :  { %vm2109_vm11 = vmor %vm2107_vm10, %vm2108_vm8  ;;  %v2160_v8 = vadd.f32 1.0, %v3422_v26 }
0x1803   :  { %v2104_v7 = vsub.f32 1.0, %v2103_v14 }
0x1804   :  { %3423 = vrcp.f32 %v2160_v8  ;;  %v2172_v11 = vand.u32 2147483648, %v2160_v8  ;;  %vm2166_vm14 = vweird.f32 %v2160_v8  ;;  %v2170_v49 = vand.u32 2147483647, %v2160_v8 }
0x1805   :  { %v2105_v22 = vmul.f32 %v3420_v24, %v2104_v7 }
0x1806   :  { %v2173_v5 = vor.u32 1.1754944e-38, %v2172_v11  ;;  %vm2171_vm0 = vcmp.eq.f32.partialorder %v2170_v49, 8.507059e+37 }
0x1807   :  { %v2106_v29 = vadd.f32 %v3420_v24, %v2105_v22 }
0x1809   :  { %v2110_v25 = vsel %vm2109_vm11, %v3420_v24, %v2106_v29 }
0x180a   :  { %v2115_v50 = vsel %vm2112_vm12, %v2114_v1, %v2110_v25  ;;  %v3424_v15 = vpop.eup %3423 }
0x180b   :  { %v2162_v54 = vmul.f32 %v3424_v15, %v2160_v8  ;;  %vm2167_vm13 = vweird.f32 %v3424_v15  ;;  %v2118_v9 = vmul.f32 %v2115_v50, %v4388_v41 }
0x180c   :  { %vm2168_vm15 = vmor %vm2166_vm14, %vm2167_vm13 }
0x180d   :  { %v2163_v6 = vsub.f32 1.0, %v2162_v54 }
0x180f   :  { %v2164_v63 = vmul.f32 %v3424_v15, %v2163_v6 }
0x1811   :  { %v2165_v36 = vadd.f32 %v3424_v15, %v2164_v63 }
0x1813   :  { %v2169_v10 = vsel %vm2168_vm15, %v3424_v15, %v2165_v36 }
0x1814   :  { %v2174_v17 = vsel %vm2171_vm0, %v2173_v5, %v2169_v10 }
0x1815   :  { %v2177_v43 = vmul.f32 %v2174_v17, %v4393_v39 }
0x1822   :  { %v2121_v2 = vpop.permute.xlu1 %2120 }
0x1823   :  { %v2123_v3 = vmul.f32 %v2121_v2, %v2115_v50 }
0x1825   :  { %2125 = vrot.lane.b32.xlu0 %v2123_v3, %s3828_s26 }
0x185a   :  { %v2180_v21 = vpop.permute.xlu2 %2179 }
0x185b   :  { %v2182_v48 = vmul.f32 %v2180_v21, %v2174_v17 }
0x185d   :  { %2184 = vrot.lane.b32.xlu1 %v2182_v48, %s3828_s26 }
0x1897   :  { %v2126_v40 = vpop.permute.xlu0 %2125 }
0x1898   :  { %v4413_v62 = vadd.f32 %v2126_v40, %v2118_v9 }
0x189a   :  { %3425 = vtanh.f32 %v4413_v62 }
0x18a0   :  { %v3426_v34 = vpop.eup %3425 }
0x18a1   :  { %2131 = vrot.lane.b32.xlu2 %v3426_v34, %s3815_s29 }
0x18cf   :  { %v2185_v44 = vpop.permute.xlu1 %2184 }
0x18d0   :  { %v4418_v45 = vadd.f32 %v2185_v44, %v2177_v43 }
0x18d2   :  { %3427 = vtanh.f32 %v4418_v45 }
0x18d8   :  { %v3428_v46 = vpop.eup %3427 }
0x18d9   :  { %2190 = vrot.lane.b32.xlu0 %v3428_v46, %s3815_s29 }
0x18fb   :  { %v2132_v55 = vpop.permute.xlu2 %2131 }
0x18fc   :  { %v2134_v41 = vmul.f32 %v2132_v55, %v2115_v50 }
0x18fe   :  { %v2195_v47 = vpack.c.bf16 %v2134_v41, %v2134_v41 }
0x1900   :  { %2197 = vrot.lane.b32.xlu1 %v2195_v47, %s3828_s26 }
0x194b   :  { %v2191_v56 = vpop.permute.xlu0 %2190 }
0x194c   :  { %v2193_v18 = vmul.f32 %v2191_v56, %v2174_v17 }
0x194e   :  { %v2254_v30 = vpack.c.bf16 %v2193_v18, %v2193_v18 }
0x1950   :  { %2256 = vrot.lane.b32.xlu2 %v2254_v30, %s3828_s26 }
0x1972   :  { %v2198_v13 = vpop.permute.xlu1 %2197 }
0x1973   :  { %3140 = vmatmul.msk.bf16.vlgmr.msrb.gmra.mxu2 %vm376_vm9, %v2198_v13 }
0x1974   :  { %2680 = vmatpush.bf16.msrb.mxu2 %v4265_v38 }
0x1978   :  { %2681 = vmatpush.bf16.msrb.mxu2 %v4276_v28 }
0x19aa   :  { %v2257_v39 = vpop.permute.xlu2 %2256 }
0x19ab   :  { %3142 = vmatmul.msk.bf16.vlgmr.msrb.gmra.mxu3 %vm376_vm9, %v2257_v39  ;;  %v4451_v39 = vpop.f32.mrf.mxu0 }
0x19ac   :  { %2739 = vmatpush.bf16.msrb.mxu3 %v4297_v33 }
0x19b0   :  { %2740 = vmatpush.bf16.msrb.mxu3 %v4304_v51 }
0x19f6   :  { %v2211_v53 = vpop.f32.mrf.mxu2 }
0x19f7   :  { %v2215_v57 = vadd.f32 %v2211_v53, %v1729_v20  ;;  %v1732_v20 = vadd.f32 %v4326_v52, %v4347_v37 }
0x19f9   :  { %3429 = vtanh.f32 %v2215_v57  ;;  %v3141_v33 = vmul.f32 -1.442695, %v2215_v57 }
0x19fe   :  { %v2213_v58 = vpop.f32.mrf.mxu2 }
0x19ff   :  { %v3430_v19 = vpop.eup %3429 }
0x1a00   :  { %2238 = vrot.lane.b32.xlu0 %v3430_v19, %s3815_s29 }
0x1a2e   :  { %v2270_v38 = vpop.f32.mrf.mxu3 }
0x1a2f   :  { %v2274_v28 = vadd.f32 %v2270_v38, %v4349_v60 }
0x1a31   :  { %3431 = vtanh.f32 %v2274_v28  ;;  %v3143_v3 = vmul.f32 -1.442695, %v2274_v28 }
0x1a32   :  { %3433 = vpow2.f32 %v3141_v33 }
0x1a36   :  { %v2272_v31 = vpop.f32.mrf.mxu3 }
0x1a37   :  { %v3432_v59 = vpop.eup %3431 }
0x1a38   :  { %2297 = vrot.lane.b32.xlu1 %v3432_v59, %s3815_s29  ;;  %v3434_v51 = vpop.eup %3433 }
0x1a39   :  { %v2219_v24 = vadd.f32 1.0, %v3434_v51 }
0x1a3b   :  { %3435 = vrcp.f32 %v2219_v24  ;;  %v2231_v61 = vand.u32 2147483648, %v2219_v24  ;;  %vm2225_vm2 = vweird.f32 %v2219_v24  ;;  %v2229_v0 = vand.u32 2147483647, %v2219_v24 }
0x1a3c   :  { %3437 = vpow2.f32 %v3143_v3 }
0x1a3d   :  { %v2232_v25 = vor.u32 1.1754944e-38, %v2231_v61  ;;  %vm2230_vm4 = vcmp.eq.f32.partialorder %v2229_v0, 8.507059e+37 }
0x1a41   :  { %v3436_v35 = vpop.eup %3435 }
0x1a42   :  { %v2221_v14 = vmul.f32 %v3436_v35, %v2219_v24  ;;  %vm2226_vm1 = vweird.f32 %v3436_v35  ;;  %v3438_v4 = vpop.eup %3437 }
0x1a43   :  { %vm2227_vm3 = vmor %vm2225_vm2, %vm2226_vm1  ;;  %v2278_v26 = vadd.f32 1.0, %v3438_v4 }
0x1a44   :  { %v2222_v7 = vsub.f32 1.0, %v2221_v14 }
0x1a45   :  { %3439 = vrcp.f32 %v2278_v26  ;;  %v2290_v36 = vand.u32 2147483648, %v2278_v26  ;;  %vm2284_vm6 = vweird.f32 %v2278_v26  ;;  %v2288_v11 = vand.u32 2147483647, %v2278_v26 }
0x1a46   :  { %v2223_v22 = vmul.f32 %v3436_v35, %v2222_v7 }
0x1a47   :  { %v2291_v10 = vor.u32 1.1754944e-38, %v2290_v36  ;;  %vm2289_vm8 = vcmp.eq.f32.partialorder %v2288_v11, 8.507059e+37 }
0x1a48   :  { %v2224_v29 = vadd.f32 %v3436_v35, %v2223_v22 }
0x1a4a   :  { %v2228_v60 = vsel %vm2227_vm3, %v3436_v35, %v2224_v29 }
0x1a4b   :  { %v2233_v2 = vsel %vm2230_vm4, %v2232_v25, %v2228_v60  ;;  %v3440_v8 = vpop.eup %3439 }
0x1a4c   :  { %v2280_v15 = vmul.f32 %v3440_v8, %v2278_v26  ;;  %vm2285_vm5 = vweird.f32 %v3440_v8  ;;  %v2236_v48 = vmul.f32 %v2233_v2, %v4413_v62 }
0x1a4d   :  { %vm2286_vm7 = vmor %vm2284_vm6, %vm2285_vm5 }
0x1a4e   :  { %v2281_v54 = vsub.f32 1.0, %v2280_v15 }
0x1a50   :  { %v2282_v6 = vmul.f32 %v3440_v8, %v2281_v54 }
0x1a52   :  { %v2283_v63 = vadd.f32 %v3440_v8, %v2282_v6 }
0x1a54   :  { %v2287_v49 = vsel %vm2286_vm7, %v3440_v8, %v2283_v63 }
0x1a55   :  { %v2292_v21 = vsel %vm2289_vm8, %v2291_v10, %v2287_v49 }
0x1a56   :  { %v2295_v43 = vmul.f32 %v2292_v21, %v4418_v45 }
0x1a72   :  { %v2239_v1 = vpop.permute.xlu0 %2238 }
0x1a73   :  { %v2241_v50 = vmul.f32 %v2239_v1, %v2233_v2 }
0x1a75   :  { %2243 = vrot.lane.b32.xlu2 %v2241_v50, %s3828_s26 }
0x1aaa   :  { %v2298_v5 = vpop.permute.xlu1 %2297 }
0x1aab   :  { %v2300_v17 = vmul.f32 %v2298_v5, %v2292_v21 }
0x1aad   :  { %2302 = vrot.lane.b32.xlu0 %v2300_v17, %s3828_s26 }
0x1acf   :  { %v2244_v9 = vpop.permute.xlu2 %2243 }
0x1ad0   :  { %v4438_v40 = vadd.f32 %v2244_v9, %v2236_v48 }
0x1ad2   :  { %3441 = vtanh.f32 %v4438_v40 }
0x1ad8   :  { %v3442_v34 = vpop.eup %3441 }
0x1ad9   :  { %2249 = vrot.lane.b32.xlu1 %v3442_v34, %s3815_s29 }
0x1b1f   :  { %v2303_v44 = vpop.permute.xlu0 %2302 }
0x1b20   :  { %v4443_v46 = vadd.f32 %v2303_v44, %v2295_v43 }
0x1b22   :  { %3443 = vtanh.f32 %v4443_v46 }
0x1b28   :  { %v3444_v55 = vpop.eup %3443 }
0x1b29   :  { %2308 = vrot.lane.b32.xlu2 %v3444_v55, %s3815_s29 }
0x1b4b   :  { %v2250_v41 = vpop.permute.xlu1 %2249 }
0x1b4c   :  { %v2252_v62 = vmul.f32 %v2250_v41, %v2233_v2 }
0x1b4e   :  { %v2313_v47 = vpack.c.bf16 %v2252_v62, %v2252_v62 }
0x1b50   :  { %2315 = vrot.lane.b32.xlu0 %v2313_v47, %s3828_s26 }
0x1b83   :  { %v2309_v56 = vpop.permute.xlu2 %2308 }
0x1b84   :  { %v2311_v18 = vmul.f32 %v2309_v56, %v2292_v21 }
0x1b86   :  { %v2372_v30 = vpack.c.bf16 %v2311_v18, %v2311_v18 }
0x1b88   :  { %2374 = vrot.lane.b32.xlu1 %v2372_v30, %s3828_s26 }
0x1bc2   :  { %v2316_v13 = vpop.permute.xlu0 %2315 }
0x1bc3   :  { %3144 = vmatmul.msk.bf16.vlgmr.msra.gmra.mxu0 %vm376_vm9, %v2316_v13 }
0x1bfa   :  { %v2375_v45 = vpop.permute.xlu1 %2374 }
0x1bfb   :  { %3146 = vmatmul.msk.bf16.vlgmr.msra.gmra.mxu1 %vm376_vm9, %v2375_v45 }
0x1c40   :  { %v2329_v53 = vpop.f32.mrf.mxu0 }
0x1c41   :  { %v2333_v57 = vadd.f32 %v2329_v53, %v1732_v20 }
0x1c43   :  { %3445 = vtanh.f32 %v2333_v57  ;;  %v3145_v38 = vmul.f32 -1.442695, %v2333_v57 }
0x1c45   :  { %3447 = vpow2.f32 %v3145_v38 }
0x1c48   :  { %v2331_v58 = vpop.f32.mrf.mxu0 }
0x1c49   :  { %v3446_v19 = vpop.eup %3445 }
0x1c4a   :  { %2356 = vrot.lane.b32.xlu2 %v3446_v19, %s3815_s29 }
0x1c4b   :  { %v3448_v59 = vpop.eup %3447 }
0x1c4c   :  { %v2337_v24 = vadd.f32 1.0, %v3448_v59 }
0x1c4e   :  { %v2349_v22 = vand.u32 2147483648, %v2337_v24  ;;  %vm2343_vm11 = vweird.f32 %v2337_v24  ;;  %v2347_v29 = vand.u32 2147483647, %v2337_v24 }
0x1c50   :  { %v2350_v61 = vor.u32 1.1754944e-38, %v2349_v22  ;;  %vm2348_vm13 = vcmp.eq.f32.partialorder %v2347_v29, 8.507059e+37 }
0x1c78   :  { %v2388_v28 = vpop.f32.mrf.mxu1 }
0x1c79   :  { %v2392_v31 = vadd.f32 %v2388_v28, %v4345_v16 }
0x1c7b   :  { %3449 = vtanh.f32 %v2392_v31  ;;  %v3147_v1 = vmul.f32 -1.442695, %v2392_v31 }
0x1c7c   :  { %3451 = vrcp.f32 %v2337_v24 }
0x1c7d   :  { %3453 = vpow2.f32 %v3147_v1 }
0x1c80   :  { %v2390_v33 = vpop.f32.mrf.mxu1 }
0x1c81   :  { %v3450_v51 = vpop.eup %3449 }
0x1c82   :  { %2415 = vrot.lane.b32.xlu0 %v3450_v51, %s3815_s29  ;;  %v3452_v52 = vpop.eup %3451 }
0x1c83   :  { %v2339_v37 = vmul.f32 %v3452_v52, %v2337_v24  ;;  %vm2344_vm10 = vweird.f32 %v3452_v52  ;;  %v3454_v2 = vpop.eup %3453 }
0x1c84   :  { %vm2345_vm12 = vmor %vm2343_vm11, %vm2344_vm10  ;;  %v2396_v50 = vadd.f32 1.0, %v3454_v2 }
0x1c85   :  { %v2340_v35 = vsub.f32 1.0, %v2339_v37 }
0x1c86   :  { %3455 = vrcp.f32 %v2396_v50  ;;  %v2408_v54 = vand.u32 2147483648, %v2396_v50  ;;  %vm2402_vm15 = vweird.f32 %v2396_v50  ;;  %v2406_v6 = vand.u32 2147483647, %v2396_v50 }
0x1c87   :  { %v2341_v14 = vmul.f32 %v3452_v52, %v2340_v35 }
0x1c88   :  { %v2409_v36 = vor.u32 1.1754944e-38, %v2408_v54  ;;  %vm2407_vm1 = vcmp.eq.f32.partialorder %v2406_v6, 8.507059e+37 }
0x1c89   :  { %v2342_v7 = vadd.f32 %v3452_v52, %v2341_v14 }
0x1c8b   :  { %v2346_v16 = vsel %vm2345_vm12, %v3452_v52, %v2342_v7 }
0x1c8c   :  { %v2351_v60 = vsel %vm2348_vm13, %v2350_v61, %v2346_v16  ;;  %v3456_v3 = vpop.eup %3455 }
0x1c8d   :  { %v2398_v4 = vmul.f32 %v3456_v3, %v2396_v50  ;;  %vm2403_vm14 = vweird.f32 %v3456_v3  ;;  %v2354_v5 = vmul.f32 %v2351_v60, %v4438_v40 }
0x1c8e   :  { %vm2404_vm0 = vmor %vm2402_vm15, %vm2403_vm14 }
0x1c8f   :  { %v2399_v26 = vsub.f32 1.0, %v2398_v4 }
0x1c91   :  { %v2400_v8 = vmul.f32 %v3456_v3, %v2399_v26 }
0x1c93   :  { %v2401_v15 = vadd.f32 %v3456_v3, %v2400_v8 }
0x1c95   :  { %v2405_v63 = vsel %vm2404_vm0, %v3456_v3, %v2401_v15 }
0x1c96   :  { %v2410_v49 = vsel %vm2407_vm1, %v2409_v36, %v2405_v63 }
0x1c97   :  { %v2413_v9 = vmul.f32 %v2410_v49, %v4443_v46 }
0x1ca4   :  { %v2357_v0 = vpop.permute.xlu2 %2356 }
0x1ca5   :  { %v2359_v25 = vmul.f32 %v2357_v0, %v2351_v60 }
0x1ca7   :  { %2361 = vrot.lane.b32.xlu1 %v2359_v25, %s3828_s26 }
0x1cf4   :  { %v2416_v11 = vpop.permute.xlu0 %2415 }
0x1cf5   :  { %v2418_v10 = vmul.f32 %v2416_v11, %v2410_v49 }
0x1cf7   :  { %2420 = vrot.lane.b32.xlu2 %v2418_v10, %s3828_s26 }
0x1d19   :  { %v2362_v21 = vpop.permute.xlu1 %2361 }
0x1d1a   :  { %v4461_v17 = vadd.f32 %v2362_v21, %v2354_v5 }
0x1d1c   :  { %3457 = vtanh.f32 %v4461_v17 }
0x1d22   :  { %v3458_v48 = vpop.eup %3457 }
0x1d23   :  { %2367 = vrot.lane.b32.xlu0 %v3458_v48, %s3815_s29 }
0x1d51   :  { %v2421_v34 = vpop.permute.xlu2 %2420 }
0x1d52   :  { %v4466_v43 = vadd.f32 %v2421_v34, %v2413_v9 }
0x1d54   :  { %3459 = vtanh.f32 %v4466_v43 }
0x1d5a   :  { %v3460_v44 = vpop.eup %3459 }
0x1d5b   :  { %2426 = vrot.lane.b32.xlu1 %v3460_v44, %s3815_s29 }
0x1d95   :  { %v2368_v55 = vpop.permute.xlu0 %2367 }
0x1d96   :  { %v2370_v40 = vmul.f32 %v2368_v55, %v2351_v60 }
0x1d98   :  { %v2431_v41 = vpack.c.bf16 %v2370_v40, %v2370_v40 }
0x1d9a   :  { %2433 = vrot.lane.b32.xlu2 %v2431_v41, %s3828_s26 }
0x1dcd   :  { %v2427_v62 = vpop.permute.xlu1 %2426 }
0x1dce   :  { %v2429_v47 = vmul.f32 %v2427_v62, %v2410_v49 }
0x1dd0   :  { %v2490_v56 = vpack.c.bf16 %v2429_v47, %v2429_v47 }
0x1dd2   :  { %2492 = vrot.lane.b32.xlu0 %v2490_v56, %s3828_s26 }
0x1df4   :  { %v2434_v18 = vpop.permute.xlu2 %2433 }
0x1df5   :  { %3148 = vmatmul.msk.bf16.vlgmr.msra.gmra.mxu2 %vm376_vm9, %v2434_v18 }
0x1e44   :  { %v2493_v46 = vpop.permute.xlu0 %2492 }
0x1e45   :  { %3150 = vmatmul.msk.bf16.vlgmr.msra.gmra.mxu3 %vm376_vm9, %v2493_v46 }
0x1e78   :  { %v2447_v30 = vpop.f32.mrf.mxu2 }
0x1e79   :  { %v2451_v13 = vadd.f32 %v2447_v30, %v4352_v42 }
0x1e7b   :  { %3461 = vtanh.f32 %v2451_v13  ;;  %v3149_v53 = vmul.f32 -1.442695, %v2451_v13 }
0x1e7d   :  { %3463 = vpow2.f32 %v3149_v53 }
0x1e80   :  { %v2449_v45 = vpop.f32.mrf.mxu2 }
0x1e81   :  { %v3462_v20 = vpop.eup %3461 }
0x1e82   :  { %2474 = vrot.lane.b32.xlu1 %v3462_v20, %s3815_s29 }
0x1e83   :  { %v3464_v19 = vpop.eup %3463 }
0x1e84   :  { %v2455_v31 = vadd.f32 1.0, %v3464_v19 }
0x1e86   :  { %v2467_v52 = vand.u32 2147483648, %v2455_v31  ;;  %vm2461_vm3 = vweird.f32 %v2455_v31  ;;  %v2465_v37 = vand.u32 2147483647, %v2455_v31 }
0x1e88   :  { %v2468_v35 = vor.u32 1.1754944e-38, %v2467_v52  ;;  %vm2466_vm5 = vcmp.eq.f32.partialorder %v2465_v37, 8.507059e+37 }
0x1ec8   :  { %v2506_v57 = vpop.f32.mrf.mxu3 }
0x1ec9   :  { %v2510_v58 = vadd.f32 %v2506_v57, %v4341_v27 }
0x1ecb   :  { %3465 = vtanh.f32 %v2510_v58  ;;  %v3151_v29 = vmul.f32 -1.442695, %v2510_v58 }
0x1ecc   :  { %3467 = vrcp.f32 %v2455_v31 }
0x1ecd   :  { %3469 = vpow2.f32 %v3151_v29 }
0x1ed0   :  { %v2508_v38 = vpop.f32.mrf.mxu3 }
0x1ed1   :  { %v3466_v28 = vpop.eup %3465 }
0x1ed2   :  { %2533 = vrot.lane.b32.xlu2 %v3466_v28, %s3815_s29  ;;  %v3468_v59 = vpop.eup %3467 }
0x1ed3   :  { %v2457_v42 = vmul.f32 %v3468_v59, %v2455_v31  ;;  %vm2462_vm2 = vweird.f32 %v3468_v59  ;;  %v3470_v16 = vpop.eup %3469 }
0x1ed4   :  { %vm2463_vm4 = vmor %vm2461_vm3, %vm2462_vm2  ;;  %v2514_v61 = vadd.f32 1.0, %v3470_v16 }
0x1ed5   :  { %v2458_v33 = vsub.f32 1.0, %v2457_v42 }
0x1ed6   :  { %3471 = vrcp.f32 %v2514_v61  ;;  %v2526_v50 = vand.u32 2147483648, %v2514_v61  ;;  %vm2520_vm7 = vweird.f32 %v2514_v61  ;;  %v2524_v3 = vand.u32 2147483647, %v2514_v61 }
0x1ed7   :  { %v2459_v51 = vmul.f32 %v3468_v59, %v2458_v33 }
0x1ed8   :  { %v2527_v26 = vor.u32 1.1754944e-38, %v2526_v50  ;;  %vm2525_vm10 = vcmp.eq.f32.partialorder %v2524_v3, 8.507059e+37 }
0x1ed9   :  { %v2460_v24 = vadd.f32 %v3468_v59, %v2459_v51 }
0x1edb   :  { %v2464_v27 = vsel %vm2463_vm4, %v3468_v59, %v2460_v24 }
0x1edc   :  { %v2469_v7 = vsel %vm2466_vm5, %v2468_v35, %v2464_v27  ;;  %v3472_v0 = vpop.eup %3471 }
0x1edd   :  { %v2516_v60 = vmul.f32 %v3472_v0, %v2514_v61  ;;  %vm2521_vm6 = vweird.f32 %v3472_v0  ;;  %v2472_v6 = vmul.f32 %v2469_v7, %v4461_v17 }
0x1ede   :  { %vm2522_vm8 = vmor %vm2520_vm7, %vm2521_vm6 }
0x1edf   :  { %v2517_v25 = vsub.f32 1.0, %v2516_v60 }
0x1ee1   :  { %v2518_v1 = vmul.f32 %v3472_v0, %v2517_v25 }
0x1ee3   :  { %v2519_v2 = vadd.f32 %v3472_v0, %v2518_v1 }
0x1ee5   :  { %v2523_v4 = vsel %vm2522_vm8, %v3472_v0, %v2519_v2 }
0x1ee6   :  { %v2528_v15 = vsel %vm2525_vm10, %v2527_v26, %v2523_v4 }
0x1ee7   :  { %v2531_v49 = vmul.f32 %v2528_v15, %v4466_v43 }
0x1ef4   :  { %v2475_v14 = vpop.permute.xlu1 %2474 }
0x1ef5   :  { %v2477_v22 = vmul.f32 %v2475_v14, %v2469_v7 }
0x1ef7   :  { %2479 = vrot.lane.b32.xlu0 %v2477_v22, %s3828_s26 }
0x1f2c   :  { %v2534_v8 = vpop.permute.xlu2 %2533 }
0x1f2d   :  { %v2536_v54 = vmul.f32 %v2534_v8, %v2528_v15 }
0x1f2f   :  { %2538 = vrot.lane.b32.xlu1 %v2536_v54, %s3828_s26 }
0x1f69   :  { %v2480_v63 = vpop.permute.xlu0 %2479 }
0x1f6a   :  { %v4481_v36 = vadd.f32 %v2480_v63, %v2472_v6 }
0x1f6c   :  { %3473 = vtanh.f32 %v4481_v36 }
0x1f72   :  { %v3474_v11 = vpop.eup %3473 }
0x1f73   :  { %2485 = vrot.lane.b32.xlu2 %v3474_v11, %s3815_s29 }
0x1fa1   :  { %v2539_v10 = vpop.permute.xlu1 %2538 }
0x1fa2   :  { %v4486_v5 = vadd.f32 %v2539_v10, %v2531_v49 }
0x1fa4   :  { %3475 = vtanh.f32 %v4486_v5 }
0x1faa   :  { %v3476_v21 = vpop.eup %3475 }
0x1fab   :  { %2544 = vrot.lane.b32.xlu0 %v3476_v21, %s3815_s29 }
0x1fcd   :  { %v2486_v48 = vpop.permute.xlu2 %2485 }
0x1fce   :  { %v2488_v17 = vmul.f32 %v2486_v48, %v2469_v7  ;;  %v3511_v48 = vld [vmem:[#allocation17] ss:$0 sm:$0xff] }
0x1fd0   :  { %v2549_v9 = vpack.c.bf16 %v2488_v17, %v2488_v17  ;;  %v1739_v17 = vadd.f32 %v3511_v48, %v4451_v39 }
0x1fd2   :  { %2551 = vrot.lane.b32.xlu1 %v2549_v9, %s3828_s26 }
0x201d   :  { %v2545_v34 = vpop.permute.xlu0 %2544 }
0x201e   :  { %v2547_v44 = vmul.f32 %v2545_v34, %v2528_v15 }
0x2020   :  { %v2608_v55 = vpack.c.bf16 %v2547_v44, %v2547_v44 }
0x2022   :  { %2610 = vrot.lane.b32.xlu2 %v2608_v55, %s3828_s26 }
0x2044   :  { %v2552_v40 = vpop.permute.xlu1 %2551 }
0x2045   :  { %3152 = vmatmul.msk.bf16.vlgmr.msrb.gmra.mxu0 %vm376_vm9, %v2552_v40 }
0x207c   :  { %v2611_v43 = vpop.permute.xlu2 %2610 }
0x207d   :  { %3154 = vmatmul.msk.bf16.vlgmr.msrb.gmra.mxu1 %vm376_vm9, %v2611_v43 }
0x20c2   :  { %v2565_v41 = vpop.f32.mrf.mxu0 }
0x20c3   :  { %v2569_v62 = vadd.f32 %v2565_v41, %v4357_v32 }
0x20c5   :  { %3477 = vtanh.f32 %v2569_v62  ;;  %v3153_v45 = vmul.f32 -1.442695, %v2569_v62 }
0x20ca   :  { %v2567_v47 = vpop.f32.mrf.mxu0 }
0x20cb   :  { %v3478_v56 = vpop.eup %3477 }
0x20cc   :  { %2592 = vrot.lane.b32.xlu0 %v3478_v56, %s3815_s29 }
0x20fa   :  { %v2624_v18 = vpop.f32.mrf.mxu1 }
0x20fb   :  { %v2628_v46 = vadd.f32 %v2624_v18, %v4336_v23 }
0x20fd   :  { %3479 = vtanh.f32 %v2628_v46  ;;  %v3155_v24 = vmul.f32 -1.442695, %v2628_v46 }
0x20fe   :  { %3481 = vpow2.f32 %v3153_v45 }
0x2102   :  { %v2626_v30 = vpop.f32.mrf.mxu1 }
0x2103   :  { %v3480_v13 = vpop.eup %3479 }
0x2104   :  { %2651 = vrot.lane.b32.xlu1 %v3480_v13, %s3815_s29  ;;  %v3482_v20 = vpop.eup %3481 }
0x2105   :  { %v2573_v53 = vadd.f32 1.0, %v3482_v20 }
0x2107   :  { %3483 = vrcp.f32 %v2573_v53  ;;  %v2585_v28 = vand.u32 2147483648, %v2573_v53  ;;  %vm2579_vm12 = vweird.f32 %v2573_v53  ;;  %v2583_v31 = vand.u32 2147483647, %v2573_v53 }
0x2108   :  { %3485 = vpow2.f32 %v3155_v24 }
0x2109   :  { %v2586_v59 = vor.u32 1.1754944e-38, %v2585_v28  ;;  %vm2584_vm14 = vcmp.eq.f32.partialorder %v2583_v31, 8.507059e+37 }
0x210d   :  { %v3484_v57 = vpop.eup %3483 }
0x210e   :  { %v2575_v32 = vmul.f32 %v3484_v57, %v2573_v53  ;;  %vm2580_vm11 = vweird.f32 %v3484_v57  ;;  %v3486_v52 = vpop.eup %3485 }
0x210f   :  { %vm2581_vm13 = vmor %vm2579_vm12, %vm2580_vm11  ;;  %v2632_v37 = vadd.f32 1.0, %v3486_v52 }
0x2110   :  { %v2576_v58 = vsub.f32 1.0, %v2575_v32 }
0x2111   :  { %3487 = vrcp.f32 %v2632_v37  ;;  %v2644_v29 = vand.u32 2147483648, %v2632_v37  ;;  %vm2638_vm0 = vweird.f32 %v2632_v37  ;;  %v2642_v16 = vand.u32 2147483647, %v2632_v37 }
0x2112   :  { %v2577_v19 = vmul.f32 %v3484_v57, %v2576_v58 }
0x2113   :  { %v2645_v0 = vor.u32 1.1754944e-38, %v2644_v29  ;;  %vm2643_vm2 = vcmp.eq.f32.partialorder %v2642_v16, 8.507059e+37 }
0x2114   :  { %v2578_v38 = vadd.f32 %v3484_v57, %v2577_v19 }
0x2116   :  { %v2582_v23 = vsel %vm2581_vm13, %v3484_v57, %v2578_v38 }
0x2117   :  { %v2587_v33 = vsel %vm2584_vm14, %v2586_v59, %v2582_v23  ;;  %v3488_v27 = vpop.eup %3487 }
0x2118   :  { %v2634_v35 = vmul.f32 %v3488_v27, %v2632_v37  ;;  %vm2639_vm15 = vweird.f32 %v3488_v27  ;;  %v2590_v2 = vmul.f32 %v2587_v33, %v4481_v36 }
0x2119   :  { %vm2640_vm1 = vmor %vm2638_vm0, %vm2639_vm15 }
0x211a   :  { %v2635_v14 = vsub.f32 1.0, %v2634_v35 }
0x211c   :  { %v2636_v7 = vmul.f32 %v3488_v27, %v2635_v14 }
0x211e   :  { %v2637_v22 = vadd.f32 %v3488_v27, %v2636_v7 }
0x2120   :  { %v2641_v61 = vsel %vm2640_vm1, %v3488_v27, %v2637_v22 }
0x2121   :  { %v2646_v25 = vsel %vm2643_vm2, %v2645_v0, %v2641_v61 }
0x2122   :  { %v2649_v26 = vmul.f32 %v2646_v25, %v4486_v5 }
0x213e   :  { %v2593_v42 = vpop.permute.xlu0 %2592 }
0x213f   :  { %v2595_v51 = vmul.f32 %v2593_v42, %v2587_v33 }
0x2141   :  { %2597 = vrot.lane.b32.xlu2 %v2595_v51, %s3828_s26 }
0x2176   :  { %v2652_v60 = vpop.permute.xlu1 %2651 }
0x2177   :  { %v2654_v1 = vmul.f32 %v2652_v60, %v2646_v25 }
0x2179   :  { %2656 = vrot.lane.b32.xlu0 %v2654_v1, %s3828_s26 }
0x219b   :  { %v2598_v50 = vpop.permute.xlu2 %2597 }
0x219c   :  { %v4501_v3 = vadd.f32 %v2598_v50, %v2590_v2 }
0x219e   :  { %3489 = vtanh.f32 %v4501_v3 }
0x21a4   :  { %v3490_v4 = vpop.eup %3489 }
0x21a5   :  { %2603 = vrot.lane.b32.xlu1 %v3490_v4, %s3815_s29 }
0x21eb   :  { %v2657_v8 = vpop.permute.xlu0 %2656 }
0x21ec   :  { %v4506_v15 = vadd.f32 %v2657_v8, %v2649_v26  ;;  %v3228_v26 = vld [vmem:[#allocation20] sm:$0xff] }
0x21ee   :  { %3491 = vtanh.f32 %v4506_v15 }
0x21f4   :  { %v3492_v54 = vpop.eup %3491 }
0x21f5   :  { %2662 = vrot.lane.b32.xlu2 %v3492_v54, %s3815_s29 }
0x2217   :  { %v2604_v6 = vpop.permute.xlu1 %2603 }
0x2218   :  { %v2606_v63 = vmul.f32 %v2604_v6, %v2587_v33 }
0x221a   :  { %v2667_v36 = vpack.c.bf16 %v2606_v63, %v2606_v63  ;;  %v3230_v63 = vld [vmem:[#allocation22] sm:$0xff] }
0x221c   :  { %2669 = vrot.lane.b32.xlu0 %v2667_v36, %s3828_s26 }
0x224f   :  { %v2663_v11 = vpop.permute.xlu2 %2662 }
0x2250   :  { %v2665_v49 = vmul.f32 %v2663_v11, %v2646_v25 }
0x2252   :  { %v2726_v10 = vpack.c.bf16 %v2665_v49, %v2665_v49 }
0x2254   :  { %2728 = vrot.lane.b32.xlu1 %v2726_v10, %s3828_s26 }
0x228e   :  { %v2670_v21 = vpop.permute.xlu0 %2669 }
0x228f   :  { %3156 = vmatmul.msk.bf16.vlgmr.msrb.gmra.mxu2 %vm376_vm9, %v2670_v21  ;;  %v3252_v21 = vld [vmem:[%s4549_s15] ss:$0 sm:$0xff] }
0x22c6   :  { %v2729_v5 = vpop.permute.xlu1 %2728 }
0x22c7   :  { %3158 = vmatmul.msk.bf16.vlgmr.msrb.gmra.mxu3 %vm376_vm9, %v2729_v5 }
0x2312   :  { %v2683_v9 = vpop.f32.mrf.mxu2 }
0x2313   :  { %v2687_v34 = vadd.f32 %v2683_v9, %v1739_v17 }
0x2315   :  { %3493 = vtanh.f32 %v2687_v34  ;;  %v3157_v40 = vmul.f32 -1.442695, %v2687_v34 }
0x2317   :  { %3495 = vpow2.f32 %v3157_v40 }
0x231a   :  { %v2685_v44 = vpop.f32.mrf.mxu2 }
0x231b   :  { %v3494_v55 = vpop.eup %3493 }
0x231c   :  { %2710 = vrot.lane.b32.xlu2 %v3494_v55, %s3815_s29 }
0x231d   :  { %v3496_v62 = vpop.eup %3495 }
0x231e   :  { %v2691_v18 = vadd.f32 1.0, %v3496_v62 }
0x2320   :  { %v2703_v20 = vand.u32 2147483648, %v2691_v18  ;;  %vm2697_vm4 = vweird.f32 %v2691_v18  ;;  %v2701_v53 = vand.u32 2147483647, %v2691_v18 }
0x2322   :  { %v2704_v57 = vor.u32 1.1754944e-38, %v2703_v20  ;;  %vm2702_vm6 = vcmp.eq.f32.partialorder %v2701_v53, 8.507059e+37 }
0x234a   :  { %v2742_v43 = vpop.f32.mrf.mxu3 }
0x234b   :  { %v2746_v41 = vadd.f32 %v2742_v43, %v4332_v12 }
0x234d   :  { %3497 = vtanh.f32 %v2746_v41  ;;  %v3159_v38 = vmul.f32 -1.442695, %v2746_v41 }
0x234e   :  { %3499 = vrcp.f32 %v2691_v18 }
0x234f   :  { %3501 = vpow2.f32 %v3159_v38 }
0x2352   :  { %v2744_v47 = vpop.f32.mrf.mxu3 }
0x2353   :  { %v3498_v56 = vpop.eup %3497 }
0x2354   :  { %2769 = vrot.lane.b32.xlu0 %v3498_v56, %s3815_s29  ;;  %v3500_v39 = vpop.eup %3499 }
0x2355   :  { %v2693_v46 = vmul.f32 %v3500_v39, %v2691_v18  ;;  %vm2698_vm3 = vweird.f32 %v3500_v39  ;;  %v3502_v28 = vpop.eup %3501 }
0x2356   :  { %vm2699_vm5 = vmor %vm2697_vm4, %vm2698_vm3  ;;  %v2750_v31 = vadd.f32 1.0, %v3502_v28 }
0x2357   :  { %v2694_v30 = vsub.f32 1.0, %v2693_v46 }
0x2358   :  { %3503 = vrcp.f32 %v2750_v31  ;;  %v2762_v24 = vand.u32 2147483648, %v2750_v31  ;;  %vm2756_vm8 = vweird.f32 %v2750_v31  ;;  %v2760_v52 = vand.u32 2147483647, %v2750_v31 }
0x2359   :  { %v2695_v13 = vmul.f32 %v3500_v39, %v2694_v30 }
0x235a   :  { %v2763_v27 = vor.u32 1.1754944e-38, %v2762_v24  ;;  %vm2761_vm11 = vcmp.eq.f32.partialorder %v2760_v52, 8.507059e+37 }
0x235b   :  { %v2696_v45 = vadd.f32 %v3500_v39, %v2695_v13 }
0x235d   :  { %v2700_v12 = vsel %vm2699_vm5, %v3500_v39, %v2696_v45 }
0x235e   :  { %v2705_v58 = vsel %vm2702_vm6, %v2704_v57, %v2700_v12  ;;  %v3504_v23 = vpop.eup %3503 }
0x235f   :  { %v2752_v59 = vmul.f32 %v3504_v23, %v2750_v31  ;;  %vm2757_vm7 = vweird.f32 %v3504_v23  ;;  %v2708_v22 = vmul.f32 %v2705_v58, %v4501_v3  ;;  %v3229_v3 = vld [vmem:[#allocation20 + $0x8] sm:$0xff] }
0x2360   :  { %vm2758_vm10 = vmor %vm2756_vm8, %vm2757_vm7  ;;  %2849 = vmatpush.bf16.msra.mxu1 %v3229_v3 }
0x2361   :  { %v2753_v42 = vsub.f32 1.0, %v2752_v59 }
0x2363   :  { %v2754_v33 = vmul.f32 %v3504_v23, %v2753_v42 }
0x2364   :  { %2850 = vmatpush.bf16.msra.mxu1 %v3228_v26 }
0x2365   :  { %v2755_v51 = vadd.f32 %v3504_v23, %v2754_v33 }
0x2367   :  { %v2759_v37 = vsel %vm2758_vm10, %v3504_v23, %v2755_v51 }
0x2368   :  { %v2764_v14 = vsel %vm2761_vm11, %v2763_v27, %v2759_v37 }
0x2369   :  { %v2767_v0 = vmul.f32 %v2764_v14, %v4506_v15  ;;  %v3231_v15 = vld [vmem:[#allocation22 + $0x8] sm:$0xff] }
0x236a   :  { %2818 = vmatpush.bf16.msra.mxu0 %v3231_v15 }
0x236e   :  { %2819 = vmatpush.bf16.msra.mxu0 %v3230_v63 }
0x2376   :  { %v2711_v32 = vpop.permute.xlu2 %2710 }
0x2377   :  { %v2713_v19 = vmul.f32 %v2711_v32, %v2705_v58 }
0x2379   :  { %2715 = vrot.lane.b32.xlu1 %v2713_v19, %s3828_s26 }
0x23c6   :  { %v2770_v35 = vpop.permute.xlu0 %2769 }
0x23c7   :  { %v2772_v7 = vmul.f32 %v2770_v35, %v2764_v14 }
0x23c9   :  { %2774 = vrot.lane.b32.xlu2 %v2772_v7, %s3828_s26 }
0x23eb   :  { %v2716_v29 = vpop.permute.xlu1 %2715 }
0x23ec   :  { %v2718_v16 = vadd.f32 %v2716_v29, %v2708_v22 }
0x23ee   :  { %3505 = vtanh.f32 %v2718_v16 }
0x23f4   :  { %v3506_v61 = vpop.eup %3505 }
0x23f5   :  { %2721 = vrot.lane.b32.xlu0 %v3506_v61, %s3815_s29 }
0x2423   :  { %v2775_v60 = vpop.permute.xlu2 %2774 }
0x2424   :  { %v2777_v25 = vadd.f32 %v2775_v60, %v2767_v0 }
0x2426   :  { %3507 = vtanh.f32 %v2777_v25 }
0x242c   :  { %v3508_v1 = vpop.eup %3507 }
0x242d   :  { %2780 = vrot.lane.b32.xlu1 %v3508_v1, %s3815_s29 }
0x2467   :  { %v2722_v2 = vpop.permute.xlu0 %2721 }
0x2468   :  { %v2724_v50 = vmul.f32 %v2722_v2, %v2705_v58 }
0x246a   :  { %v2784_v4 = vpack.c.bf16 %v2724_v50, %v2724_v50 }
0x246c   :  { %2826 = vrot.lane.b32.xlu0 %v2784_v4, %s3828_s26 }
0x249f   :  { %v2781_v8 = vpop.permute.xlu1 %2780 }
0x24a0   :  { %v2783_v54 = vmul.f32 %v2781_v8, %v2764_v14 }
0x24a2   :  { %v2789_v6 = vpack.c.bf16 %v2783_v54, %v2783_v54 }
0x24a4   :  { %2795 = vrot.lane.b32.xlu2 %v2789_v6, %s3828_s26 }
0x24de   :  { %v2827_v36 = vpop.permute.xlu0 %2826 }
0x24df   :  { %3177 = vmatmul.msk.bf16.vlgmr.msra.gmra.mxu1 %vm376_vm9, %v2827_v36 }
0x24fe   :  { %v2796_v11 = vpop.permute.xlu2 %2795 }
0x24ff   :  { %3168 = vmatmul.msk.bf16.vlgmr.msra.gmra.mxu0 %vm376_vm9, %v2796_v11 }
0x255c   :  { %v2852_v49 = vpop.f32.mrf.mxu1 }
0x2564   :  { %v2854_v10 = vpop.f32.mrf.mxu1 }
0x257c   :  { %v2821_v5 = vpop.f32.mrf.mxu0 }
0x257d   :  { %v2853_v48 = vadd.f32 %v2852_v49, %v2821_v5 }
0x257f   :  { %v2860_v17 = vadd.f32 %v3252_v21, %v2853_v48 }
0x2581   :  { %2861 = vst [vmem:[#allocation23] sm:$0xff] %v2860_v17 }
0x2582   :  { %2872 = dma.vmem_to_hbm [thread:$0]  %s2868_s10, 128, %s2870_s13, [#allocation7]  }
0x2584   :  { %v2823_v9 = vpop.f32.mrf.mxu0 }
0x2585   :  { %3812 = dma.done.wait [#allocation7], 128  }
0x2586   :  { %3813 = vsyncadd [#allocation7], 4294967168 }
0x2587   :  { %2877 = vsyncpa [#allocation6], 1 }
0x2588   :  { %2878 = vsyncpa [#allocation9], 1 }
0x2589   :  { %2879 = vsyncpa [#allocation12], 1 }
0x258a   :  { %2880 = vsyncpa [#allocation15], 1 }
0x258b   :  { %2881 = vsyncpa [#allocation18], 1 }
0x258c   :  { %2882 = vsyncpa [#allocation21], 1 }
0x258d   :  { %2883 = vsyncpa [#allocation7], 1 }

</bundles_post_ra>
